<compile_context>
chip_gen: v7x
topology: tpu7x:2x2x1
jax: 0.10.0
libtpu: 0.0.40
codegen_flags: <defaults>
</compile_context>

<pallas_src>
import math

import jax
import jax.numpy as jnp
from jax.experimental import pallas as pl
from jax.experimental.pallas import tpu as pltpu

# ----------------------------- config ---------------------------------------
BATCH = 2
CHANNELS = 3
IMAGE = 16
PATCH = 4
HIDDEN = 32
HEADS = 4
HEAD_DIM = HIDDEN // HEADS
MLP_DIM = 4 * HIDDEN
LAYERS = 2
NUM_CLASSES = 10
CLS_PAD = 128                    # lane-dense padded classifier width
LN_EPS = 1e-12                   # HF ViT default layer_norm_eps

NUM_PATCHES = (IMAGE // PATCH) ** 2
SEQ = NUM_PATCHES + 1            # +1 for CLS token
ROWS = BATCH * SEQ               # flattened (batch, seq) rows
PATCH_DIM = CHANNELS * PATCH * PATCH
ATT_SCALE = 1.0 / math.sqrt(HEAD_DIM)
INV_SQRT2 = 1.0 / math.sqrt(2.0)


# ----------------------------- kernel helpers --------------------------------
def _ln(x, g, b):
    # layernorm over the last axis, f32 math (g, b are (1, H) rows)
    m = jnp.mean(x, axis=-1, keepdims=True)
    v = jnp.mean((x - m) ** 2, axis=-1, keepdims=True)
    return (x - m) * jax.lax.rsqrt(v + LN_EPS) * g + b


# ----------------------------- the fused kernel -------------------------------
def _vit_kernel(
    patches_ref, pw_ref, pb_ref, cls_ref, pos_ref,           # embedding
    ln1g_ref, ln1b_ref, wqkv_ref, bqkv_ref, wo_ref, bo_ref,   # attn (stacked)
    ln2g_ref, ln2b_ref, w1_ref, b1_ref, w2_ref, b2_ref,       # mlp  (stacked)
    lnfg_ref, lnfb_ref, wcls_ref, bcls_ref,                   # final LN + head
    logits_ref,                                               # output (B, 128)
    h_sc,                                                     # VMEM (B*SEQ, H)
    ctx_sc,                                                   # VMEM (B*SEQ, H)
    cls_sc,                                                   # VMEM (B, H)
):
    layer = pl.program_id(0)
    last = pl.num_programs(0) - 1

    # ---- grid step 0: patch embedding + [CLS] + positional embedding --------
    # Direct ref-slice stores; no in-kernel concatenates.
    @pl.when(layer == 0)
    def _():
        emb = (
            jnp.dot(patches_ref[...], pw_ref[...], preferred_element_type=jnp.float32)
            + pb_ref[...]
        )  # (B*N, H)
        for b in range(BATCH):
            h_sc[b * SEQ:b * SEQ + 1, :] = cls_ref[...] + pos_ref[0:1, :]
            h_sc[b * SEQ + 1:(b + 1) * SEQ, :] = (
                emb[b * NUM_PATCHES:(b + 1) * NUM_PATCHES, :] + pos_ref[1:, :]
            )

    h = h_sc[...]                                       # (B*SEQ, H), VMEM-resident

    # --- attention block (pre-LN), batch-flattened fused QKV projection -------
    # Softmax scale is pre-folded into the Q columns of w_qkv at init time.
    x = _ln(h, ln1g_ref[...], ln1b_ref[...])
    qkv = (
        jnp.dot(x, wqkv_ref[...], preferred_element_type=jnp.float32)
        + bqkv_ref[...]
    )  # (B*SEQ, 3H)

    # Scores/ctx are block-diagonal over batch -> per-batch, per-head matmuls.
    # Each head's ctx is written into ctx_sc at lane offset h*HEAD_DIM so the
    # output projection can be done once on the full slab.
    for b in range(BATCH):
        r0 = b * SEQ
        for hh in range(HEADS):
            c0 = hh * HEAD_DIM
            q = qkv[r0:r0 + SEQ, c0:c0 + HEAD_DIM]
            k = qkv[r0:r0 + SEQ, HIDDEN + c0:HIDDEN + c0 + HEAD_DIM]
            v = qkv[r0:r0 + SEQ, 2 * HIDDEN + c0:2 * HIDDEN + c0 + HEAD_DIM]

            s = jnp.dot(q, k.T, preferred_element_type=jnp.float32)  # (SEQ, SEQ)
            s = s - jnp.max(s, axis=-1, keepdims=True)
            p = jnp.exp(s)
            p = p / jnp.sum(p, axis=-1, keepdims=True)               # exact softmax
            ctx_sc[r0:r0 + SEQ, c0:c0 + HEAD_DIM] = jnp.dot(
                p, v, preferred_element_type=jnp.float32
            )

    # Single output projection over the whole (B*SEQ, H) slab + fused residual.
    h = h + (
        jnp.dot(ctx_sc[...], wo_ref[...], preferred_element_type=jnp.float32)
        + bo_ref[...]
    )

    # --- MLP block (pre-LN), fused erf-GELU, fused residual -------------------
    x2 = _ln(h, ln2g_ref[...], ln2b_ref[...])
    mid = jnp.dot(x2, w1_ref[...], preferred_element_type=jnp.float32) + b1_ref[...]
    mid = 0.5 * mid * (1.0 + jax.lax.erf(mid * INV_SQRT2))
    h = h + jnp.dot(mid, w2_ref[...], preferred_element_type=jnp.float32) + b2_ref[...]

    h_sc[...] = h

    # --- final LN + classifier: only on the LAST layer, on CLS rows only ------
    @pl.when(layer == last)
    def _():
        for b in range(BATCH):
            cls_sc[b:b + 1, :] = h[b * SEQ:b * SEQ + 1, :]
        cls_n = _ln(cls_sc[...], lnfg_ref[...], lnfb_ref[...])      # (B, H)
        logits_ref[...] = (
            jnp.dot(cls_n, wcls_ref[...], preferred_element_type=jnp.float32)
            + bcls_ref[...]
        ).astype(logits_ref.dtype)


# ----------------------------- parameters ------------------------------------
def init_params(key):
    def normal(k, shape, scale=0.02):
        return scale * jax.random.normal(k, shape, dtype=jnp.float32)

    keys = iter(jax.random.split(key, 8))
    p = {}
    p["patch_w"] = normal(next(keys), (PATCH_DIM, HIDDEN))
    p["patch_b"] = jnp.zeros((1, HIDDEN), jnp.float32)
    p["cls_token"] = normal(next(keys), (1, HIDDEN))
    p["pos_emb"] = normal(next(keys), (SEQ, HIDDEN))

    # per-layer weights stacked on a leading layer axis (indexed by the grid)
    p["ln1_g"] = jnp.ones((LAYERS, 1, HIDDEN), jnp.float32)
    p["ln1_b"] = jnp.zeros((LAYERS, 1, HIDDEN), jnp.float32)
    w_qkv = normal(next(keys), (LAYERS, HIDDEN, 3 * HIDDEN))   # [Wq | Wk | Wv]
    # Fold the attention softmax scale 1/sqrt(head_dim) into the Q projection
    # (q/sqrt(d)) @ k^T == (q @ k^T)/sqrt(d); saves a per-layer VPU multiply.
    p["w_qkv"] = w_qkv.at[:, :, :HIDDEN].multiply(ATT_SCALE)
    p["b_qkv"] = jnp.zeros((LAYERS, 1, 3 * HIDDEN), jnp.float32)  # (Q bias would be scaled too)
    p["wo"] = normal(next(keys), (LAYERS, HIDDEN, HIDDEN))
    p["bo"] = jnp.zeros((LAYERS, 1, HIDDEN), jnp.float32)
    p["ln2_g"] = jnp.ones((LAYERS, 1, HIDDEN), jnp.float32)
    p["ln2_b"] = jnp.zeros((LAYERS, 1, HIDDEN), jnp.float32)
    p["w1"] = normal(next(keys), (LAYERS, HIDDEN, MLP_DIM))
    p["b1"] = jnp.zeros((LAYERS, 1, MLP_DIM), jnp.float32)
    p["w2"] = normal(next(keys), (LAYERS, MLP_DIM, HIDDEN))
    p["b2"] = jnp.zeros((LAYERS, 1, HIDDEN), jnp.float32)

    p["ln_f_g"] = jnp.ones((1, HIDDEN), jnp.float32)
    p["ln_f_b"] = jnp.zeros((1, HIDDEN), jnp.float32)

    # classifier: xavier_uniform weight, zero bias (as in the module __init__),
    # zero-padded to a lane-dense 128-wide output (padded classes sliced off
    # outside; logits for pads are exactly 0 and never used).
    bound = math.sqrt(6.0 / (HIDDEN + NUM_CLASSES))
    cls_w = jax.random.uniform(
        next(keys), (HIDDEN, NUM_CLASSES), jnp.float32, -bound, bound
    )
    p["cls_w_pad"] = (
        jnp.zeros((HIDDEN, CLS_PAD), jnp.float32).at[:, :NUM_CLASSES].set(cls_w)
    )
    p["cls_b_pad"] = jnp.zeros((1, CLS_PAD), jnp.float32)
    return p


# ----------------------------- forward ---------------------------------------
def vit_forward(params, x):
    # x: (B, C, H, W) NCHW, same as the PyTorch module.
    B, C, H, W = x.shape
    nh, nw = H // PATCH, W // PATCH
    N = nh * nw

    # patch extraction (glue): strided conv == per-patch linear; flatten each
    # patch in (c, ph, pw) order to match torch Conv2d weight flattening.
    patches = (
        x.reshape(B, C, nh, PATCH, nw, PATCH)
        .transpose(0, 2, 4, 1, 3, 5)
        .reshape(B * N, C * PATCH * PATCH)
    )

    sq = pl.Squeezed()  # squeeze the stacked layer axis out of the kernel refs

    grid_spec = pltpu.PrefetchScalarGridSpec(
        num_scalar_prefetch=0,
        grid=(LAYERS,),
        in_specs=[
            pl.BlockSpec((BATCH * NUM_PATCHES, PATCH_DIM), lambda l: (0, 0)),  # patches
            pl.BlockSpec((PATCH_DIM, HIDDEN), lambda l: (0, 0)),               # patch_w
            pl.BlockSpec((1, HIDDEN), lambda l: (0, 0)),                       # patch_b
            pl.BlockSpec((1, HIDDEN), lambda l: (0, 0)),                       # cls_token
            pl.BlockSpec((SEQ, HIDDEN), lambda l: (0, 0)),                     # pos_emb
            pl.BlockSpec((sq, 1, HIDDEN), lambda l: (l, 0, 0)),                # ln1_g
            pl.BlockSpec((sq, 1, HIDDEN), lambda l: (l, 0, 0)),                # ln1_b
            pl.BlockSpec((sq, HIDDEN, 3 * HIDDEN), lambda l: (l, 0, 0)),       # w_qkv
            pl.BlockSpec((sq, 1, 3 * HIDDEN), lambda l: (l, 0, 0)),            # b_qkv
            pl.BlockSpec((sq, HIDDEN, HIDDEN), lambda l: (l, 0, 0)),           # wo
            pl.BlockSpec((sq, 1, HIDDEN), lambda l: (l, 0, 0)),                # bo
            pl.BlockSpec((sq, 1, HIDDEN), lambda l: (l, 0, 0)),                # ln2_g
            pl.BlockSpec((sq, 1, HIDDEN), lambda l: (l, 0, 0)),                # ln2_b
            pl.BlockSpec((sq, HIDDEN, MLP_DIM), lambda l: (l, 0, 0)),          # w1
            pl.BlockSpec((sq, 1, MLP_DIM), lambda l: (l, 0, 0)),               # b1
            pl.BlockSpec((sq, MLP_DIM, HIDDEN), lambda l: (l, 0, 0)),          # w2
            pl.BlockSpec((sq, 1, HIDDEN), lambda l: (l, 0, 0)),                # b2
            pl.BlockSpec((1, HIDDEN), lambda l: (0, 0)),                       # ln_f_g
            pl.BlockSpec((1, HIDDEN), lambda l: (0, 0)),                       # ln_f_b
            pl.BlockSpec((HIDDEN, CLS_PAD), lambda l: (0, 0)),                 # cls_w_pad
            pl.BlockSpec((1, CLS_PAD), lambda l: (0, 0)),                      # cls_b_pad
        ],
        out_specs=pl.BlockSpec((BATCH, CLS_PAD), lambda l: (0, 0)),
        scratch_shapes=[
            pltpu.VMEM((ROWS, HIDDEN), jnp.float32),    # resident hidden state
            pltpu.VMEM((ROWS, HIDDEN), jnp.float32),    # per-head ctx assembly slab
            pltpu.VMEM((BATCH, HIDDEN), jnp.float32),   # CLS-row gather
        ],
    )

    logits_pad = pl.pallas_call(
        _vit_kernel,
        out_shape=jax.ShapeDtypeStruct((BATCH, CLS_PAD), jnp.float32),
        grid_spec=grid_spec,
        compiler_params=pltpu.CompilerParams(
            dimension_semantics=("arbitrary",),
        ),
    )(
        patches,
        params["patch_w"], params["patch_b"],
        params["cls_token"], params["pos_emb"],
        params["ln1_g"], params["ln1_b"],
        params["w_qkv"], params["b_qkv"],
        params["wo"], params["bo"],
        params["ln2_g"], params["ln2_b"],
        params["w1"], params["b1"],
        params["w2"], params["b2"],
        params["ln_f_g"], params["ln_f_b"],
        params["cls_w_pad"], params["cls_b_pad"],
    )
    return logits_pad[:, :NUM_CLASSES]


# TODO(synk): freeze_layers/num_frozen_blocks only affect requires_grad
# (training), not the forward pass, so they have no kernel equivalent here.
# TODO(synk): pretrained 'google/vit-base-patch16-224-in21k' weights are
# replaced by deterministic synthetic weights (no file/network access).

# ----------------------------- main ------------------------------------------
if __name__ == "__main__":
    key = jax.random.PRNGKey(0)
    pkey, xkey = jax.random.split(key)
    params = init_params(pkey)
    x = jax.random.normal(xkey, (BATCH, CHANNELS, IMAGE, IMAGE), dtype=jnp.float32)

    vit = jax.jit(vit_forward)
    logits = vit(params, x)
    logits = jax.block_until_ready(logits)

    assert logits.shape == (BATCH, NUM_CLASSES), logits.shape
    assert logits.dtype == jnp.float32
    assert bool(jnp.all(jnp.isfinite(logits)))
    print("KERNEL_OK")
</pallas_src>

<mosaic_0001>
module attributes {stable_mosaic.version = 11 : i64} {
  func.func @_vit_kernel(%arg0: i32, %arg1: memref<32x48xf32, #tpu.memory_space<vmem>>, %arg2: memref<48x32xf32, #tpu.memory_space<vmem>>, %arg3: memref<1x32xf32, #tpu.memory_space<vmem>>, %arg4: memref<1x32xf32, #tpu.memory_space<vmem>>, %arg5: memref<17x32xf32, #tpu.memory_space<vmem>>, %arg6: memref<1x1x32xf32, #tpu.memory_space<vmem>>, %arg7: memref<1x1x32xf32, #tpu.memory_space<vmem>>, %arg8: memref<1x32x96xf32, #tpu.memory_space<vmem>>, %arg9: memref<1x1x96xf32, #tpu.memory_space<vmem>>, %arg10: memref<1x32x32xf32, #tpu.memory_space<vmem>>, %arg11: memref<1x1x32xf32, #tpu.memory_space<vmem>>, %arg12: memref<1x1x32xf32, #tpu.memory_space<vmem>>, %arg13: memref<1x1x32xf32, #tpu.memory_space<vmem>>, %arg14: memref<1x32x128xf32, #tpu.memory_space<vmem>>, %arg15: memref<1x1x128xf32, #tpu.memory_space<vmem>>, %arg16: memref<1x128x32xf32, #tpu.memory_space<vmem>>, %arg17: memref<1x1x32xf32, #tpu.memory_space<vmem>>, %arg18: memref<1x32xf32, #tpu.memory_space<vmem>>, %arg19: memref<1x32xf32, #tpu.memory_space<vmem>>, %arg20: memref<32x128xf32, #tpu.memory_space<vmem>>, %arg21: memref<1x128xf32, #tpu.memory_space<vmem>>, %arg22: memref<2x128xf32, #tpu.memory_space<vmem>>, %arg23: memref<34x32xf32, #tpu.memory_space<vmem>>, %arg24: memref<34x32xf32, #tpu.memory_space<vmem>>, %arg25: memref<2x32xf32, #tpu.memory_space<vmem>>) attributes {dimension_semantics = [#tpu.dimension_semantics<arbitrary>], iteration_bounds = array<i64: 2>, scalar_prefetch = 0 : i64, scratch_operands = 3 : i64, tpu.core_type = #tpu.core_type<tc>, window_params = [{pipeline_mode = #tpu.pipeline_mode<synchronous>, transform_indices = @transform_0, window_bounds = array<i64: 32, 48>}, {pipeline_mode = #tpu.pipeline_mode<synchronous>, transform_indices = @transform_1, window_bounds = array<i64: 48, 32>}, {pipeline_mode = #tpu.pipeline_mode<synchronous>, transform_indices = @transform_2, window_bounds = array<i64: 1, 32>}, {pipeline_mode = #tpu.pipeline_mode<synchronous>, transform_indices = @transform_3, window_bounds = array<i64: 1, 32>}, {pipeline_mode = #tpu.pipeline_mode<synchronous>, transform_indices = @transform_4, window_bounds = array<i64: 17, 32>}, {transform_indices = @transform_5, window_bounds = array<i64: 1, 1, 32>}, {transform_indices = @transform_6, window_bounds = array<i64: 1, 1, 32>}, {transform_indices = @transform_7, window_bounds = array<i64: 1, 32, 96>}, {transform_indices = @transform_8, window_bounds = array<i64: 1, 1, 96>}, {transform_indices = @transform_9, window_bounds = array<i64: 1, 32, 32>}, {transform_indices = @transform_10, window_bounds = array<i64: 1, 1, 32>}, {transform_indices = @transform_11, window_bounds = array<i64: 1, 1, 32>}, {transform_indices = @transform_12, window_bounds = array<i64: 1, 1, 32>}, {transform_indices = @transform_13, window_bounds = array<i64: 1, 32, 128>}, {transform_indices = @transform_14, window_bounds = array<i64: 1, 1, 128>}, {transform_indices = @transform_15, window_bounds = array<i64: 1, 128, 32>}, {transform_indices = @transform_16, window_bounds = array<i64: 1, 1, 32>}, {pipeline_mode = #tpu.pipeline_mode<synchronous>, transform_indices = @transform_17, window_bounds = array<i64: 1, 32>}, {pipeline_mode = #tpu.pipeline_mode<synchronous>, transform_indices = @transform_18, window_bounds = array<i64: 1, 32>}, {pipeline_mode = #tpu.pipeline_mode<synchronous>, transform_indices = @transform_19, window_bounds = array<i64: 32, 128>}, {pipeline_mode = #tpu.pipeline_mode<synchronous>, transform_indices = @transform_20, window_bounds = array<i64: 1, 128>}, {pipeline_mode = #tpu.pipeline_mode<synchronous>, transform_indices = @transform_21, window_bounds = array<i64: 2, 128>}]} {
    %c0_i32 = arith.constant 0 : i32
    %0 = arith.cmpi eq, %arg0, %c0_i32 : i32
    %1 = arith.extui %0 : i1 to i32
    %c0_i32_0 = arith.constant 0 : i32
    %2 = arith.cmpi ne, %1, %c0_i32_0 : i32
    scf.if %2 {
      %c0_103 = arith.constant 0 : index
      %c0_104 = arith.constant 0 : index
      %227 = vector.load %arg1[%c0_103, %c0_104] : memref<32x48xf32, #tpu.memory_space<vmem>>, vector<32x48xf32>
      %c0_105 = arith.constant 0 : index
      %c0_106 = arith.constant 0 : index
      %228 = vector.load %arg2[%c0_105, %c0_106] : memref<48x32xf32, #tpu.memory_space<vmem>>, vector<48x32xf32>
      %cst_107 = arith.constant dense<0.000000e+00> : vector<32x32xf32>
      %229 = tpu.matmul %227, %228, %cst_107 {dimension_numbers = #tpu.dot_dimension_numbers<[1], [0], [0], [1], [0, 0, 1, 1], [], []>} : vector<32x48xf32>, vector<48x32xf32>, vector<32x32xf32> -> vector<32x32xf32>
      %c0_108 = arith.constant 0 : index
      %c0_109 = arith.constant 0 : index
      %230 = vector.load %arg3[%c0_108, %c0_109] : memref<1x32xf32, #tpu.memory_space<vmem>>, vector<1x32xf32>
      %231 = vector.broadcast %230 : vector<1x32xf32> to vector<32x32xf32>
      %232 = arith.addf %229, %231 : vector<32x32xf32>
      %c0_110 = arith.constant 0 : index
      %c0_111 = arith.constant 0 : index
      %233 = vector.load %arg4[%c0_110, %c0_111] : memref<1x32xf32, #tpu.memory_space<vmem>>, vector<1x32xf32>
      %c0_112 = arith.constant 0 : index
      %c0_113 = arith.constant 0 : index
      %234 = vector.load %arg5[%c0_112, %c0_113] : memref<17x32xf32, #tpu.memory_space<vmem>>, vector<1x32xf32>
      %235 = arith.addf %233, %234 : vector<1x32xf32>
      %c0_114 = arith.constant 0 : index
      %c0_115 = arith.constant 0 : index
      %236 = vector.load %arg23[%c0_114, %c0_115] : memref<34x32xf32, #tpu.memory_space<vmem>>, vector<1x32xf32>
      tpu.vector_store %arg23[%c0_114, %c0_115], %235 {strides = array<i32>} : memref<34x32xf32, #tpu.memory_space<vmem>>, vector<1x32xf32>,
      %237 = vector.extract_strided_slice %232 {offsets = [0, 0], sizes = [16, 32], strides = [1, 1]} : vector<32x32xf32> to vector<16x32xf32>
      %c1 = arith.constant 1 : index
      %c0_116 = arith.constant 0 : index
      %238 = vector.load %arg5[%c1, %c0_116] : memref<17x32xf32, #tpu.memory_space<vmem>>, vector<16x32xf32>
      %239 = arith.addf %237, %238 : vector<16x32xf32>
      %c1_117 = arith.constant 1 : index
      %c0_118 = arith.constant 0 : index
      %240 = vector.load %arg23[%c1_117, %c0_118] : memref<34x32xf32, #tpu.memory_space<vmem>>, vector<16x32xf32>
      tpu.vector_store %arg23[%c1_117, %c0_118], %239 {strides = array<i32>} : memref<34x32xf32, #tpu.memory_space<vmem>>, vector<16x32xf32>,
      %c0_119 = arith.constant 0 : index
      %c0_120 = arith.constant 0 : index
      %241 = vector.load %arg4[%c0_119, %c0_120] : memref<1x32xf32, #tpu.memory_space<vmem>>, vector<1x32xf32>
      %c0_121 = arith.constant 0 : index
      %c0_122 = arith.constant 0 : index
      %242 = vector.load %arg5[%c0_121, %c0_122] : memref<17x32xf32, #tpu.memory_space<vmem>>, vector<1x32xf32>
      %243 = arith.addf %241, %242 : vector<1x32xf32>
      %c17_123 = arith.constant 17 : index
      %c0_124 = arith.constant 0 : index
      %244 = vector.load %arg23[%c17_123, %c0_124] : memref<34x32xf32, #tpu.memory_space<vmem>>, vector<1x32xf32>
      tpu.vector_store %arg23[%c17_123, %c0_124], %243 {strides = array<i32>} : memref<34x32xf32, #tpu.memory_space<vmem>>, vector<1x32xf32>,
      %245 = vector.extract_strided_slice %232 {offsets = [16, 0], sizes = [16, 32], strides = [1, 1]} : vector<32x32xf32> to vector<16x32xf32>
      %c1_125 = arith.constant 1 : index
      %c0_126 = arith.constant 0 : index
      %246 = vector.load %arg5[%c1_125, %c0_126] : memref<17x32xf32, #tpu.memory_space<vmem>>, vector<16x32xf32>
      %247 = arith.addf %245, %246 : vector<16x32xf32>
      %c18 = arith.constant 18 : index
      %c0_127 = arith.constant 0 : index
      %248 = vector.load %arg23[%c18, %c0_127] : memref<34x32xf32, #tpu.memory_space<vmem>>, vector<16x32xf32>
      tpu.vector_store %arg23[%c18, %c0_127], %247 {strides = array<i32>} : memref<34x32xf32, #tpu.memory_space<vmem>>, vector<16x32xf32>,
    } else {
    }
    %c0 = arith.constant 0 : index
    %c0_1 = arith.constant 0 : index
    %3 = vector.load %arg23[%c0, %c0_1] : memref<34x32xf32, #tpu.memory_space<vmem>>, vector<34x32xf32>
    %c0_2 = arith.constant 0 : index
    %c0_3 = arith.constant 0 : index
    %c0_4 = arith.constant 0 : index
    %4 = vector.load %arg6[%c0_2, %c0_3, %c0_4] : memref<1x1x32xf32, #tpu.memory_space<vmem>>, vector<1x1x32xf32>
    %5 = vector.shape_cast %4 : vector<1x1x32xf32> to vector<1x32xf32>
    %c0_5 = arith.constant 0 : index
    %c0_6 = arith.constant 0 : index
    %c0_7 = arith.constant 0 : index
    %6 = vector.load %arg7[%c0_5, %c0_6, %c0_7] : memref<1x1x32xf32, #tpu.memory_space<vmem>>, vector<1x1x32xf32>
    %7 = vector.shape_cast %6 : vector<1x1x32xf32> to vector<1x32xf32>
    %cst = arith.constant dense<0.000000e+00> : vector<34xf32>
    %8 = vector.multi_reduction <add>, %3, %cst [1] : vector<34x32xf32> to vector<34xf32>
    %9 = vector.shape_cast %8 : vector<34xf32> to vector<34x1xf32>
    %cst_8 = arith.constant 3.200000e+01 : f32
    %10 = vector.broadcast %cst_8 : f32 to vector<34x1xf32>
    %11 = arith.divf %9, %10 : vector<34x1xf32>
    %12 = vector.broadcast %11 : vector<34x1xf32> to vector<34x32xf32>
    %13 = arith.subf %3, %12 : vector<34x32xf32>
    %14 = arith.mulf %13, %13 : vector<34x32xf32>
    %cst_9 = arith.constant dense<0.000000e+00> : vector<34xf32>
    %15 = vector.multi_reduction <add>, %14, %cst_9 [1] : vector<34x32xf32> to vector<34xf32>
    %16 = vector.shape_cast %15 : vector<34xf32> to vector<34x1xf32>
    %cst_10 = arith.constant 3.200000e+01 : f32
    %17 = vector.broadcast %cst_10 : f32 to vector<34x1xf32>
    %18 = arith.divf %16, %17 : vector<34x1xf32>
    %19 = vector.broadcast %11 : vector<34x1xf32> to vector<34x32xf32>
    %20 = arith.subf %3, %19 : vector<34x32xf32>
    %cst_11 = arith.constant 9.99999996E-13 : f32
    %21 = vector.broadcast %cst_11 : f32 to vector<34x1xf32>
    %22 = arith.addf %18, %21 : vector<34x1xf32>
    %23 = math.rsqrt %22 : vector<34x1xf32>
    %24 = vector.broadcast %23 : vector<34x1xf32> to vector<34x32xf32>
    %25 = arith.mulf %20, %24 : vector<34x32xf32>
    %26 = vector.broadcast %5 : vector<1x32xf32> to vector<34x32xf32>
    %27 = arith.mulf %25, %26 : vector<34x32xf32>
    %28 = vector.broadcast %7 : vector<1x32xf32> to vector<34x32xf32>
    %29 = arith.addf %27, %28 : vector<34x32xf32>
    %c0_12 = arith.constant 0 : index
    %c0_13 = arith.constant 0 : index
    %c0_14 = arith.constant 0 : index
    %30 = vector.load %arg8[%c0_12, %c0_13, %c0_14] : memref<1x32x96xf32, #tpu.memory_space<vmem>>, vector<1x32x96xf32>
    %31 = vector.shape_cast %30 : vector<1x32x96xf32> to vector<32x96xf32>
    %cst_15 = arith.constant dense<0.000000e+00> : vector<34x96xf32>
    %32 = tpu.matmul %29, %31, %cst_15 {dimension_numbers = #tpu.dot_dimension_numbers<[1], [0], [0], [1], [0, 0, 1, 1], [], []>} : vector<34x32xf32>, vector<32x96xf32>, vector<34x96xf32> -> vector<34x96xf32>
    %c0_16 = arith.constant 0 : index
    %c0_17 = arith.constant 0 : index
    %c0_18 = arith.constant 0 : index
    %33 = vector.load %arg9[%c0_16, %c0_17, %c0_18] : memref<1x1x96xf32, #tpu.memory_space<vmem>>, vector<1x1x96xf32>
    %34 = vector.shape_cast %33 : vector<1x1x96xf32> to vector<1x96xf32>
    %35 = vector.broadcast %34 : vector<1x96xf32> to vector<34x96xf32>
    %36 = arith.addf %32, %35 : vector<34x96xf32>
    %37 = vector.extract_strided_slice %36 {offsets = [0, 0], sizes = [17, 8], strides = [1, 1]} : vector<34x96xf32> to vector<17x8xf32>
    %38 = vector.extract_strided_slice %36 {offsets = [0, 32], sizes = [17, 8], strides = [1, 1]} : vector<34x96xf32> to vector<17x8xf32>
    %39 = vector.extract_strided_slice %36 {offsets = [0, 64], sizes = [17, 8], strides = [1, 1]} : vector<34x96xf32> to vector<17x8xf32>
    %40 = tpu.transpose %38, [1, 0] : vector<17x8xf32> -> vector<8x17xf32>
    %cst_19 = arith.constant dense<0.000000e+00> : vector<17x17xf32>
    %41 = tpu.matmul %37, %40, %cst_19 {dimension_numbers = #tpu.dot_dimension_numbers<[1], [0], [0], [1], [0, 0, 1, 1], [], []>} : vector<17x8xf32>, vector<8x17xf32>, vector<17x17xf32> -> vector<17x17xf32>
    %cst_20 = arith.constant dense<0xFF800000> : vector<17xf32>
    %42 = vector.multi_reduction <maximumf>, %41, %cst_20 [1] : vector<17x17xf32> to vector<17xf32>
    %43 = vector.shape_cast %42 : vector<17xf32> to vector<17x1xf32>
    %44 = vector.broadcast %43 : vector<17x1xf32> to vector<17x17xf32>
    %45 = arith.subf %41, %44 : vector<17x17xf32>
    %46 = math.exp %45 : vector<17x17xf32>
    %cst_21 = arith.constant dense<0.000000e+00> : vector<17xf32>
    %47 = vector.multi_reduction <add>, %46, %cst_21 [1] : vector<17x17xf32> to vector<17xf32>
    %48 = vector.shape_cast %47 : vector<17xf32> to vector<17x1xf32>
    %49 = vector.broadcast %48 : vector<17x1xf32> to vector<17x17xf32>
    %50 = arith.divf %46, %49 : vector<17x17xf32>
    %cst_22 = arith.constant dense<0.000000e+00> : vector<17x8xf32>
    %51 = tpu.matmul %50, %39, %cst_22 {dimension_numbers = #tpu.dot_dimension_numbers<[1], [0], [0], [1], [0, 0, 1, 1], [], []>} : vector<17x17xf32>, vector<17x8xf32>, vector<17x8xf32> -> vector<17x8xf32>
    %c0_23 = arith.constant 0 : index
    %c0_24 = arith.constant 0 : index
    %52 = vector.load %arg24[%c0_23, %c0_24] : memref<34x32xf32, #tpu.memory_space<vmem>>, vector<17x8xf32>
    tpu.vector_store %arg24[%c0_23, %c0_24], %51 {strides = array<i32>} : memref<34x32xf32, #tpu.memory_space<vmem>>, vector<17x8xf32>,
    %53 = vector.extract_strided_slice %36 {offsets = [0, 8], sizes = [17, 8], strides = [1, 1]} : vector<34x96xf32> to vector<17x8xf32>
    %54 = vector.extract_strided_slice %36 {offsets = [0, 40], sizes = [17, 8], strides = [1, 1]} : vector<34x96xf32> to vector<17x8xf32>
    %55 = vector.extract_strided_slice %36 {offsets = [0, 72], sizes = [17, 8], strides = [1, 1]} : vector<34x96xf32> to vector<17x8xf32>
    %56 = tpu.transpose %54, [1, 0] : vector<17x8xf32> -> vector<8x17xf32>
    %cst_25 = arith.constant dense<0.000000e+00> : vector<17x17xf32>
    %57 = tpu.matmul %53, %56, %cst_25 {dimension_numbers = #tpu.dot_dimension_numbers<[1], [0], [0], [1], [0, 0, 1, 1], [], []>} : vector<17x8xf32>, vector<8x17xf32>, vector<17x17xf32> -> vector<17x17xf32>
    %cst_26 = arith.constant dense<0xFF800000> : vector<17xf32>
    %58 = vector.multi_reduction <maximumf>, %57, %cst_26 [1] : vector<17x17xf32> to vector<17xf32>
    %59 = vector.shape_cast %58 : vector<17xf32> to vector<17x1xf32>
    %60 = vector.broadcast %59 : vector<17x1xf32> to vector<17x17xf32>
    %61 = arith.subf %57, %60 : vector<17x17xf32>
    %62 = math.exp %61 : vector<17x17xf32>
    %cst_27 = arith.constant dense<0.000000e+00> : vector<17xf32>
    %63 = vector.multi_reduction <add>, %62, %cst_27 [1] : vector<17x17xf32> to vector<17xf32>
    %64 = vector.shape_cast %63 : vector<17xf32> to vector<17x1xf32>
    %65 = vector.broadcast %64 : vector<17x1xf32> to vector<17x17xf32>
    %66 = arith.divf %62, %65 : vector<17x17xf32>
    %cst_28 = arith.constant dense<0.000000e+00> : vector<17x8xf32>
    %67 = tpu.matmul %66, %55, %cst_28 {dimension_numbers = #tpu.dot_dimension_numbers<[1], [0], [0], [1], [0, 0, 1, 1], [], []>} : vector<17x17xf32>, vector<17x8xf32>, vector<17x8xf32> -> vector<17x8xf32>
    %c0_29 = arith.constant 0 : index
    %c8 = arith.constant 8 : index
    %68 = vector.load %arg24[%c0_29, %c8] : memref<34x32xf32, #tpu.memory_space<vmem>>, vector<17x8xf32>
    tpu.vector_store %arg24[%c0_29, %c8], %67 {strides = array<i32>} : memref<34x32xf32, #tpu.memory_space<vmem>>, vector<17x8xf32>,
    %69 = vector.extract_strided_slice %36 {offsets = [0, 16], sizes = [17, 8], strides = [1, 1]} : vector<34x96xf32> to vector<17x8xf32>
    %70 = vector.extract_strided_slice %36 {offsets = [0, 48], sizes = [17, 8], strides = [1, 1]} : vector<34x96xf32> to vector<17x8xf32>
    %71 = vector.extract_strided_slice %36 {offsets = [0, 80], sizes = [17, 8], strides = [1, 1]} : vector<34x96xf32> to vector<17x8xf32>
    %72 = tpu.transpose %70, [1, 0] : vector<17x8xf32> -> vector<8x17xf32>
    %cst_30 = arith.constant dense<0.000000e+00> : vector<17x17xf32>
    %73 = tpu.matmul %69, %72, %cst_30 {dimension_numbers = #tpu.dot_dimension_numbers<[1], [0], [0], [1], [0, 0, 1, 1], [], []>} : vector<17x8xf32>, vector<8x17xf32>, vector<17x17xf32> -> vector<17x17xf32>
    %cst_31 = arith.constant dense<0xFF800000> : vector<17xf32>
    %74 = vector.multi_reduction <maximumf>, %73, %cst_31 [1] : vector<17x17xf32> to vector<17xf32>
    %75 = vector.shape_cast %74 : vector<17xf32> to vector<17x1xf32>
    %76 = vector.broadcast %75 : vector<17x1xf32> to vector<17x17xf32>
    %77 = arith.subf %73, %76 : vector<17x17xf32>
    %78 = math.exp %77 : vector<17x17xf32>
    %cst_32 = arith.constant dense<0.000000e+00> : vector<17xf32>
    %79 = vector.multi_reduction <add>, %78, %cst_32 [1] : vector<17x17xf32> to vector<17xf32>
    %80 = vector.shape_cast %79 : vector<17xf32> to vector<17x1xf32>
    %81 = vector.broadcast %80 : vector<17x1xf32> to vector<17x17xf32>
    %82 = arith.divf %78, %81 : vector<17x17xf32>
    %cst_33 = arith.constant dense<0.000000e+00> : vector<17x8xf32>
    %83 = tpu.matmul %82, %71, %cst_33 {dimension_numbers = #tpu.dot_dimension_numbers<[1], [0], [0], [1], [0, 0, 1, 1], [], []>} : vector<17x17xf32>, vector<17x8xf32>, vector<17x8xf32> -> vector<17x8xf32>
    %c0_34 = arith.constant 0 : index
    %c16 = arith.constant 16 : index
    %84 = vector.load %arg24[%c0_34, %c16] : memref<34x32xf32, #tpu.memory_space<vmem>>, vector<17x8xf32>
    tpu.vector_store %arg24[%c0_34, %c16], %83 {strides = array<i32>} : memref<34x32xf32, #tpu.memory_space<vmem>>, vector<17x8xf32>,
    %85 = vector.extract_strided_slice %36 {offsets = [0, 24], sizes = [17, 8], strides = [1, 1]} : vector<34x96xf32> to vector<17x8xf32>
    %86 = vector.extract_strided_slice %36 {offsets = [0, 56], sizes = [17, 8], strides = [1, 1]} : vector<34x96xf32> to vector<17x8xf32>
    %87 = vector.extract_strided_slice %36 {offsets = [0, 88], sizes = [17, 8], strides = [1, 1]} : vector<34x96xf32> to vector<17x8xf32>
    %88 = tpu.transpose %86, [1, 0] : vector<17x8xf32> -> vector<8x17xf32>
    %cst_35 = arith.constant dense<0.000000e+00> : vector<17x17xf32>
    %89 = tpu.matmul %85, %88, %cst_35 {dimension_numbers = #tpu.dot_dimension_numbers<[1], [0], [0], [1], [0, 0, 1, 1], [], []>} : vector<17x8xf32>, vector<8x17xf32>, vector<17x17xf32> -> vector<17x17xf32>
    %cst_36 = arith.constant dense<0xFF800000> : vector<17xf32>
    %90 = vector.multi_reduction <maximumf>, %89, %cst_36 [1] : vector<17x17xf32> to vector<17xf32>
    %91 = vector.shape_cast %90 : vector<17xf32> to vector<17x1xf32>
    %92 = vector.broadcast %91 : vector<17x1xf32> to vector<17x17xf32>
    %93 = arith.subf %89, %92 : vector<17x17xf32>
    %94 = math.exp %93 : vector<17x17xf32>
    %cst_37 = arith.constant dense<0.000000e+00> : vector<17xf32>
    %95 = vector.multi_reduction <add>, %94, %cst_37 [1] : vector<17x17xf32> to vector<17xf32>
    %96 = vector.shape_cast %95 : vector<17xf32> to vector<17x1xf32>
    %97 = vector.broadcast %96 : vector<17x1xf32> to vector<17x17xf32>
    %98 = arith.divf %94, %97 : vector<17x17xf32>
    %cst_38 = arith.constant dense<0.000000e+00> : vector<17x8xf32>
    %99 = tpu.matmul %98, %87, %cst_38 {dimension_numbers = #tpu.dot_dimension_numbers<[1], [0], [0], [1], [0, 0, 1, 1], [], []>} : vector<17x17xf32>, vector<17x8xf32>, vector<17x8xf32> -> vector<17x8xf32>
    %c0_39 = arith.constant 0 : index
    %c24 = arith.constant 24 : index
    %100 = vector.load %arg24[%c0_39, %c24] : memref<34x32xf32, #tpu.memory_space<vmem>>, vector<17x8xf32>
    tpu.vector_store %arg24[%c0_39, %c24], %99 {strides = array<i32>} : memref<34x32xf32, #tpu.memory_space<vmem>>, vector<17x8xf32>,
    %101 = vector.extract_strided_slice %36 {offsets = [17, 0], sizes = [17, 8], strides = [1, 1]} : vector<34x96xf32> to vector<17x8xf32>
    %102 = vector.extract_strided_slice %36 {offsets = [17, 32], sizes = [17, 8], strides = [1, 1]} : vector<34x96xf32> to vector<17x8xf32>
    %103 = vector.extract_strided_slice %36 {offsets = [17, 64], sizes = [17, 8], strides = [1, 1]} : vector<34x96xf32> to vector<17x8xf32>
    %104 = tpu.transpose %102, [1, 0] : vector<17x8xf32> -> vector<8x17xf32>
    %cst_40 = arith.constant dense<0.000000e+00> : vector<17x17xf32>
    %105 = tpu.matmul %101, %104, %cst_40 {dimension_numbers = #tpu.dot_dimension_numbers<[1], [0], [0], [1], [0, 0, 1, 1], [], []>} : vector<17x8xf32>, vector<8x17xf32>, vector<17x17xf32> -> vector<17x17xf32>
    %cst_41 = arith.constant dense<0xFF800000> : vector<17xf32>
    %106 = vector.multi_reduction <maximumf>, %105, %cst_41 [1] : vector<17x17xf32> to vector<17xf32>
    %107 = vector.shape_cast %106 : vector<17xf32> to vector<17x1xf32>
    %108 = vector.broadcast %107 : vector<17x1xf32> to vector<17x17xf32>
    %109 = arith.subf %105, %108 : vector<17x17xf32>
    %110 = math.exp %109 : vector<17x17xf32>
    %cst_42 = arith.constant dense<0.000000e+00> : vector<17xf32>
    %111 = vector.multi_reduction <add>, %110, %cst_42 [1] : vector<17x17xf32> to vector<17xf32>
    %112 = vector.shape_cast %111 : vector<17xf32> to vector<17x1xf32>
    %113 = vector.broadcast %112 : vector<17x1xf32> to vector<17x17xf32>
    %114 = arith.divf %110, %113 : vector<17x17xf32>
    %cst_43 = arith.constant dense<0.000000e+00> : vector<17x8xf32>
    %115 = tpu.matmul %114, %103, %cst_43 {dimension_numbers = #tpu.dot_dimension_numbers<[1], [0], [0], [1], [0, 0, 1, 1], [], []>} : vector<17x17xf32>, vector<17x8xf32>, vector<17x8xf32> -> vector<17x8xf32>
    %c17 = arith.constant 17 : index
    %c0_44 = arith.constant 0 : index
    %116 = vector.load %arg24[%c17, %c0_44] : memref<34x32xf32, #tpu.memory_space<vmem>>, vector<17x8xf32>
    tpu.vector_store %arg24[%c17, %c0_44], %115 {strides = array<i32>} : memref<34x32xf32, #tpu.memory_space<vmem>>, vector<17x8xf32>,
    %117 = vector.extract_strided_slice %36 {offsets = [17, 8], sizes = [17, 8], strides = [1, 1]} : vector<34x96xf32> to vector<17x8xf32>
    %118 = vector.extract_strided_slice %36 {offsets = [17, 40], sizes = [17, 8], strides = [1, 1]} : vector<34x96xf32> to vector<17x8xf32>
    %119 = vector.extract_strided_slice %36 {offsets = [17, 72], sizes = [17, 8], strides = [1, 1]} : vector<34x96xf32> to vector<17x8xf32>
    %120 = tpu.transpose %118, [1, 0] : vector<17x8xf32> -> vector<8x17xf32>
    %cst_45 = arith.constant dense<0.000000e+00> : vector<17x17xf32>
    %121 = tpu.matmul %117, %120, %cst_45 {dimension_numbers = #tpu.dot_dimension_numbers<[1], [0], [0], [1], [0, 0, 1, 1], [], []>} : vector<17x8xf32>, vector<8x17xf32>, vector<17x17xf32> -> vector<17x17xf32>
    %cst_46 = arith.constant dense<0xFF800000> : vector<17xf32>
    %122 = vector.multi_reduction <maximumf>, %121, %cst_46 [1] : vector<17x17xf32> to vector<17xf32>
    %123 = vector.shape_cast %122 : vector<17xf32> to vector<17x1xf32>
    %124 = vector.broadcast %123 : vector<17x1xf32> to vector<17x17xf32>
    %125 = arith.subf %121, %124 : vector<17x17xf32>
    %126 = math.exp %125 : vector<17x17xf32>
    %cst_47 = arith.constant dense<0.000000e+00> : vector<17xf32>
    %127 = vector.multi_reduction <add>, %126, %cst_47 [1] : vector<17x17xf32> to vector<17xf32>
    %128 = vector.shape_cast %127 : vector<17xf32> to vector<17x1xf32>
    %129 = vector.broadcast %128 : vector<17x1xf32> to vector<17x17xf32>
    %130 = arith.divf %126, %129 : vector<17x17xf32>
    %cst_48 = arith.constant dense<0.000000e+00> : vector<17x8xf32>
    %131 = tpu.matmul %130, %119, %cst_48 {dimension_numbers = #tpu.dot_dimension_numbers<[1], [0], [0], [1], [0, 0, 1, 1], [], []>} : vector<17x17xf32>, vector<17x8xf32>, vector<17x8xf32> -> vector<17x8xf32>
    %c17_49 = arith.constant 17 : index
    %c8_50 = arith.constant 8 : index
    %132 = vector.load %arg24[%c17_49, %c8_50] : memref<34x32xf32, #tpu.memory_space<vmem>>, vector<17x8xf32>
    tpu.vector_store %arg24[%c17_49, %c8_50], %131 {strides = array<i32>} : memref<34x32xf32, #tpu.memory_space<vmem>>, vector<17x8xf32>,
    %133 = vector.extract_strided_slice %36 {offsets = [17, 16], sizes = [17, 8], strides = [1, 1]} : vector<34x96xf32> to vector<17x8xf32>
    %134 = vector.extract_strided_slice %36 {offsets = [17, 48], sizes = [17, 8], strides = [1, 1]} : vector<34x96xf32> to vector<17x8xf32>
    %135 = vector.extract_strided_slice %36 {offsets = [17, 80], sizes = [17, 8], strides = [1, 1]} : vector<34x96xf32> to vector<17x8xf32>
    %136 = tpu.transpose %134, [1, 0] : vector<17x8xf32> -> vector<8x17xf32>
    %cst_51 = arith.constant dense<0.000000e+00> : vector<17x17xf32>
    %137 = tpu.matmul %133, %136, %cst_51 {dimension_numbers = #tpu.dot_dimension_numbers<[1], [0], [0], [1], [0, 0, 1, 1], [], []>} : vector<17x8xf32>, vector<8x17xf32>, vector<17x17xf32> -> vector<17x17xf32>
    %cst_52 = arith.constant dense<0xFF800000> : vector<17xf32>
    %138 = vector.multi_reduction <maximumf>, %137, %cst_52 [1] : vector<17x17xf32> to vector<17xf32>
    %139 = vector.shape_cast %138 : vector<17xf32> to vector<17x1xf32>
    %140 = vector.broadcast %139 : vector<17x1xf32> to vector<17x17xf32>
    %141 = arith.subf %137, %140 : vector<17x17xf32>
    %142 = math.exp %141 : vector<17x17xf32>
    %cst_53 = arith.constant dense<0.000000e+00> : vector<17xf32>
    %143 = vector.multi_reduction <add>, %142, %cst_53 [1] : vector<17x17xf32> to vector<17xf32>
    %144 = vector.shape_cast %143 : vector<17xf32> to vector<17x1xf32>
    %145 = vector.broadcast %144 : vector<17x1xf32> to vector<17x17xf32>
    %146 = arith.divf %142, %145 : vector<17x17xf32>
    %cst_54 = arith.constant dense<0.000000e+00> : vector<17x8xf32>
    %147 = tpu.matmul %146, %135, %cst_54 {dimension_numbers = #tpu.dot_dimension_numbers<[1], [0], [0], [1], [0, 0, 1, 1], [], []>} : vector<17x17xf32>, vector<17x8xf32>, vector<17x8xf32> -> vector<17x8xf32>
    %c17_55 = arith.constant 17 : index
    %c16_56 = arith.constant 16 : index
    %148 = vector.load %arg24[%c17_55, %c16_56] : memref<34x32xf32, #tpu.memory_space<vmem>>, vector<17x8xf32>
    tpu.vector_store %arg24[%c17_55, %c16_56], %147 {strides = array<i32>} : memref<34x32xf32, #tpu.memory_space<vmem>>, vector<17x8xf32>,
    %149 = vector.extract_strided_slice %36 {offsets = [17, 24], sizes = [17, 8], strides = [1, 1]} : vector<34x96xf32> to vector<17x8xf32>
    %150 = vector.extract_strided_slice %36 {offsets = [17, 56], sizes = [17, 8], strides = [1, 1]} : vector<34x96xf32> to vector<17x8xf32>
    %151 = vector.extract_strided_slice %36 {offsets = [17, 88], sizes = [17, 8], strides = [1, 1]} : vector<34x96xf32> to vector<17x8xf32>
    %152 = tpu.transpose %150, [1, 0] : vector<17x8xf32> -> vector<8x17xf32>
    %cst_57 = arith.constant dense<0.000000e+00> : vector<17x17xf32>
    %153 = tpu.matmul %149, %152, %cst_57 {dimension_numbers = #tpu.dot_dimension_numbers<[1], [0], [0], [1], [0, 0, 1, 1], [], []>} : vector<17x8xf32>, vector<8x17xf32>, vector<17x17xf32> -> vector<17x17xf32>
    %cst_58 = arith.constant dense<0xFF800000> : vector<17xf32>
    %154 = vector.multi_reduction <maximumf>, %153, %cst_58 [1] : vector<17x17xf32> to vector<17xf32>
    %155 = vector.shape_cast %154 : vector<17xf32> to vector<17x1xf32>
    %156 = vector.broadcast %155 : vector<17x1xf32> to vector<17x17xf32>
    %157 = arith.subf %153, %156 : vector<17x17xf32>
    %158 = math.exp %157 : vector<17x17xf32>
    %cst_59 = arith.constant dense<0.000000e+00> : vector<17xf32>
    %159 = vector.multi_reduction <add>, %158, %cst_59 [1] : vector<17x17xf32> to vector<17xf32>
    %160 = vector.shape_cast %159 : vector<17xf32> to vector<17x1xf32>
    %161 = vector.broadcast %160 : vector<17x1xf32> to vector<17x17xf32>
    %162 = arith.divf %158, %161 : vector<17x17xf32>
    %cst_60 = arith.constant dense<0.000000e+00> : vector<17x8xf32>
    %163 = tpu.matmul %162, %151, %cst_60 {dimension_numbers = #tpu.dot_dimension_numbers<[1], [0], [0], [1], [0, 0, 1, 1], [], []>} : vector<17x17xf32>, vector<17x8xf32>, vector<17x8xf32> -> vector<17x8xf32>
    %c17_61 = arith.constant 17 : index
    %c24_62 = arith.constant 24 : index
    %164 = vector.load %arg24[%c17_61, %c24_62] : memref<34x32xf32, #tpu.memory_space<vmem>>, vector<17x8xf32>
    tpu.vector_store %arg24[%c17_61, %c24_62], %163 {strides = array<i32>} : memref<34x32xf32, #tpu.memory_space<vmem>>, vector<17x8xf32>,
    %c0_63 = arith.constant 0 : index
    %c0_64 = arith.constant 0 : index
    %165 = vector.load %arg24[%c0_63, %c0_64] : memref<34x32xf32, #tpu.memory_space<vmem>>, vector<34x32xf32>
    %c0_65 = arith.constant 0 : index
    %c0_66 = arith.constant 0 : index
    %c0_67 = arith.constant 0 : index
    %166 = vector.load %arg10[%c0_65, %c0_66, %c0_67] : memref<1x32x32xf32, #tpu.memory_space<vmem>>, vector<1x32x32xf32>
    %167 = vector.shape_cast %166 : vector<1x32x32xf32> to vector<32x32xf32>
    %cst_68 = arith.constant dense<0.000000e+00> : vector<34x32xf32>
    %168 = tpu.matmul %165, %167, %cst_68 {dimension_numbers = #tpu.dot_dimension_numbers<[1], [0], [0], [1], [0, 0, 1, 1], [], []>} : vector<34x32xf32>, vector<32x32xf32>, vector<34x32xf32> -> vector<34x32xf32>
    %c0_69 = arith.constant 0 : index
    %c0_70 = arith.constant 0 : index
    %c0_71 = arith.constant 0 : index
    %169 = vector.load %arg11[%c0_69, %c0_70, %c0_71] : memref<1x1x32xf32, #tpu.memory_space<vmem>>, vector<1x1x32xf32>
    %170 = vector.shape_cast %169 : vector<1x1x32xf32> to vector<1x32xf32>
    %171 = vector.broadcast %170 : vector<1x32xf32> to vector<34x32xf32>
    %172 = arith.addf %168, %171 : vector<34x32xf32>
    %173 = arith.addf %3, %172 : vector<34x32xf32>
    %c0_72 = arith.constant 0 : index
    %c0_73 = arith.constant 0 : index
    %c0_74 = arith.constant 0 : index
    %174 = vector.load %arg12[%c0_72, %c0_73, %c0_74] : memref<1x1x32xf32, #tpu.memory_space<vmem>>, vector<1x1x32xf32>
    %175 = vector.shape_cast %174 : vector<1x1x32xf32> to vector<1x32xf32>
    %c0_75 = arith.constant 0 : index
    %c0_76 = arith.constant 0 : index
    %c0_77 = arith.constant 0 : index
    %176 = vector.load %arg13[%c0_75, %c0_76, %c0_77] : memref<1x1x32xf32, #tpu.memory_space<vmem>>, vector<1x1x32xf32>
    %177 = vector.shape_cast %176 : vector<1x1x32xf32> to vector<1x32xf32>
    %cst_78 = arith.constant dense<0.000000e+00> : vector<34xf32>
    %178 = vector.multi_reduction <add>, %173, %cst_78 [1] : vector<34x32xf32> to vector<34xf32>
    %179 = vector.shape_cast %178 : vector<34xf32> to vector<34x1xf32>
    %cst_79 = arith.constant 3.200000e+01 : f32
    %180 = vector.broadcast %cst_79 : f32 to vector<34x1xf32>
    %181 = arith.divf %179, %180 : vector<34x1xf32>
    %182 = vector.broadcast %181 : vector<34x1xf32> to vector<34x32xf32>
    %183 = arith.subf %173, %182 : vector<34x32xf32>
    %184 = arith.mulf %183, %183 : vector<34x32xf32>
    %cst_80 = arith.constant dense<0.000000e+00> : vector<34xf32>
    %185 = vector.multi_reduction <add>, %184, %cst_80 [1] : vector<34x32xf32> to vector<34xf32>
    %186 = vector.shape_cast %185 : vector<34xf32> to vector<34x1xf32>
    %cst_81 = arith.constant 3.200000e+01 : f32
    %187 = vector.broadcast %cst_81 : f32 to vector<34x1xf32>
    %188 = arith.divf %186, %187 : vector<34x1xf32>
    %189 = vector.broadcast %181 : vector<34x1xf32> to vector<34x32xf32>
    %190 = arith.subf %173, %189 : vector<34x32xf32>
    %cst_82 = arith.constant 9.99999996E-13 : f32
    %191 = vector.broadcast %cst_82 : f32 to vector<34x1xf32>
    %192 = arith.addf %188, %191 : vector<34x1xf32>
    %193 = math.rsqrt %192 : vector<34x1xf32>
    %194 = vector.broadcast %193 : vector<34x1xf32> to vector<34x32xf32>
    %195 = arith.mulf %190, %194 : vector<34x32xf32>
    %196 = vector.broadcast %175 : vector<1x32xf32> to vector<34x32xf32>
    %197 = arith.mulf %195, %196 : vector<34x32xf32>
    %198 = vector.broadcast %177 : vector<1x32xf32> to vector<34x32xf32>
    %199 = arith.addf %197, %198 : vector<34x32xf32>
    %c0_83 = arith.constant 0 : index
    %c0_84 = arith.constant 0 : index
    %c0_85 = arith.constant 0 : index
    %200 = vector.load %arg14[%c0_83, %c0_84, %c0_85] : memref<1x32x128xf32, #tpu.memory_space<vmem>>, vector<1x32x128xf32>
    %201 = vector.shape_cast %200 : vector<1x32x128xf32> to vector<32x128xf32>
    %cst_86 = arith.constant dense<0.000000e+00> : vector<34x128xf32>
    %202 = tpu.matmul %199, %201, %cst_86 {dimension_numbers = #tpu.dot_dimension_numbers<[1], [0], [0], [1], [0, 0, 1, 1], [], []>} : vector<34x32xf32>, vector<32x128xf32>, vector<34x128xf32> -> vector<34x128xf32>
    %c0_87 = arith.constant 0 : index
    %c0_88 = arith.constant 0 : index
    %c0_89 = arith.constant 0 : index
    %203 = vector.load %arg15[%c0_87, %c0_88, %c0_89] : memref<1x1x128xf32, #tpu.memory_space<vmem>>, vector<1x1x128xf32>
    %204 = vector.shape_cast %203 : vector<1x1x128xf32> to vector<1x128xf32>
    %205 = vector.broadcast %204 : vector<1x128xf32> to vector<34x128xf32>
    %206 = arith.addf %202, %205 : vector<34x128xf32>
    %cst_90 = arith.constant 5.000000e-01 : f32
    %207 = vector.broadcast %cst_90 : f32 to vector<34x128xf32>
    %208 = arith.mulf %207, %206 : vector<34x128xf32>
    %cst_91 = arith.constant 0.707106769 : f32
    %209 = vector.broadcast %cst_91 : f32 to vector<34x128xf32>
    %210 = arith.mulf %206, %209 : vector<34x128xf32>
    %211 = math.erf %210 : vector<34x128xf32>
    %cst_92 = arith.constant 1.000000e+00 : f32
    %212 = vector.broadcast %cst_92 : f32 to vector<34x128xf32>
    %213 = arith.addf %212, %211 : vector<34x128xf32>
    %214 = arith.mulf %208, %213 : vector<34x128xf32>
    %c0_93 = arith.constant 0 : index
    %c0_94 = arith.constant 0 : index
    %c0_95 = arith.constant 0 : index
    %215 = vector.load %arg16[%c0_93, %c0_94, %c0_95] : memref<1x128x32xf32, #tpu.memory_space<vmem>>, vector<1x128x32xf32>
    %216 = vector.shape_cast %215 : vector<1x128x32xf32> to vector<128x32xf32>
    %cst_96 = arith.constant dense<0.000000e+00> : vector<34x32xf32>
    %217 = tpu.matmul %214, %216, %cst_96 {dimension_numbers = #tpu.dot_dimension_numbers<[1], [0], [0], [1], [0, 0, 1, 1], [], []>} : vector<34x128xf32>, vector<128x32xf32>, vector<34x32xf32> -> vector<34x32xf32>
    %218 = arith.addf %173, %217 : vector<34x32xf32>
    %c0_97 = arith.constant 0 : index
    %c0_98 = arith.constant 0 : index
    %c0_99 = arith.constant 0 : index
    %219 = vector.load %arg17[%c0_97, %c0_98, %c0_99] : memref<1x1x32xf32, #tpu.memory_space<vmem>>, vector<1x1x32xf32>
    %220 = vector.shape_cast %219 : vector<1x1x32xf32> to vector<1x32xf32>
    %221 = vector.broadcast %220 : vector<1x32xf32> to vector<34x32xf32>
    %222 = arith.addf %218, %221 : vector<34x32xf32>
    %c0_100 = arith.constant 0 : index
    %c0_101 = arith.constant 0 : index
    %223 = vector.load %arg23[%c0_100, %c0_101] : memref<34x32xf32, #tpu.memory_space<vmem>>, vector<34x32xf32>
    tpu.vector_store %arg23[%c0_100, %c0_101], %222 {strides = array<i32>} : memref<34x32xf32, #tpu.memory_space<vmem>>, vector<34x32xf32>,
    %c1_i32 = arith.constant 1 : i32
    %224 = arith.cmpi eq, %arg0, %c1_i32 : i32
    %225 = arith.extui %224 : i1 to i32
    %c0_i32_102 = arith.constant 0 : i32
    %226 = arith.cmpi ne, %225, %c0_i32_102 : i32
    scf.if %226 {
      %227 = vector.extract_strided_slice %222 {offsets = [0, 0], sizes = [1, 32], strides = [1, 1]} : vector<34x32xf32> to vector<1x32xf32>
      %c0_103 = arith.constant 0 : index
      %c0_104 = arith.constant 0 : index
      %228 = vector.load %arg25[%c0_103, %c0_104] : memref<2x32xf32, #tpu.memory_space<vmem>>, vector<1x32xf32>
      tpu.vector_store %arg25[%c0_103, %c0_104], %227 {strides = array<i32>} : memref<2x32xf32, #tpu.memory_space<vmem>>, vector<1x32xf32>,
      %229 = vector.extract_strided_slice %222 {offsets = [17, 0], sizes = [1, 32], strides = [1, 1]} : vector<34x32xf32> to vector<1x32xf32>
      %c1 = arith.constant 1 : index
      %c0_105 = arith.constant 0 : index
      %230 = vector.load %arg25[%c1, %c0_105] : memref<2x32xf32, #tpu.memory_space<vmem>>, vector<1x32xf32>
      tpu.vector_store %arg25[%c1, %c0_105], %229 {strides = array<i32>} : memref<2x32xf32, #tpu.memory_space<vmem>>, vector<1x32xf32>,
      %c0_106 = arith.constant 0 : index
      %c0_107 = arith.constant 0 : index
      %231 = vector.load %arg25[%c0_106, %c0_107] : memref<2x32xf32, #tpu.memory_space<vmem>>, vector<2x32xf32>
      %c0_108 = arith.constant 0 : index
      %c0_109 = arith.constant 0 : index
      %232 = vector.load %arg18[%c0_108, %c0_109] : memref<1x32xf32, #tpu.memory_space<vmem>>, vector<1x32xf32>
      %c0_110 = arith.constant 0 : index
      %c0_111 = arith.constant 0 : index
      %233 = vector.load %arg19[%c0_110, %c0_111] : memref<1x32xf32, #tpu.memory_space<vmem>>, vector<1x32xf32>
      %cst_112 = arith.constant dense<0.000000e+00> : vector<2xf32>
      %234 = vector.multi_reduction <add>, %231, %cst_112 [1] : vector<2x32xf32> to vector<2xf32>
      %235 = vector.shape_cast %234 : vector<2xf32> to vector<2x1xf32>
      %cst_113 = arith.constant 3.200000e+01 : f32
      %236 = vector.broadcast %cst_113 : f32 to vector<2x1xf32>
      %237 = arith.divf %235, %236 : vector<2x1xf32>
      %238 = vector.broadcast %237 : vector<2x1xf32> to vector<2x32xf32>
      %239 = arith.subf %231, %238 : vector<2x32xf32>
      %240 = arith.mulf %239, %239 : vector<2x32xf32>
      %cst_114 = arith.constant dense<0.000000e+00> : vector<2xf32>
      %241 = vector.multi_reduction <add>, %240, %cst_114 [1] : vector<2x32xf32> to vector<2xf32>
      %242 = vector.shape_cast %241 : vector<2xf32> to vector<2x1xf32>
      %cst_115 = arith.constant 3.200000e+01 : f32
      %243 = vector.broadcast %cst_115 : f32 to vector<2x1xf32>
      %244 = arith.divf %242, %243 : vector<2x1xf32>
      %245 = vector.broadcast %237 : vector<2x1xf32> to vector<2x32xf32>
      %246 = arith.subf %231, %245 : vector<2x32xf32>
      %cst_116 = arith.constant 9.99999996E-13 : f32
      %247 = vector.broadcast %cst_116 : f32 to vector<2x1xf32>
      %248 = arith.addf %244, %247 : vector<2x1xf32>
      %249 = math.rsqrt %248 : vector<2x1xf32>
      %250 = vector.broadcast %249 : vector<2x1xf32> to vector<2x32xf32>
      %251 = arith.mulf %246, %250 : vector<2x32xf32>
      %252 = vector.broadcast %232 : vector<1x32xf32> to vector<2x32xf32>
      %253 = arith.mulf %251, %252 : vector<2x32xf32>
      %254 = vector.broadcast %233 : vector<1x32xf32> to vector<2x32xf32>
      %255 = arith.addf %253, %254 : vector<2x32xf32>
      %c0_117 = arith.constant 0 : index
      %c0_118 = arith.constant 0 : index
      %256 = vector.load %arg20[%c0_117, %c0_118] : memref<32x128xf32, #tpu.memory_space<vmem>>, vector<32x128xf32>
      %cst_119 = arith.constant dense<0.000000e+00> : vector<2x128xf32>
      %257 = tpu.matmul %255, %256, %cst_119 {dimension_numbers = #tpu.dot_dimension_numbers<[1], [0], [0], [1], [0, 0, 1, 1], [], []>} : vector<2x32xf32>, vector<32x128xf32>, vector<2x128xf32> -> vector<2x128xf32>
      %c0_120 = arith.constant 0 : index
      %c0_121 = arith.constant 0 : index
      %258 = vector.load %arg21[%c0_120, %c0_121] : memref<1x128xf32, #tpu.memory_space<vmem>>, vector<1x128xf32>
      %259 = vector.broadcast %258 : vector<1x128xf32> to vector<2x128xf32>
      %260 = arith.addf %257, %259 : vector<2x128xf32>
      %c0_122 = arith.constant 0 : index
      %c0_123 = arith.constant 0 : index
      %261 = vector.load %arg22[%c0_122, %c0_123] : memref<2x128xf32, #tpu.memory_space<vmem>>, vector<2x128xf32>
      tpu.vector_store %arg22[%c0_122, %c0_123], %260 {strides = array<i32>} : memref<2x128xf32, #tpu.memory_space<vmem>>, vector<2x128xf32>,
    } else {
    }
    return
  }
  func.func @transform_0(%arg0: i32) -> (i32, i32) {
    %c0_i32 = arith.constant 0 : i32
    %c0_i32_0 = arith.constant 0 : i32
    %c0_i32_1 = arith.constant 0 : i32
    return %c0_i32, %c0_i32_0 : i32, i32
  }
  func.func @transform_1(%arg0: i32) -> (i32, i32) {
    %c0_i32 = arith.constant 0 : i32
    %c0_i32_0 = arith.constant 0 : i32
    %c0_i32_1 = arith.constant 0 : i32
    return %c0_i32, %c0_i32_0 : i32, i32
  }
  func.func @transform_2(%arg0: i32) -> (i32, i32) {
    %c0_i32 = arith.constant 0 : i32
    %c0_i32_0 = arith.constant 0 : i32
    %c0_i32_1 = arith.constant 0 : i32
    return %c0_i32, %c0_i32_0 : i32, i32
  }
  func.func @transform_3(%arg0: i32) -> (i32, i32) {
    %c0_i32 = arith.constant 0 : i32
    %c0_i32_0 = arith.constant 0 : i32
    %c0_i32_1 = arith.constant 0 : i32
    return %c0_i32, %c0_i32_0 : i32, i32
  }
  func.func @transform_4(%arg0: i32) -> (i32, i32) {
    %c0_i32 = arith.constant 0 : i32
    %c0_i32_0 = arith.constant 0 : i32
    %c0_i32_1 = arith.constant 0 : i32
    return %c0_i32, %c0_i32_0 : i32, i32
  }
  func.func @transform_5(%arg0: i32) -> (i32, i32, i32) {
    %c0_i32 = arith.constant 0 : i32
    %c0_i32_0 = arith.constant 0 : i32
    %c0_i32_1 = arith.constant 0 : i32
    return %arg0, %c0_i32, %c0_i32_0 : i32, i32, i32
  }
  func.func @transform_6(%arg0: i32) -> (i32, i32, i32) {
    %c0_i32 = arith.constant 0 : i32
    %c0_i32_0 = arith.constant 0 : i32
    %c0_i32_1 = arith.constant 0 : i32
    return %arg0, %c0_i32, %c0_i32_0 : i32, i32, i32
  }
  func.func @transform_7(%arg0: i32) -> (i32, i32, i32) {
    %c0_i32 = arith.constant 0 : i32
    %c0_i32_0 = arith.constant 0 : i32
    %c0_i32_1 = arith.constant 0 : i32
    return %arg0, %c0_i32, %c0_i32_0 : i32, i32, i32
  }
  func.func @transform_8(%arg0: i32) -> (i32, i32, i32) {
    %c0_i32 = arith.constant 0 : i32
    %c0_i32_0 = arith.constant 0 : i32
    %c0_i32_1 = arith.constant 0 : i32
    return %arg0, %c0_i32, %c0_i32_0 : i32, i32, i32
  }
  func.func @transform_9(%arg0: i32) -> (i32, i32, i32) {
    %c0_i32 = arith.constant 0 : i32
    %c0_i32_0 = arith.constant 0 : i32
    %c0_i32_1 = arith.constant 0 : i32
    return %arg0, %c0_i32, %c0_i32_0 : i32, i32, i32
  }
  func.func @transform_10(%arg0: i32) -> (i32, i32, i32) {
    %c0_i32 = arith.constant 0 : i32
    %c0_i32_0 = arith.constant 0 : i32
    %c0_i32_1 = arith.constant 0 : i32
    return %arg0, %c0_i32, %c0_i32_0 : i32, i32, i32
  }
  func.func @transform_11(%arg0: i32) -> (i32, i32, i32) {
    %c0_i32 = arith.constant 0 : i32
    %c0_i32_0 = arith.constant 0 : i32
    %c0_i32_1 = arith.constant 0 : i32
    return %arg0, %c0_i32, %c0_i32_0 : i32, i32, i32
  }
  func.func @transform_12(%arg0: i32) -> (i32, i32, i32) {
    %c0_i32 = arith.constant 0 : i32
    %c0_i32_0 = arith.constant 0 : i32
    %c0_i32_1 = arith.constant 0 : i32
    return %arg0, %c0_i32, %c0_i32_0 : i32, i32, i32
  }
  func.func @transform_13(%arg0: i32) -> (i32, i32, i32) {
    %c0_i32 = arith.constant 0 : i32
    %c0_i32_0 = arith.constant 0 : i32
    %c0_i32_1 = arith.constant 0 : i32
    return %arg0, %c0_i32, %c0_i32_0 : i32, i32, i32
  }
  func.func @transform_14(%arg0: i32) -> (i32, i32, i32) {
    %c0_i32 = arith.constant 0 : i32
    %c0_i32_0 = arith.constant 0 : i32
    %c0_i32_1 = arith.constant 0 : i32
    return %arg0, %c0_i32, %c0_i32_0 : i32, i32, i32
  }
  func.func @transform_15(%arg0: i32) -> (i32, i32, i32) {
    %c0_i32 = arith.constant 0 : i32
    %c0_i32_0 = arith.constant 0 : i32
    %c0_i32_1 = arith.constant 0 : i32
    return %arg0, %c0_i32, %c0_i32_0 : i32, i32, i32
  }
  func.func @transform_16(%arg0: i32) -> (i32, i32, i32) {
    %c0_i32 = arith.constant 0 : i32
    %c0_i32_0 = arith.constant 0 : i32
    %c0_i32_1 = arith.constant 0 : i32
    return %arg0, %c0_i32, %c0_i32_0 : i32, i32, i32
  }
  func.func @transform_17(%arg0: i32) -> (i32, i32) {
    %c0_i32 = arith.constant 0 : i32
    %c0_i32_0 = arith.constant 0 : i32
    %c0_i32_1 = arith.constant 0 : i32
    return %c0_i32, %c0_i32_0 : i32, i32
  }
  func.func @transform_18(%arg0: i32) -> (i32, i32) {
    %c0_i32 = arith.constant 0 : i32
    %c0_i32_0 = arith.constant 0 : i32
    %c0_i32_1 = arith.constant 0 : i32
    return %c0_i32, %c0_i32_0 : i32, i32
  }
  func.func @transform_19(%arg0: i32) -> (i32, i32) {
    %c0_i32 = arith.constant 0 : i32
    %c0_i32_0 = arith.constant 0 : i32
    %c0_i32_1 = arith.constant 0 : i32
    return %c0_i32, %c0_i32_0 : i32, i32
  }
  func.func @transform_20(%arg0: i32) -> (i32, i32) {
    %c0_i32 = arith.constant 0 : i32
    %c0_i32_0 = arith.constant 0 : i32
    %c0_i32_1 = arith.constant 0 : i32
    return %c0_i32, %c0_i32_0 : i32, i32
  }
  func.func @transform_21(%arg0: i32) -> (i32, i32) {
    %c0_i32 = arith.constant 0 : i32
    %c0_i32_0 = arith.constant 0 : i32
    %c0_i32_1 = arith.constant 0 : i32
    return %c0_i32, %c0_i32_0 : i32, i32
  }
}

</mosaic_0001>

<bundles_post_ra>
// kernel: vit_forward.1
= control target key start
LH: loop header
LB: loop body
LE: loop exit
PB: predicated region body
PF: predicated region fallthrough
CT: control target
= control target key end

     0   :  { %s6208_s0 = inlined_call_operand.vmem [shape: f32[32,48], index: 0, kind: input, shape index: {}]   ;;  %s6209_s1 = inlined_call_operand.vmem [shape: f32[48,32], index: 1, kind: input, shape index: {}]   ;;  %s6210_s2 = inlined_call_operand.vmem [shape: f32[1,32], index: 2, kind: input, shape index: {}]   ;;  %s6211_s3 = inlined_call_operand.vmem [shape: f32[1,32], index: 3, kind: input, shape index: {}]   ;;  %s6212_s4 = inlined_call_operand.vmem [shape: f32[17,32], index: 4, kind: input, shape index: {}]   ;;  %s6213_s5 = inlined_call_operand.vmem [shape: f32[2,1,32], index: 5, kind: input, shape index: {}]   ;;  %s6214_s6 = inlined_call_operand.vmem [shape: f32[2,1,32], index: 6, kind: input, shape index: {}]   ;;  %s6215_s7 = inlined_call_operand.vmem [shape: f32[2,32,96], index: 7, kind: input, shape index: {}]   ;;  %s6216_s8 = inlined_call_operand.vmem [shape: f32[2,1,96], index: 8, kind: input, shape index: {}]   ;;  %s6217_s9 = inlined_call_operand.vmem [shape: f32[2,32,32], index: 9, kind: input, shape index: {}]   ;;  %s6218_s10 = inlined_call_operand.vmem [shape: f32[2,1,32], index: 10, kind: input, shape index: {}]   ;;  %s6219_s11 = inlined_call_operand.vmem [shape: f32[2,1,32], index: 11, kind: input, shape index: {}]   ;;  %s6220_s12 = inlined_call_operand.vmem [shape: f32[2,1,32], index: 12, kind: input, shape index: {}]   ;;  %s6221_s13 = inlined_call_operand.vmem [shape: f32[2,32,128], index: 13, kind: input, shape index: {}]   ;;  %s6222_s14 = inlined_call_operand.vmem [shape: f32[2,1,128], index: 14, kind: input, shape index: {}]   ;;  %s6223_s15 = inlined_call_operand.vmem [shape: f32[2,128,32], index: 15, kind: input, shape index: {}]   ;;  %s6224_s16 = inlined_call_operand.vmem [shape: f32[2,1,32], index: 16, kind: input, shape index: {}]   ;;  %s6225_s17 = inlined_call_operand.vmem [shape: f32[1,32], index: 17, kind: input, shape index: {}]   ;;  %s6226_s18 = inlined_call_operand.vmem [shape: f32[1,32], index: 18, kind: input, shape index: {}]   ;;  %s6227_s19 = inlined_call_operand.vmem [shape: f32[32,128], index: 19, kind: input, shape index: {}]   ;;  %s6228_s20 = inlined_call_operand.vmem [shape: f32[1,128], index: 20, kind: input, shape index: {}]   ;;  %s6229_s21 = inlined_call_operand.hbm [shape: f32[2,128], index: 21, kind: output, shape index: {}]  }
   0x1   :  { %6236 = sst [smem:[#allocation9_spill]] %s6208_s0 }
   0x2   :  { %6237 = sst [smem:[#allocation10_spill]] %s6209_s1 }
   0x3   :  { %6238 = sst [smem:[#allocation11_spill]] %s6210_s2 }
   0x4   :  { %6239 = sst [smem:[#allocation12_spill]] %s6211_s3 }
   0x5   :  { %6240 = sst [smem:[#allocation13_spill]] %s6212_s4 }
   0x6   :  { %6241 = sst [smem:[#allocation14_spill]] %s6213_s5 }
   0x7   :  { %6242 = sst [smem:[#allocation15_spill]] %s6215_s7 }
   0x8   :  { %6243 = sst [smem:[#allocation16_spill]] %s6217_s9 }
   0x9   :  { %6244 = sst [smem:[#allocation17_spill]] %s6225_s17 }
   0xa   :  { %6245 = sst [smem:[#allocation18_spill]] %s6226_s18 }
   0xb   :  { %6246 = sst [smem:[#allocation19_spill]] %s6228_s20 }
   0xc   :  { %6247 = sst [smem:[#allocation20_spill]] %s6229_s21 }
   0xd   :  { %26 = vsyncpa [#allocation6], 0  ;;  %s5141_s2 = smov 0  }
   0xe LB: > { %6248 = sst [smem:[#allocation8_spill]] %s5008_s2  ;;  %s5147_s25 = sadd.s32 4294967295, %s5008_s2   ;;  %s5008_s2 = sphi %s5141_s2, %s32_s2  }
   0xf   : > { %p3927_p0 = scmp.ge.s32.totalorder %s5008_s2, 1  ;;  %p677_p1 = scmp.lt.s32.totalorder %s5008_s2, 3 }
  0x11   : > { %p678_p2 = pnand %p3927_p0, %p677_p1 }
  0x12   : > { %p771_p3 = scmp.lt.s32.totalorder (!%p678_p2), %s5147_s25, 1  ;;  %s6250_s7 = sld [smem:[#allocation15_spill]] (!%p678_p2) }
  0x13   : > { %681 = sbr.rel (%p678_p2) target bundleno = 4228 (0x1084), region = 104  ;;  %s6251_s9 = sld [smem:[#allocation16_spill]] (!%p678_p2) }
  0x14   : > { %p3936_p4 = scmp.ne.s32.totalorder (!%p678_p2), %s5147_s25, 0 }
  0x1a   : > { %s5153_s26 = scalar_select %p771_p3, %s5147_s25, 1 }
  0x1b   : > { %818 = sbr.rel (%p3936_p4) target bundleno = 266 (0x10a), region = 108  ;;  %s6252_s24 = sld [smem:[#allocation10_spill]] (!%p3936_p4)  ;;  %vm836_vm0 = vcmask (!%p3936_p4), 392192   ;;  %vm937_vm1 = vcmask (!%p3936_p4), 253952   ;;  %vm943_vm2 = vcmask (!%p3936_p4), 261120  }
  0x1c   : > { %s4054_s5 = sshll.u32 %s5153_s26, 5  ;;  %s795_s18 = scalar_lea.vmem %s6219_s11, %s5153_s26 }
  0x1d   : > { %s5171_s3 = scalar_lea.vmem %s6250_s7, %s4054_s5  ;;  %s5176_s20 = scalar_lea.vmem %s6251_s9, %s4054_s5 }
  0x1e   : > { %s5193_s7 = scalar_lea.vmem %s6221_s13, %s4054_s5  ;;  %s4057_s17 = sshll.u32 %s5153_s26, 7 }
  0x1f   : > { %s5203_s0 = scalar_lea.vmem %s6223_s15, %s4057_s17  ;;  %s6253_s9 = sld [smem:[#allocation9_spill]] (!%p3936_p4) }
  0x20   : > { %s6254_s5 = sld [smem:[#allocation12_spill]] (!%p3936_p4)  ;;  %s6255_s2 = sld [smem:[#allocation13_spill]] (!%p3936_p4) }
  0x21   : > { %v823_v0 = vld [vmem:[%s6252_s24] sm:$0xff] (!%p3936_p4)  ;;  %v824_v1 = vld [vmem:[%s6252_s24 + $0x8] sm:$0xff] (!%p3936_p4)  ;;  %v825_v2 = vld [vmem:[%s6252_s24 + $0x10] sm:$0xff] (!%p3936_p4)  ;;  %s6257_s23 = sld [smem:[#allocation11_spill]] (!%p3936_p4) }
  0x22   : > { %v4602_v3 = vpack.c.bf16 %v824_v1, %v823_v0  ;;  %v826_v4 = vld [vmem:[%s6252_s24 + $0x18] sm:$0xff]  ;;  %v827_v6 = vld [vmem:[%s6252_s24 + $0x20] sm:$0xff]  ;;  %v828_v7 = vld [vmem:[%s6252_s24 + $0x28] sm:$0xff] }
  0x23   : > { %v4606_v5 = vpack.c.bf16 %v826_v4, %v825_v2  ;;  %v4610_v10 = vpack.c.bf16 %v828_v7, %v827_v6 }
  0x24   : > { %4603 = vmatprep.subr.bf16.mxu0 %v4602_v3  ;;  %4718 = vmatprep.subr.bf16.mxu1 %v4602_v3 }
  0x25   : > { %v819_v8 = vld [vmem:[%s6253_s9] sm:$0xff]  ;;  %v821_v9 = vld [vmem:[%s6253_s9 + $0x10] sm:$0xff]  ;;  %4605 = vmatpush3.bf16.msra.mxu0 %v4602_v3  ;;  %4721 = vmatpush3.bf16.msra.mxu1 %v4602_v3  ;;  %v820_v11 = vld [vmem:[%s6253_s9 + $0x8] sm:$0xff] }
  0x26   : > { %4607 = vmatprep.subr.bf16.mxu0 %v4606_v5  ;;  %4719 = vmatprep.subr.bf16.mxu1 %v4606_v5  ;;  %v822_v12 = vld [vmem:[%s6253_s9 + $0x18] sm:$0xff]  ;;  %v934_v13 = vld [vmem:[%s6254_s5] sm:$0x1]  ;;  %s6256_s22 = smov %s6255_s2 }
  0x27   : > { %4229 = vmatprep.mubr.msk.f32.mxu0 %vm836_vm0, %v819_v8  ;;  %4232 = vmatprep.mubr.msk.f32.mxu1 %vm836_vm0, %v821_v9  ;;  %v935_v14 = vld [vmem:[%s6255_s2] sm:$0x1]  ;;  %v940_v21 = vld [vmem:[%s6256_s22 + $0x9] sm:$0xff]  ;;  %v939_v26 = vld [vmem:[%s6256_s22 + $0x1] sm:$0xff] }
  0x28   : > { %v936_v15 = vadd.f32 %v935_v14, %v934_v13  ;;  %v946_v16 = vld [vmem:[%s6254_s5] sm:$0x1] }
  0x29   : > { %4609 = vmatpush3.bf16.msra.mxu0 %v4606_v5  ;;  %4722 = vmatpush3.bf16.msra.mxu1 %v4606_v5  ;;  %v947_v17 = vld [vmem:[%s6256_s22] sm:$0x1] }
  0x2a   : > { %4611 = vmatprep.subr.bf16.mxu0 %v4610_v10  ;;  %4720 = vmatprep.subr.bf16.mxu1 %v4610_v10  ;;  %v948_v18 = vadd.f32 %v947_v17, %v946_v16  ;;  %938 = vst.msk [vmem:[#allocation2] sm:$0x1] %vm937_vm1, %v936_v15  ;;  %v3937_v19 = vld [vmem:[%s6257_s23] ss:$0 sm:$0xff] }
  0x2c   : > { %949 = vst.msk [vmem:[#allocation2 + $0x11] sm:$0x1] %vm937_vm1, %v948_v18 }
  0x2d   : > { %4613 = vmatpush3.bf16.msra.mxu0 %v4610_v10  ;;  %4723 = vmatpush3.bf16.msra.mxu1 %v4610_v10 }
  0x30   : > { %4230 = vmatmul.mubr.msk.f32.vlgmr.msra.gmra.mrb[0].mxu0 %vm836_vm0, %v820_v11  ;;  %4233 = vmatmul.mubr.msk.f32.vlgmr.msra.gmra.mrb[0].mxu1 %vm836_vm0, %v822_v12 }
 0x103   : > { %v4231_v20 = vpop.f32.mrb[0].mxu0  ;;  %v4234_v22 = vpop.f32.mrb[0].mxu1 }
 0x104   : > { %v921_v23 = vadd.f32 %v4231_v20, %v3937_v19  ;;  %v931_v24 = vadd.f32 %v4234_v22, %v3937_v19  ;;  %v915_v25 = vpop.f32.mrb[1].mxu0  ;;  %v925_v27 = vpop.f32.mrb[1].mxu1 }
 0x105   : > { %v916_v28 = vadd.f32 %v3937_v19, %v915_v25  ;;  %v926_v29 = vadd.f32 %v3937_v19, %v925_v27 }
 0x106   : > { %v942_v30 = vadd.f32 %v940_v21, %v921_v23  ;;  %v953_v31 = vadd.f32 %v940_v21, %v931_v24 }
 0x107   : > { %v941_v32 = vadd.f32 %v939_v26, %v916_v28  ;;  %v952_v33 = vadd.f32 %v939_v26, %v926_v29 }
 0x108   : > { %945 = vst.msk [vmem:[#allocation2 + $0x9] sm:$0xff] %vm943_vm2, %v942_v30  ;;  %955 = vst.msk [vmem:[#allocation2 + $0x1a] sm:$0xff] %vm943_vm2, %v953_v31 }
 0x109   : > { %944 = vst.msk [vmem:[#allocation2 + $0x1] sm:$0xff] %vm943_vm2, %v941_v32  ;;  %954 = vst.msk [vmem:[#allocation2 + $0x12] sm:$0xff] %vm943_vm2, %v952_v33 }
 0x10a PF: > { %vm963_vm3 = vcmask 261120   ;;  %v1053_v55 = vld [vmem:[%s5171_s3] sm:$0xff]  ;;  %v1054_v56 = vld [vmem:[%s5171_s3 + $0x8] sm:$0xff]  ;;  %v1055_v57 = vld [vmem:[%s5171_s3 + $0x10] sm:$0xff]  ;;  %v5010_v58 = vmov 0.0|0.0   ;;  %vm5011_vm4 = vmmov 0   ;;  %s6260_s23 = scalar_lea.vmem %s6214_s6, %s5153_s26  ;;  %s6261_s1 = scalar_lea.vmem %s6216_s8, %s5153_s26 }
 0x10b   : > { %4614 = vmatprep.subr.bf16.mxu0 %v5010_v58  ;;  %v4615_v59 = vpack.c.bf16 %v1054_v56, %v1053_v55  ;;  %v1056_v60 = vld [vmem:[%s5171_s3 + $0x18] sm:$0xff]  ;;  %v5012_v61 = vmov 0.0   ;;  %4620 = vmatprep.subr.bf16.mxu1 %v5010_v58  ;;  %s6258_s29 = sld [smem:[#allocation14_spill]]  ;;  %v5295_v11 = vld [vmem:[%s6260_s23] ss:$0 sm:$0xff]  ;;  %s5013_s2 = smov 96  }
 0x10c   : > { %4243 = vmatprep.mubr.msk.f32.mxu0 %vm5011_vm4, %v5012_v61  ;;  %4264 = vmatprep.mubr.msk.f32.mxu1 %vm5011_vm4, %v5012_v61  ;;  %v4618_v62 = vpack.c.bf16 %v1056_v60, %v1055_v57  ;;  %v5317_v24 = vld [vmem:[%s6261_s1] ss:$0 sm:$0xff]  ;;  %vm976_vm5 = vcmask 254976   ;;  %vm1178_vm6 = vcmask 64512   ;;  %vm1271_vm8 = vcmask 138240   ;;  %s5014_s3 = smov 64  }
 0x10d   : > { %4616 = vmatpush3.bf16.msra.mxu0 %v4615_v59  ;;  %vm5340_vm7 = vmpackc.low %vm1178_vm6, %vm1178_vm6  ;;  %vm1278_vm9 = vcmask 131072   ;;  %s5015_s17 = smov 88   ;;  %s5018_s30 = smov 112   ;;  %vm2171_vm10 = vcmask 1046528   ;;  %vm1323_vm11 = vcmask 1040384   ;;  %vm1408_vm12 = vcmask 57344  }
 0x10e   : > { %4617 = vmatprep.subr.bf16.mxu0 %v5010_v58  ;;  %s5019_s4 = smov 104   ;;  %s5020_s23 = smov 72   ;;  %vm1658_vm13 = vcmask 130112   ;;  %vm1661_vm14 = vcmask 122944   ;;  %vm1911_vm15 = vcmask 195712   ;;  %vm1914_vm0 = vcmask 188544  }
 0x10f   : > { %v960_v33 = vld [vmem:[#allocation2 + $0x20] sm:$0x3]  ;;  %s5021_s27 = smov 56   ;;  %s5022_s21 = smov 48   ;;  %vm2164_vm1 = vcmask 261312   ;;  %vm2167_vm2 = vcmask 254144  }
 0x110   : > { %v956_v34 = vld [vmem:[#allocation2] sm:$0xff]  ;;  %v958_v35 = vld [vmem:[#allocation2 + $0x10] sm:$0xff]  ;;  %v957_v36 = vld [vmem:[#allocation2 + $0x8] sm:$0xff]  ;;  %s5023_s1 = smov 40   ;;  %p4045_p5 = scmp.ne.s32.totalorder %s5147_s25, 1 }
 0x111   : > { %v964_v37 = vsel %vm963_vm3, %v956_v34, 0.0  ;;  %v970_v38 = vsel %vm963_vm3, %v958_v35, 0.0  ;;  %v967_v39 = vsel %vm963_vm3, %v957_v36, 0.0  ;;  %4619 = vmatpush3.bf16.msra.mxu0 %v4618_v62  ;;  %s6259_s28 = scalar_lea.vmem %s6258_s29, %s5153_s26  ;;  %s5016_s29 = smov 80  }
 0x112   : > { %965 = vadd.xlane.f32.xlu0 %v964_v37  ;;  %971 = vadd.xlane.f32.xlu1 %v970_v38  ;;  %v5288_v9 = vld [vmem:[%s6259_s28] ss:$0 sm:$0xff]  ;;  %s5017_s28 = smov 120  }
 0x113   : > { %4634 = vmatprep.subr.bf16.mxu0 %v5010_v58 }
 0x116   : > { %968 = vadd.xlane.f32.xlu0 %v967_v39 }
 0x19f   : > { %v966_v40 = vpop.xlane.xlu0 %965  ;;  %v972_v41 = vpop.xlane.xlu1 %971 }
 0x1a0   : > { %v981_v42 = vmul.f32 0.03125, %v966_v40  ;;  %v983_v43 = vmul.f32 0.03125, %v972_v41 }
 0x1a2   : > { %v986_v44 = vsub.f32 %v956_v34, %v981_v42  ;;  %v988_v45 = vsub.f32 %v958_v35, %v983_v43  ;;  %v977_v34 = vsel %vm976_vm5, %v960_v33, 0.0  ;;  %v959_v35 = vld [vmem:[#allocation2 + $0x18] sm:$0xff] }
 0x1a3   : > { %v969_v46 = vpop.xlane.xlu0 %968 }
 0x1a4   : > { %v982_v47 = vmul.f32 0.03125, %v969_v46  ;;  %v991_v48 = vmul.f32 %v986_v44, %v986_v44  ;;  %v993_v49 = vmul.f32 %v988_v45, %v988_v45 }
 0x1a6   : > { %v987_v50 = vsub.f32 %v957_v36, %v982_v47  ;;  %v996_v51 = vsel %vm963_vm3, %v991_v48, 0.0  ;;  %v1002_v52 = vsel %vm963_vm3, %v993_v49, 0.0  ;;  %v973_v36 = vsel %vm963_vm3, %v959_v35, 0.0 }
 0x1a7   : > { %997 = vadd.xlane.f32.xlu1 %v996_v51 }
 0x1a8   : > { %v992_v53 = vmul.f32 %v987_v50, %v987_v50 }
 0x1aa   : > { %v999_v54 = vsel %vm963_vm3, %v992_v53, 0.0 }
 0x1ab   : > { %1003 = vadd.xlane.f32.xlu1 %v1002_v52  ;;  %1000 = vadd.xlane.f32.xlu0 %v999_v54 }
 0x234   : > { %v998_v63 = vpop.xlane.xlu1 %997 }
 0x235   : > { %v1011_v0 = vmul.f32 0.03125, %v998_v63 }
 0x237   : > { %v1016_v1 = vadd.f32 1e-12, %v1011_v0 }
 0x238   : > { %v1004_v2 = vpop.xlane.xlu1 %1003  ;;  %v1001_v3 = vpop.xlane.xlu0 %1000 }
 0x239   : > { %4839 = vrsqrt.f32 %v1016_v1  ;;  %v1013_v4 = vmul.f32 0.03125, %v1004_v2  ;;  %v1012_v5 = vmul.f32 0.03125, %v1001_v3 }
 0x23b   : > { %v1018_v6 = vadd.f32 1e-12, %v1013_v4  ;;  %v1017_v7 = vadd.f32 1e-12, %v1012_v5 }
 0x23d   : > { %4841 = vrsqrt.f32 %v1018_v6 }
 0x23e   : > { %4843 = vrsqrt.f32 %v1017_v7 }
 0x243   : > { %v4840_v8 = vpop.eup %4839 }
 0x244   : > { %v1026_v10 = vmul.f32 %v4840_v8, %v986_v44 }
 0x246   : > { %v1037_v12 = vmul.f32 %v5288_v9, %v1026_v10 }
 0x247   : > { %v4842_v13 = vpop.eup %4841 }
 0x248   : > { %v4844_v14 = vpop.eup %4843  ;;  %v1048_v15 = vadd.f32 %v5295_v11, %v1037_v12  ;;  %v1028_v17 = vmul.f32 %v4842_v13, %v988_v45 }
 0x249   : > { %v1027_v16 = vmul.f32 %v4844_v14, %v987_v50 }
 0x24a   : > { %4244 = vmatmul.mubr.msk.f32.vlgmr.msra.gmra.mrb[0].mxu0 %vm963_vm3, %v1048_v15  ;;  %v1039_v20 = vmul.f32 %v5288_v9, %v1028_v17 }
 0x24b   : > { %4246 = vmatprep.mubr.msk.f32.mxu0 %vm5011_vm4, %v5012_v61  ;;  %v1038_v18 = vmul.f32 %v5288_v9, %v1027_v16 }
 0x24c   : > { %v1050_v21 = vadd.f32 %v5295_v11, %v1039_v20 }
 0x24d   : > { %v1049_v19 = vadd.f32 %v5295_v11, %v1038_v18 }
 0x24f   : > { %4247 = vmatmul.mubr.msk.f32.gmra.mrb[2].mxu0 %vm963_vm3, %v1049_v19 }
 0x250   : > { %4249 = vmatprep.mubr.msk.f32.mxu0 %vm5011_vm4, %v5012_v61 }
 0x253   : > { %4250 = vmatmul.mubr.msk.f32.gmra.mrb[4].mxu0 %vm963_vm3, %v1050_v21 }
 0x254   : > { %4252 = vmatprep.mubr.msk.f32.mxu0 %vm5011_vm4, %v5012_v61 }
 0x31d   : > { %v1145_v22 = vpop.f32.mrb[0].mxu0 }
 0x31e   : > { %v4245_v23 = vpop.f32.mrb[1].mxu0  ;;  %v5320_v26 = vadd.f32 %v5317_v24, %v1145_v22 }
 0x322   : > { %v1150_v25 = vpop.f32.mrb[2].mxu0 }
 0x323   : > { %v5323_v27 = vadd.f32 %v5317_v24, %v1150_v25  ;;  %v4248_v28 = vpop.f32.mrb[3].mxu0 }
 0x325   : > { %v5327_v29 = vpack.i.bf16 %v5323_v27, %v5320_v26 }
 0x326   : > { %v1155_v30 = vpop.f32.mrb[4].mxu0 }
 0x327   : > { %v5330_v31 = vadd.f32 %v5317_v24, %v1155_v30  ;;  %4760 = vrot.lane.b32.xlu0 %v5327_v29, %s5013_s2  ;;  %v4251_v32 = vpop.f32.mrb[5].mxu0 }
 0x329   : > { %1176 = vrot.lane.b32.xlu1 %v5330_v31, %s5013_s2 }
 0x346   : > { %978 = vadd.xlane.f32.xlu0 %v977_v34 }
 0x34d   : > { %974 = vadd.xlane.f32.xlu1 %v973_v36 }
 0x399   : > { %v4761_v37 = vpop.permute.xlu0 %4760 }
 0x39a   : > { %v4763_v38 = vunpack.i.h.bf16 %v4761_v37  ;;  %v4762_v39 = vunpack.i.l.bf16 %v4761_v37 }
 0x39b   : > { %v1177_v42 = vpop.permute.xlu1 %1176 }
 0x39c   : > { %v4621_v41 = vpack.c.bf16 %v4763_v38, %v4762_v39 }
 0x39e   : > { %4623 = vmatpush3.bf16.xpose.msk.msra.mxu1 %vm5340_vm7, %v4621_v41 }
 0x39f   : > { %4262 = vmatprep.subr.mxu1 %v5012_v61 }
 0x3a6   : > { %4263 = vmatpush3.xpose.msk.msra.mxu1 %vm1178_vm6, %v1177_v42  ;;  %v2172_v42 = vrot.slane %v5330_v31, 1 }
 0x3a7   : > { %4624 = vmatprep.subr.bf16.mxu1 %v5010_v58 }
 0x3a9   : > { %4265 = vmatmul.mubr.msk.f32.vlgmr.msra.gmra.mrb[0].mxu1 %vm1178_vm6, %v5320_v26 }
 0x3aa   : > { %4267 = vmatprep.mubr.msk.f32.mxu1 %vm5011_vm4, %v5012_v61 }
 0x3ad   : > { %4268 = vmatmul.mubr.msk.f32.gmra.mrb[2].mxu1 %vm1178_vm6, %v5323_v27 }
 0x3ae   : > { %4270 = vmatprep.mubr.msk.f32.mxu1 %vm5011_vm4, %v5012_v61 }
 0x3b1   : > { %4271 = vmatmul.mubr.msk.f32.gmra.mrb[4].mxu1 %vm1178_vm6, %v5330_v31 }
 0x3b2   : > { %4279 = vmatprep.mubr.msk.f32.mxu1 %vm5011_vm4, %v5012_v61 }
 0x3d3   : > { %v979_v43 = vpop.xlane.xlu0 %978 }
 0x3d4   : > { %v985_v44 = vmul.f32 0.03125, %v979_v43 }
 0x3d6   : > { %v990_v45 = vsub.f32 %v960_v33, %v985_v44 }
 0x3d8   : > { %v995_v46 = vmul.f32 %v990_v45, %v990_v45 }
 0x3da   : > { %v975_v47 = vpop.xlane.xlu1 %974  ;;  %v1008_v48 = vsel %vm976_vm5, %v995_v46, 0.0 }
 0x3db   : > { %v984_v49 = vmul.f32 0.03125, %v975_v47  ;;  %1009 = vadd.xlane.f32.xlu1 %v1008_v48 }
 0x3dd   : > { %v989_v50 = vsub.f32 %v959_v35, %v984_v49 }
 0x3df   : > { %v994_v51 = vmul.f32 %v989_v50, %v989_v50 }
 0x3e1   : > { %v1005_v52 = vsel %vm963_vm3, %v994_v51, 0.0 }
 0x3e2   : > { %1006 = vadd.xlane.f32.xlu0 %v1005_v52 }
 0x468   : > { %v1010_v53 = vpop.xlane.xlu1 %1009 }
 0x469   : > { %v1015_v54 = vmul.f32 0.03125, %v1010_v53 }
 0x46b   : > { %v1020_v55 = vadd.f32 1e-12, %v1015_v54 }
 0x46d   : > { %4845 = vrsqrt.f32 %v1020_v55 }
 0x46f   : > { %v1007_v56 = vpop.xlane.xlu0 %1006 }
 0x470   : > { %v1014_v57 = vmul.f32 0.03125, %v1007_v56 }
 0x472   : > { %v1019_v59 = vadd.f32 1e-12, %v1014_v57 }
 0x474   : > { %4847 = vrsqrt.f32 %v1019_v59 }
 0x477   : > { %v4846_v60 = vpop.eup %4845 }
 0x478   : > { %v1030_v3 = vmul.f32 %v4846_v60, %v990_v45 }
 0x47a   : > { %v1041_v10 = vmul.f32 %v5288_v9, %v1030_v3 }
 0x47c   : > { %v1257_v62 = vpop.f32.mrb[0].mxu1  ;;  %v1052_v15 = vadd.f32 %v5295_v11, %v1041_v10 }
 0x47d   : > { %v4266_v63 = vpop.f32.mrb[1].mxu1  ;;  %v1272_v0 = vsel %vm1271_vm8, %v1257_v62, -inf }
 0x47e   : > { %v4848_v1 = vpop.eup %4847  ;;  %1273 = vmax.xlane.f32.xlu0 %v1272_v0 }
 0x47f   : > { %v1029_v2 = vmul.f32 %v4848_v1, %v989_v50 }
 0x480   : > { %v1262_v4 = vpop.f32.mrb[2].mxu1 }
 0x481   : > { %v4269_v5 = vpop.f32.mrb[3].mxu1  ;;  %v1275_v6 = vsel %vm1271_vm8, %v1262_v4, -inf  ;;  %v1040_v7 = vmul.f32 %v5288_v9, %v1029_v2 }
 0x482   : > { %1276 = vmax.xlane.f32.xlu1 %v1275_v6 }
 0x483   : > { %v1051_v8 = vadd.f32 %v5295_v11, %v1040_v7 }
 0x484   : > { %v1267_v12 = vpop.f32.mrb[4].mxu1 }
 0x485   : > { %4253 = vmatmul.mubr.msk.f32.gmra.mrb[6].mxu0 %vm963_vm3, %v1051_v8  ;;  %v4272_v13 = vpop.f32.mrb[5].mxu1  ;;  %v1279_v14 = vsel %vm1278_vm9, %v1267_v12, -inf }
 0x486   : > { %1280 = vmax.xlane.f32.xlu0 %v1279_v14  ;;  %4255 = vmatprep.mubr.msk.f32.mxu0 %vm5011_vm4, %v5012_v61 }
 0x489   : > { %4256 = vmatmul.mubr.msk.f32.gmra.mrb[8].mxu0 %vm963_vm3, %v1052_v15 }
 0x48a   : > { %4324 = vmatprep.mubr.msk.f32.mxu0 %vm5011_vm4, %v5012_v61 }
 0x50b   : > { %v1274_v16 = vpop.xlane.xlu0 %1273 }
 0x50c   : > { %v1282_v17 = vsub.f32 %v1257_v62, %v1274_v16 }
 0x50e   : > { %v1285_v9 = vmul.f32 1.442695, %v1282_v17 }
 0x50f   : > { %v1277_v18 = vpop.xlane.xlu1 %1276 }
 0x510   : > { %4849 = vpow2.f32 %v1285_v9  ;;  %v1283_v19 = vsub.f32 %v1262_v4, %v1277_v18 }
 0x512   : > { %v1287_v20 = vmul.f32 1.442695, %v1283_v19 }
 0x513   : > { %v1281_v25 = vpop.xlane.xlu0 %1280 }
 0x514   : > { %4851 = vpow2.f32 %v1287_v20  ;;  %v1284_v28 = vsub.f32 %v1267_v12, %v1281_v25 }
 0x516   : > { %v1289_v30 = vmul.f32 1.442695, %v1284_v28 }
 0x518   : > { %4853 = vpow2.f32 %v1289_v30 }
 0x51a   : > { %v5376_v21 = vpop.eup %4849 }
 0x51b   : > { %v1291_v22 = vsel %vm1271_vm8, %v5376_v21, 0.0 }
 0x51c   : > { %1292 = vadd.xlane.f32.xlu1 %v1291_v22 }
 0x51e   : > { %v5380_v11 = vpop.eup %4851 }
 0x51f   : > { %v1294_v23 = vsel %vm1271_vm8, %v5380_v11, 0.0 }
 0x520   : > { %1295 = vadd.xlane.f32.xlu0 %v1294_v23 }
 0x522   : > { %v5402_v32 = vpop.eup %4853 }
 0x523   : > { %v1297_v34 = vsel %vm1278_vm9, %v5402_v32, 0.0 }
 0x52d   : > { %1310 = vrot.lane.b32.xlu1 %v5330_v31, %s5014_s3 }
 0x531   : > { %4770 = vrot.lane.b32.xlu1 %v5327_v29, %s5015_s17 }
 0x535   : > { %1420 = vrot.lane.b32.xlu1 %v5330_v31, %s5015_s17 }
 0x536   : > { %4765 = vrot.lane.b32.xlu0 %v5327_v29, %s5014_s3 }
 0x53a   : > { %4775 = vrot.lane.b32.xlu0 %v5327_v29, %s5016_s29 }
 0x53e   : > { %1412 = vrot.lane.b32.xlu0 %v5323_v27, %s5017_s28 }
 0x542   : > { %1673 = vrot.lane.b32.xlu0 %v5330_v31, %s5016_s29 }
 0x546   : > { %1663 = vrot.lane.b32.xlu0 %v5320_v26, %s5018_s30 }
 0x54a   : > { %1667 = vrot.lane.b32.xlu0 %v5330_v31, %s5018_s30 }
 0x558   : > { %v1160_v33 = vpop.f32.mrb[6].mxu0 }
 0x559   : > { %v1161_v35 = vadd.f32 %v5317_v24, %v1160_v33  ;;  %1298 = vadd.xlane.f32.xlu1 %v1297_v34  ;;  %v4254_v36 = vpop.f32.mrb[7].mxu0 }
 0x55b   : > { %v2173_v38 = vrot.slane %v1161_v35, 1 }
 0x55c   : > { %v1165_v37 = vpop.f32.mrb[8].mxu0 }
 0x55d   : > { %v1166_v39 = vadd.f32 %v5317_v24, %v1165_v37  ;;  %v4257_v41 = vpop.f32.mrb[9].mxu0  ;;  %v5411_v44 = vsel %vm2171_vm10, %v2172_v42, %v2173_v38 }
 0x55f   : > { %v5409_v43 = vrot.slane %v1166_v39, 1 }
 0x561   : > { %v5414_v45 = vsel %vm2171_vm10, %v2173_v38, %v5409_v43 }
 0x562   : > { %v5418_v46 = vpack.i.bf16 %v5414_v45, %v5411_v44 }
 0x564   : > { %4785 = vrot.lane.b32.xlu0 %v5418_v46, %s5013_s2 }
 0x568   : > { %1918 = vrot.lane.b32.xlu0 %v5323_v27, %s5019_s4 }
 0x56a   : > { %1410 = vrot.lane.b32.xlu1 %v5320_v26, %s5017_s28 }
 0x56c   : > { %2181 = vrot.lane.b32.xlu0 %v5409_v43, %s5013_s2  ;;  %s5024_s2 = smov 8  }
 0x56e   : > { %1414 = vrot.lane.b32.xlu1 %v5330_v31, %s5017_s28 }
 0x570   : > { %2420 = vrot.lane.b32.xlu0 %v5409_v43, %s5015_s17 }
 0x572   : > { %4780 = vrot.lane.b32.xlu1 %v5327_v29, %s5020_s23 }
 0x574   : > { %2410 = vrot.lane.b32.xlu0 %v5411_v44, %s5017_s28 }
 0x576   : > { %1665 = vrot.lane.b32.xlu1 %v5323_v27, %s5018_s30 }
 0x578   : > { %2414 = vrot.lane.b32.xlu0 %v5409_v43, %s5017_s28 }
 0x57a   : > { %1926 = vrot.lane.b32.xlu1 %v5330_v31, %s5020_s23 }
 0x57c   : > { %4800 = vrot.lane.b32.xlu0 %v5418_v46, %s5020_s23 }
 0x57e   : > { %1916 = vrot.lane.b32.xlu1 %v5320_v26, %s5019_s4 }
 0x580   : > { %2663 = vrot.lane.b32.xlu0 %v5414_v45, %s5018_s30 }
 0x582   : > { %1920 = vrot.lane.b32.xlu1 %v5330_v31, %s5019_s4 }
 0x584   : > { %2922 = vrot.lane.b32.xlu0 %v5409_v43, %s5020_s23 }
 0x586   : > { %4790 = vrot.lane.b32.xlu1 %v5418_v46, %s5015_s17  ;;  %s5026_s17 = smov 24  }
 0x588   : > { %2914 = vrot.lane.b32.xlu0 %v5414_v45, %s5019_s4 }
 0x58a   : > { %4795 = vrot.lane.b32.xlu1 %v5418_v46, %s5016_s29 }
 0x58e   : > { %2412 = vrot.lane.b32.xlu1 %v5414_v45, %s5017_s28  ;;  %s6264_s28 = scalar_lea.vmem %s6218_s10, %s5153_s26 }
 0x592   : > { %2671 = vrot.lane.b32.xlu1 %v5409_v43, %s5016_s29 }
 0x596   : > { %2661 = vrot.lane.b32.xlu1 %v5411_v44, %s5018_s30 }
 0x59a   : > { %2665 = vrot.lane.b32.xlu1 %v5409_v43, %s5018_s30 }
 0x59e   : > { %2912 = vrot.lane.b32.xlu1 %v5411_v44, %s5019_s4 }
 0x5a2   : > { %2916 = vrot.lane.b32.xlu1 %v5409_v43, %s5019_s4 }
 0x5a9   : > { %v1293_v24 = vpop.xlane.xlu1 %1292 }
 0x5aa   : > { %4855 = vrcp.f32 %v1293_v24 }
 0x5ad   : > { %v1296_v26 = vpop.xlane.xlu0 %1295  ;;  %v1311_v47 = vpop.permute.xlu1 %1310 }
 0x5ae   : > { %4857 = vrcp.f32 %v1296_v26 }
 0x5b1   : > { %v4766_v27 = vpop.permute.xlu0 %4765  ;;  %v4771_v55 = vpop.permute.xlu1 %4770 }
 0x5b2   : > { %v4768_v48 = vunpack.i.h.bf16 %v4766_v27  ;;  %v4767_v49 = vunpack.i.l.bf16 %v4766_v27  ;;  %v4773_v62 = vunpack.i.h.bf16 %v4771_v55  ;;  %v4772_v63 = vunpack.i.l.bf16 %v4771_v55 }
 0x5b4   : > { %v4625_v50 = vpack.c.bf16 %v4768_v48, %v4767_v49  ;;  %v4856_v52 = vpop.eup %4855  ;;  %v4628_v2 = vpack.c.bf16 %v4773_v62, %v4772_v63 }
 0x5b5   : > { %v4776_v51 = vpop.permute.xlu0 %4775  ;;  %v1301_v57 = vmul.f32 %v4856_v52, %v5376_v21  ;;  %v1421_v4 = vpop.permute.xlu1 %1420 }
 0x5b6   : > { %v4778_v53 = vunpack.i.h.bf16 %v4776_v51  ;;  %v4777_v54 = vunpack.i.l.bf16 %v4776_v51  ;;  %4626 = vmatpush3.bf16.msra.mxu1 %v4625_v50 }
 0x5b7   : > { %4277 = vmatprep.subr.mxu1 %v5012_v61 }
 0x5b8   : > { %v4635_v56 = vpack.c.bf16 %v4778_v53, %v4777_v54  ;;  %v4858_v60 = vpop.eup %4857 }
 0x5b9   : > { %v1413_v59 = vpop.permute.xlu0 %1412  ;;  %v1303_v0 = vmul.f32 %v4858_v60, %v5380_v11 }
 0x5ba   : > { %4278 = vmatpush3.msk.msra.mxu1 %vm1323_vm11, %v1311_v47  ;;  %4637 = vmatpush3.bf16.xpose.msk.msra.mxu0 %vm5340_vm7, %v4635_v56 }
 0x5bb   : > { %4280 = vmatmul.mubr.msk.f32.vlgmr.msra.gmra.mrb[6].mxu1 %vm1271_vm8, %v1301_v57  ;;  %4627 = vmatprep.subr.bf16.mxu1 %v5010_v58 }
 0x5bc   : > { %4282 = vmatprep.mubr.msk.f32.mxu1 %vm5011_vm4, %v5012_v61  ;;  %4322 = vmatprep.subr.mxu0 %v5012_v61 }
 0x5bd   : > { %v1674_v1 = vpop.permute.xlu0 %1673 }
 0x5bf   : > { %4283 = vmatmul.mubr.msk.f32.gmra.mrb[8].mxu1 %vm1271_vm8, %v1303_v0 }
 0x5c0   : > { %4285 = vmatprep.mubr.msk.f32.mxu1 %vm5011_vm4, %v5012_v61 }
 0x5c1   : > { %4630 = vmatpush3.bf16.xpose.msk.msra.mxu1 %vm5340_vm7, %v4628_v2  ;;  %v1664_v3 = vpop.permute.xlu0 %1663 }
 0x5c2   : > { %4323 = vmatpush3.xpose.msk.msra.mxu0 %vm1178_vm6, %v1674_v1  ;;  %4292 = vmatprep.subr.mxu1 %v5012_v61 }
 0x5c3   : > { %4641 = vmatprep.subr.bf16.mxu0 %v5010_v58 }
 0x5c5   : > { %4325 = vmatmul.mubr.msk.f32.vlgmr.msra.gmra.mrb[10].mxu0 %vm1178_vm6, %v1664_v3  ;;  %v1668_v17 = vpop.permute.xlu0 %1667 }
 0x5c6   : > { %4327 = vmatprep.mubr.msk.f32.mxu0 %vm5011_vm4, %v5012_v61 }
 0x5c9   : > { %4293 = vmatpush3.xpose.msk.msra.mxu1 %vm1178_vm6, %v1421_v4 }
 0x5ca   : > { %4631 = vmatprep.subr.bf16.mxu1 %v5010_v58 }
 0x5d6   : > { %v4786_v18 = vpop.permute.xlu0 %4785 }
 0x5d7   : > { %v4788_v19 = vunpack.i.h.bf16 %v4786_v18  ;;  %v4787_v20 = vunpack.i.l.bf16 %v4786_v18 }
 0x5d9   : > { %v4649_v11 = vpack.c.bf16 %v4788_v19, %v4787_v20 }
 0x5da   : > { %v1919_v22 = vpop.permute.xlu0 %1918 }
 0x5de   : > { %v2182_v25 = vpop.permute.xlu0 %2181 }
 0x5e2   : > { %v2421_v33 = vpop.permute.xlu0 %2420 }
 0x5e6   : > { %v1299_v5 = vpop.xlane.xlu1 %1298  ;;  %v2411_v35 = vpop.permute.xlu0 %2410 }
 0x5e7   : > { %4859 = vrcp.f32 %v1299_v5 }
 0x5ea   : > { %v1411_v6 = vpop.permute.xlu1 %1410  ;;  %v2415_v39 = vpop.permute.xlu0 %2414 }
 0x5ee   : > { %v1415_v7 = vpop.permute.xlu1 %1414 }
 0x5f1   : > { %v4860_v8 = vpop.eup %4859 }
 0x5f2   : > { %v4781_v10 = vpop.permute.xlu1 %4780  ;;  %v1305_v12 = vmul.f32 %v4860_v8, %v5402_v32 }
 0x5f3   : > { %v4783_v13 = vunpack.i.h.bf16 %v4781_v10  ;;  %v4782_v14 = vunpack.i.l.bf16 %v4781_v10 }
 0x5f4   : > { %4286 = vmatmul.mubr.msk.f32.gmra.mrb[10].mxu1 %vm1271_vm8, %v1305_v12 }
 0x5f5   : > { %v4642_v15 = vpack.c.bf16 %v4783_v13, %v4782_v14  ;;  %4294 = vmatprep.mubr.msk.f32.mxu1 %vm5011_vm4, %v5012_v61 }
 0x5f6   : > { %v1666_v16 = vpop.permute.xlu1 %1665 }
 0x5f7   : > { %4328 = vmatmul.mubr.msk.f32.gmra.mrb[12].mxu0 %vm1178_vm6, %v1666_v16 }
 0x5f8   : > { %4644 = vmatpush3.bf16.xpose.msk.msra.mxu0 %vm5340_vm7, %v4642_v15  ;;  %4295 = vmatmul.mubr.msk.f32.vlgmr.msra.gmra.mrb[12].mxu1 %vm1178_vm6, %v1411_v6 }
 0x5f9   : > { %4330 = vmatprep.mubr.msk.f32.mxu0 %vm5011_vm4, %v5012_v61  ;;  %4297 = vmatprep.mubr.msk.f32.mxu1 %vm5011_vm4, %v5012_v61 }
 0x5fa   : > { %v1927_v9 = vpop.permute.xlu1 %1926  ;;  %4352 = vmatprep.subr.mxu0 %v5012_v61 }
 0x5fb   : > { %4331 = vmatmul.mubr.msk.f32.gmra.mrb[14].mxu0 %vm1178_vm6, %v1668_v17 }
 0x5fc   : > { %4298 = vmatmul.mubr.msk.f32.gmra.mrb[14].mxu1 %vm1178_vm6, %v1413_v59  ;;  %4354 = vmatprep.mubr.msk.f32.mxu0 %vm5011_vm4, %v5012_v61 }
 0x5fd   : > { %4300 = vmatprep.mubr.msk.f32.mxu1 %vm5011_vm4, %v5012_v61 }
 0x5fe   : > { %v1917_v21 = vpop.permute.xlu1 %1916 }
 0x600   : > { %4353 = vmatpush3.xpose.msk.msra.mxu0 %vm1178_vm6, %v1927_v9  ;;  %4301 = vmatmul.mubr.msk.f32.gmra.mrb[16].mxu1 %vm1178_vm6, %v1415_v7 }
 0x601   : > { %4648 = vmatprep.subr.bf16.mxu0 %v5010_v58  ;;  %4309 = vmatprep.mubr.msk.f32.mxu1 %vm5011_vm4, %v5012_v61 }
 0x602   : > { %v1921_v23 = vpop.permute.xlu1 %1920 }
 0x603   : > { %4355 = vmatmul.mubr.msk.f32.vlgmr.msra.gmra.mrb[16].mxu0 %vm1178_vm6, %v1917_v21 }
 0x604   : > { %4651 = vmatpush3.bf16.xpose.msk.msra.mxu0 %vm5340_vm7, %v4649_v11  ;;  %4357 = vmatprep.mubr.msk.f32.mxu0 %vm5011_vm4, %v5012_v61 }
 0x605   : > { %4382 = vmatprep.subr.mxu0 %v5012_v61 }
 0x606   : > { %v4791_v28 = vpop.permute.xlu1 %4790 }
 0x607   : > { %4358 = vmatmul.mubr.msk.f32.gmra.mrb[18].mxu0 %vm1178_vm6, %v1919_v22  ;;  %v4793_v30 = vunpack.i.h.bf16 %v4791_v28  ;;  %v4792_v32 = vunpack.i.l.bf16 %v4791_v28 }
 0x608   : > { %4360 = vmatprep.mubr.msk.f32.mxu0 %vm5011_vm4, %v5012_v61 }
 0x609   : > { %v4656_v34 = vpack.c.bf16 %v4793_v30, %v4792_v32 }
 0x60a   : > { %v4796_v36 = vpop.permute.xlu1 %4795 }
 0x60b   : > { %4361 = vmatmul.mubr.msk.f32.gmra.mrb[20].mxu0 %vm1178_vm6, %v1921_v23  ;;  %v4798_v37 = vunpack.i.h.bf16 %v4796_v36  ;;  %v4797_v38 = vunpack.i.l.bf16 %v4796_v36 }
 0x60c   : > { %4383 = vmatpush3.xpose.msk.msra.mxu0 %vm1178_vm6, %v2182_v25  ;;  %4384 = vmatprep.mubr.msk.f32.mxu0 %vm5011_vm4, %v5012_v61 }
 0x60d   : > { %4655 = vmatprep.subr.bf16.mxu0 %v5010_v58  ;;  %v4663_v41 = vpack.c.bf16 %v4798_v37, %v4797_v38 }
 0x60e   : > { %v2413_v42 = vpop.permute.xlu1 %2412 }
 0x60f   : > { %4385 = vmatmul.mubr.msk.f32.vlgmr.msra.gmra.mrb[22].mxu0 %vm1178_vm6, %v5411_v44  ;;  %v4801_v44 = vpop.permute.xlu0 %4800 }
 0x610   : > { %4658 = vmatpush3.bf16.xpose.msk.msra.mxu0 %vm5340_vm7, %v4656_v34  ;;  %4387 = vmatprep.mubr.msk.f32.mxu0 %vm5011_vm4, %v5012_v61  ;;  %v4803_v24 = vunpack.i.h.bf16 %v4801_v44  ;;  %v4802_v26 = vunpack.i.l.bf16 %v4801_v44 }
 0x611   : > { %4412 = vmatprep.subr.mxu0 %v5012_v61 }
 0x612   : > { %v4670_v27 = vpack.c.bf16 %v4803_v24, %v4802_v26 }
 0x613   : > { %4388 = vmatmul.mubr.msk.f32.gmra.mrb[24].mxu0 %vm1178_vm6, %v5414_v45  ;;  %v2672_v45 = vpop.permute.xlu1 %2671  ;;  %v2664_v48 = vpop.permute.xlu0 %2663 }
 0x614   : > { %4390 = vmatprep.mubr.msk.f32.mxu0 %vm5011_vm4, %v5012_v61 }
 0x617   : > { %4391 = vmatmul.mubr.msk.f32.gmra.mrb[26].mxu0 %vm1178_vm6, %v5409_v43  ;;  %v2662_v47 = vpop.permute.xlu1 %2661  ;;  %v2923_v50 = vpop.permute.xlu0 %2922 }
 0x618   : > { %4413 = vmatpush3.xpose.msk.msra.mxu0 %vm1178_vm6, %v2421_v33  ;;  %4414 = vmatprep.mubr.msk.f32.mxu0 %vm5011_vm4, %v5012_v61 }
 0x619   : > { %4662 = vmatprep.subr.bf16.mxu0 %v5010_v58 }
 0x61b   : > { %4415 = vmatmul.mubr.msk.f32.vlgmr.msra.gmra.mrb[28].mxu0 %vm1178_vm6, %v2411_v35  ;;  %v2666_v49 = vpop.permute.xlu1 %2665  ;;  %v2915_v51 = vpop.permute.xlu0 %2914 }
 0x61c   : > { %4665 = vmatpush3.bf16.xpose.msk.msra.mxu0 %vm5340_vm7, %v4663_v41  ;;  %4417 = vmatprep.mubr.msk.f32.mxu0 %vm5011_vm4, %v5012_v61 }
 0x61d   : > { %4442 = vmatprep.subr.mxu0 %v5012_v61 }
 0x61f   : > { %4418 = vmatmul.mubr.msk.f32.gmra.mrb[30].mxu0 %vm1178_vm6, %v2413_v42  ;;  %v2913_v40 = vpop.permute.xlu1 %2912 }
 0x620   : > { %4420 = vmatprep.mubr.msk.f32.mxu0 %vm5011_vm4, %v5012_v61 }
 0x623   : > { %4421 = vmatmul.mubr.msk.f32.gmra.mrb[32].mxu0 %vm1178_vm6, %v2415_v39  ;;  %v2917_v52 = vpop.permute.xlu1 %2916 }
 0x624   : > { %4443 = vmatpush3.xpose.msk.msra.mxu0 %vm1178_vm6, %v2672_v45  ;;  %4444 = vmatprep.mubr.msk.f32.mxu0 %vm5011_vm4, %v5012_v61 }
 0x625   : > { %4669 = vmatprep.subr.bf16.mxu0 %v5010_v58 }
 0x627   : > { %4445 = vmatmul.mubr.msk.f32.vlgmr.msra.gmra.mrb[34].mxu0 %vm1178_vm6, %v2662_v47 }
 0x628   : > { %4672 = vmatpush3.bf16.xpose.msk.msra.mxu0 %vm5340_vm7, %v4670_v27  ;;  %4447 = vmatprep.mubr.msk.f32.mxu0 %vm5011_vm4, %v5012_v61 }
 0x629   : > { %4472 = vmatprep.subr.mxu0 %v5012_v61 }
 0x62b   : > { %4448 = vmatmul.mubr.msk.f32.gmra.mrb[36].mxu0 %vm1178_vm6, %v2664_v48 }
 0x62c   : > { %4450 = vmatprep.mubr.msk.f32.mxu0 %vm5011_vm4, %v5012_v61 }
 0x62f   : > { %4451 = vmatmul.mubr.msk.f32.gmra.mrb[38].mxu0 %vm1178_vm6, %v2666_v49 }
 0x630   : > { %4473 = vmatpush3.xpose.msk.msra.mxu0 %vm1178_vm6, %v2923_v50  ;;  %4474 = vmatprep.mubr.msk.f32.mxu0 %vm5011_vm4, %v5012_v61 }
 0x631   : > { %4676 = vmatprep.subr.bf16.mxu0 %v5010_v58 }
 0x633   : > { %4475 = vmatmul.mubr.msk.f32.vlgmr.msra.gmra.mrb[40].mxu0 %vm1178_vm6, %v2913_v40 }
 0x634   : > { %4477 = vmatprep.mubr.msk.f32.mxu0 %vm5011_vm4, %v5012_v61 }
 0x637   : > { %4478 = vmatmul.mubr.msk.f32.gmra.mrb[42].mxu0 %vm1178_vm6, %v2915_v51 }
 0x638   : > { %4480 = vmatprep.mubr.msk.f32.mxu0 %vm5011_vm4, %v5012_v61 }
 0x63b   : > { %4481 = vmatmul.mubr.msk.f32.gmra.mrb[44].mxu0 %vm1178_vm6, %v2917_v52 }
 0x63c   : > { %4506 = vmatprep.mubr.msk.f32.mxu0 %vm5011_vm4, %v5012_v61 }
 0x68e   : > { %v1392_v53 = vpop.f32.mrb[6].mxu1 }
 0x68f   : > { %1406 = vst.msk [vmem:[#allocation3] sm:$0xff] %vm1178_vm6, %v1392_v53  ;;  %v4281_v54 = vpop.f32.mrb[7].mxu1 }
 0x692   : > { %v1397_v55 = vpop.f32.mrb[8].mxu1 }
 0x693   : > { %1407 = vst.msk [vmem:[#allocation3 + $0x8] sm:$0xff] %vm1178_vm6, %v1397_v55  ;;  %v4284_v56 = vpop.f32.mrb[9].mxu1 }
 0x698   : > { %v5578_v57 = vpop.f32.mrb[10].mxu0 }
 0x699   : > { %v4326_v59 = vpop.f32.mrb[11].mxu0  ;;  %v1767_v60 = vsel %vm1271_vm8, %v5578_v57, -inf }
 0x69a   : > { %1768 = vmax.xlane.f32.xlu0 %v1767_v60 }
 0x6c7   : > { %v1402_v62 = vpop.f32.mrb[10].mxu1 }
 0x6c8   : > { %1409 = vst.msk [vmem:[#allocation3 + $0x10] sm:$0x1] %vm1408_vm12, %v1402_v62  ;;  %v4287_v63 = vpop.f32.mrb[11].mxu1 }
 0x6ca   : > { %v5583_v0 = vpop.f32.mrb[12].mxu0 }
 0x6cb   : > { %v5585_v1 = vpop.f32.mrb[12].mxu1  ;;  %v4329_v2 = vpop.f32.mrb[13].mxu0  ;;  %v1770_v3 = vsel %vm1271_vm8, %v5583_v0, -inf }
 0x6cc   : > { %v4296_v4 = vpop.f32.mrb[13].mxu1  ;;  %1771 = vmax.xlane.f32.xlu0 %v1770_v3 }
 0x6ce   : > { %v5589_v5 = vpop.f32.mrb[14].mxu0 }
 0x6cf   : > { %v5591_v6 = vpop.f32.mrb[14].mxu1  ;;  %v4332_v7 = vpop.f32.mrb[15].mxu0  ;;  %v1773_v8 = vsel %vm1278_vm9, %v5589_v5, -inf }
 0x6d0   : > { %v4299_v10 = vpop.f32.mrb[15].mxu1  ;;  %1774 = vmax.xlane.f32.xlu1 %v1773_v8 }
 0x6d3   : > { %v5595_v12 = vpop.f32.mrb[16].mxu1 }
 0x6d4   : > { %v4302_v13 = vpop.f32.mrb[17].mxu1 }
 0x6d6   : > { %v5597_v14 = vpop.f32.mrb[16].mxu0 }
 0x6d7   : > { %v4356_v15 = vpop.f32.mrb[17].mxu0  ;;  %v2020_v16 = vsel %vm1271_vm8, %v5597_v14, -inf }
 0x6d8   : > { %2021 = vmax.xlane.f32.xlu0 %v2020_v16 }
 0x6da   : > { %v5601_v17 = vpop.f32.mrb[18].mxu0 }
 0x6db   : > { %v4359_v9 = vpop.f32.mrb[19].mxu0  ;;  %v2023_v18 = vsel %vm1271_vm8, %v5601_v17, -inf }
 0x6dc   : > { %2024 = vmax.xlane.f32.xlu1 %v2023_v18 }
 0x6de   : > { %v5605_v19 = vpop.f32.mrb[20].mxu0 }
 0x6df   : > { %v4362_v20 = vpop.f32.mrb[21].mxu0  ;;  %v2026_v21 = vsel %vm1278_vm9, %v5605_v19, -inf }
 0x6e0   : > { %2027 = vmax.xlane.f32.xlu0 %v2026_v21 }
 0x6e2   : > { %v5609_v22 = vpop.f32.mrb[22].mxu0 }
 0x6e3   : > { %v4386_v11 = vpop.f32.mrb[23].mxu0  ;;  %v2275_v23 = vsel %vm1271_vm8, %v5609_v22, -inf }
 0x6e4   : > { %2276 = vmax.xlane.f32.xlu1 %v2275_v23 }
 0x6e6   : > { %v5613_v25 = vpop.f32.mrb[24].mxu0 }
 0x6e7   : > { %v4389_v28 = vpop.f32.mrb[25].mxu0  ;;  %v2278_v30 = vsel %vm1271_vm8, %v5613_v25, -inf }
 0x6e8   : > { %2279 = vmax.xlane.f32.xlu0 %v2278_v30 }
 0x6ea   : > { %v5617_v32 = vpop.f32.mrb[26].mxu0 }
 0x6eb   : > { %v4392_v33 = vpop.f32.mrb[27].mxu0  ;;  %v2281_v34 = vsel %vm1278_vm9, %v5617_v32, -inf }
 0x6ec   : > { %2282 = vmax.xlane.f32.xlu1 %v2281_v34 }
 0x6ee   : > { %v5621_v35 = vpop.f32.mrb[28].mxu0 }
 0x6ef   : > { %v4416_v36 = vpop.f32.mrb[29].mxu0  ;;  %v2514_v37 = vsel %vm1271_vm8, %v5621_v35, -inf }
 0x6f0   : > { %2515 = vmax.xlane.f32.xlu0 %v2514_v37 }
 0x6f2   : > { %v5625_v38 = vpop.f32.mrb[30].mxu0 }
 0x6f3   : > { %v4419_v39 = vpop.f32.mrb[31].mxu0  ;;  %v2517_v41 = vsel %vm1271_vm8, %v5625_v38, -inf }
 0x6f4   : > { %2518 = vmax.xlane.f32.xlu1 %v2517_v41  ;;  %v1514_v41 = vsel %vm1271_vm8, %v5585_v1, -inf }
 0x6f6   : > { %v5629_v42 = vpop.f32.mrb[32].mxu0 }
 0x6f7   : > { %v4422_v44 = vpop.f32.mrb[33].mxu0  ;;  %v2520_v45 = vsel %vm1278_vm9, %v5629_v42, -inf }
 0x6f8   : > { %2521 = vmax.xlane.f32.xlu0 %v2520_v45 }
 0x6fa   : > { %v5633_v24 = vpop.f32.mrb[34].mxu0 }
 0x6fb   : > { %v4446_v26 = vpop.f32.mrb[35].mxu0  ;;  %v2765_v27 = vsel %vm1271_vm8, %v5633_v24, -inf }
 0x6fc   : > { %2766 = vmax.xlane.f32.xlu1 %v2765_v27  ;;  %v1520_v26 = vsel %vm1278_vm9, %v5595_v12, -inf }
 0x6fe   : > { %v5637_v47 = vpop.f32.mrb[36].mxu0 }
 0x6ff   : > { %v4449_v48 = vpop.f32.mrb[37].mxu0  ;;  %v2768_v49 = vsel %vm1271_vm8, %v5637_v47, -inf }
 0x700   : > { %2769 = vmax.xlane.f32.xlu0 %v2768_v49 }
 0x702   : > { %v5641_v50 = vpop.f32.mrb[38].mxu0 }
 0x703   : > { %v4452_v40 = vpop.f32.mrb[39].mxu0  ;;  %v2771_v51 = vsel %vm1278_vm9, %v5641_v50, -inf }
 0x704   : > { %2772 = vmax.xlane.f32.xlu1 %v2771_v51 }
 0x706   : > { %v5645_v52 = vpop.f32.mrb[40].mxu0 }
 0x707   : > { %v4476_v53 = vpop.f32.mrb[41].mxu0  ;;  %v3016_v54 = vsel %vm1271_vm8, %v5645_v52, -inf }
 0x708   : > { %3017 = vmax.xlane.f32.xlu0 %v3016_v54 }
 0x70a   : > { %v5649_v55 = vpop.f32.mrb[42].mxu0 }
 0x70b   : > { %v4479_v56 = vpop.f32.mrb[43].mxu0  ;;  %v3019_v59 = vsel %vm1271_vm8, %v5649_v55, -inf }
 0x70c   : > { %3020 = vmax.xlane.f32.xlu1 %v3019_v59 }
 0x70e   : > { %v5653_v60 = vpop.f32.mrb[44].mxu0 }
 0x70f   : > { %v4482_v62 = vpop.f32.mrb[45].mxu0  ;;  %v3022_v63 = vsel %vm1278_vm9, %v5653_v60, -inf }
 0x710   : > { %3023 = vmax.xlane.f32.xlu0 %v3022_v63 }
 0x727   : > { %v1769_v2 = vpop.xlane.xlu0 %1768 }
 0x728   : > { %v1776_v3 = vsub.f32 %v5578_v57, %v1769_v2 }
 0x72a   : > { %v1779_v4 = vmul.f32 1.442695, %v1776_v3 }
 0x72c   : > { %4861 = vpow2.f32 %v1779_v4 }
 0x736   : > { %v5658_v7 = vpop.eup %4861 }
 0x737   : > { %v1785_v8 = vsel %vm1271_vm8, %v5658_v7, 0.0 }
 0x738   : > { %1786 = vadd.xlane.f32.xlu0 %v1785_v8 }
 0x74e   : > { %4805 = vrot.lane.b32.xlu0 %v5327_v29, %s5021_s27 }
 0x759   : > { %v1772_v10 = vpop.xlane.xlu0 %1771 }
 0x75a   : > { %v1777_v13 = vsub.f32 %v5583_v0, %v1772_v10 }
 0x75c   : > { %v1781_v15 = vmul.f32 1.442695, %v1777_v13 }
 0x75d   : > { %v1775_v16 = vpop.xlane.xlu1 %1774 }
 0x75e   : > { %4863 = vpow2.f32 %v1781_v15  ;;  %v1778_v27 = vsub.f32 %v5589_v5, %v1775_v16 }
 0x760   : > { %v1783_v51 = vmul.f32 1.442695, %v1778_v27 }
 0x765   : > { %v2022_v30 = vpop.xlane.xlu0 %2021 }
 0x766   : > { %v2029_v53 = vsub.f32 %v5597_v14, %v2022_v30 }
 0x768   : > { %v5665_v9 = vpop.eup %4863  ;;  %v2032_v59 = vmul.f32 1.442695, %v2029_v53 }
 0x769   : > { %v2025_v57 = vpop.xlane.xlu1 %2024  ;;  %v1788_v18 = vsel %vm1271_vm8, %v5665_v9, 0.0 }
 0x76a   : > { %v2030_v20 = vsub.f32 %v5601_v17, %v2025_v57  ;;  %1789 = vadd.xlane.f32.xlu1 %v1788_v18 }
 0x76c   : > { %v2034_v21 = vmul.f32 1.442695, %v2030_v20  ;;  %v1517_v20 = vsel %vm1271_vm8, %v5591_v6, -inf }
 0x76d   : > { %v2028_v34 = vpop.xlane.xlu0 %2027 }
 0x76e   : > { %4865 = vpow2.f32 %v2034_v21  ;;  %v2031_v62 = vsub.f32 %v5605_v19, %v2028_v34 }
 0x770   : > { %v2036_v2 = vmul.f32 1.442695, %v2031_v62 }
 0x771   : > { %v2277_v11 = vpop.xlane.xlu1 %2276 }
 0x772   : > { %v2284_v23 = vsub.f32 %v5609_v22, %v2277_v11 }
 0x774   : > { %v2287_v28 = vmul.f32 1.442695, %v2284_v23 }
 0x775   : > { %v2280_v22 = vpop.xlane.xlu0 %2279 }
 0x776   : > { %4867 = vpow2.f32 %v2287_v28  ;;  %v2285_v3 = vsub.f32 %v5613_v25, %v2280_v22 }
 0x777   : > { %4869 = vpow2.f32 %v1783_v51 }
 0x778   : > { %v5671_v0 = vpop.eup %4865  ;;  %4871 = vpow2.f32 %v2032_v59  ;;  %v2289_v19 = vmul.f32 1.442695, %v2285_v3 }
 0x779   : > { %v2041_v33 = vsel %vm1271_vm8, %v5671_v0, 0.0  ;;  %v2283_v37 = vpop.xlane.xlu1 %2282  ;;  %4873 = vpow2.f32 %v2036_v2 }
 0x77a   : > { %2042 = vadd.xlane.f32.xlu0 %v2041_v33  ;;  %4875 = vpow2.f32 %v2289_v19  ;;  %v2286_v16 = vsub.f32 %v5617_v32, %v2283_v37 }
 0x77b   : > { %1551 = vrot.lane.b32.xlu1 %v5330_v31, %s5021_s27 }
 0x77c   : > { %v2291_v18 = vmul.f32 1.442695, %v2286_v16 }
 0x77d   : > { %v2516_v39 = vpop.xlane.xlu0 %2515 }
 0x77e   : > { %4877 = vpow2.f32 %v2291_v18 }
 0x77f   : > { %4810 = vrot.lane.b32.xlu1 %v5327_v29, %s5022_s21 }
 0x780   : > { %v5679_v17 = vpop.eup %4867 }
 0x781   : > { %v2293_v36 = vsel %vm1271_vm8, %v5679_v17, 0.0  ;;  %v2519_v44 = vpop.xlane.xlu1 %2518  ;;  %v5709_v8 = vpop.eup %4869 }
 0x782   : > { %2294 = vadd.xlane.f32.xlu0 %v2293_v36  ;;  %v1791_v10 = vsel %vm1278_vm9, %v5709_v8, 0.0  ;;  %v5715_v13 = vpop.eup %4871  ;;  %v2523_v36 = vsub.f32 %v5621_v35, %v2516_v39 }
 0x783   : > { %v2038_v25 = vsel %vm1271_vm8, %v5715_v13, 0.0  ;;  %v5719_v15 = vpop.eup %4873 }
 0x784   : > { %v2044_v57 = vsel %vm1278_vm9, %v5719_v15, 0.0  ;;  %v5726_v21 = vpop.eup %4875  ;;  %v2526_v37 = vmul.f32 1.442695, %v2523_v36 }
 0x785   : > { %v2522_v45 = vpop.xlane.xlu0 %2521  ;;  %v2296_v11 = vsel %vm1271_vm8, %v5726_v21, 0.0 }
 0x786   : > { %1515 = vmax.xlane.f32.xlu0 %v1514_v41  ;;  %v2524_v41 = vsub.f32 %v5625_v38, %v2519_v44  ;;  %4879 = vpow2.f32 %v2526_v37 }
 0x788   : > { %v5730_v23 = vpop.eup %4877 }
 0x789   : > { %v5688_v48 = vpop.xlane.xlu1 %2766  ;;  %v2299_v32 = vsel %vm1278_vm9, %v5730_v23, 0.0 }
 0x78a   : > { %1521 = vmax.xlane.f32.xlu0 %v1520_v26  ;;  %v2528_v26 = vmul.f32 1.442695, %v2524_v41 }
 0x78c   : > { %4881 = vpow2.f32 %v2528_v26 }
 0x78d   : > { %v5690_v49 = vpop.xlane.xlu0 %2769 }
 0x78e   : > { %v2775_v40 = vsub.f32 %v5637_v47, %v5690_v49 }
 0x790   : > { %v5744_v51 = vpop.eup %4879  ;;  %v2779_v16 = vmul.f32 1.442695, %v2775_v40 }
 0x791   : > { %v5695_v54 = vpop.xlane.xlu1 %2772  ;;  %v2532_v53 = vsel %vm1271_vm8, %v5744_v51, 0.0 }
 0x792   : > { %v2776_v56 = vsub.f32 %v5641_v50, %v5695_v54 }
 0x795   : > { %v5700_v5 = vpop.xlane.xlu0 %3017 }
 0x796   : > { %v3025_v63 = vsub.f32 %v5645_v52, %v5700_v5  ;;  %v5748_v59 = vpop.eup %4881  ;;  %v2781_v5 = vmul.f32 1.442695, %v2776_v56 }
 0x799   : > { %v3021_v38 = vpop.xlane.xlu1 %3020 }
 0x79d   : > { %v5705_v14 = vpop.xlane.xlu0 %3023 }
 0x79e   : > { %v3027_v4 = vsub.f32 %v5653_v60, %v5705_v14 }
 0x7a0   : > { %1804 = vrot.lane.b32.xlu0 %v5330_v31, %s5022_s21 }
 0x7a3   : > { %1792 = vadd.xlane.f32.xlu1 %v1791_v10 }
 0x7a7   : > { %2039 = vadd.xlane.f32.xlu1 %v2038_v25 }
 0x7ab   : > { %2045 = vadd.xlane.f32.xlu1 %v2044_v57 }
 0x7af   : > { %1518 = vmax.xlane.f32.xlu1 %v1517_v20 }
 0x7b3   : > { %2297 = vadd.xlane.f32.xlu1 %v2296_v11 }
 0x7bf   : > { %2300 = vadd.xlane.f32.xlu0 %v2299_v32 }
 0x7c4   : > { %4815 = vrot.lane.b32.xlu1 %v5327_v29, %s5023_s1  ;;  %v2525_v29 = vsub.f32 %v5629_v42, %v2522_v45  ;;  %v2774_v45 = vsub.f32 %v5633_v24, %v5688_v48 }
 0x7c5   : > { %v5736_v28 = vpop.xlane.xlu0 %1786 }
 0x7c6   : > { %v2530_v27 = vmul.f32 1.442695, %v2525_v29  ;;  %v2777_v2 = vmul.f32 1.442695, %v2774_v45  ;;  %v3028_v29 = vmul.f32 1.442695, %v3025_v63 }
 0x7c8   : > { %4883 = vpow2.f32 %v2530_v27  ;;  %v3026_v27 = vsub.f32 %v5649_v55, %v3021_v38 }
 0x7c9   : > { %v4806_v30 = vpop.permute.xlu0 %4805  ;;  %4885 = vpow2.f32 %v2777_v2 }
 0x7ca   : > { %v4808_v33 = vunpack.i.h.bf16 %v4806_v30  ;;  %v4807_v34 = vunpack.i.l.bf16 %v4806_v30 }
 0x7cc   : > { %v4632_v22 = vpack.c.bf16 %v4808_v33, %v4807_v34 }
 0x7ce   : > { %4633 = vmatpush3.bf16.msra.mxu1 %v4632_v22 }
 0x7cf   : > { %4307 = vmatprep.subr.mxu1 %v5012_v61 }
 0x7d2   : > { %v5752_v35 = vpop.eup %4883 }
 0x7d3   : > { %v2538_v42 = vsel %vm1278_vm9, %v5752_v35, 0.0  ;;  %v5773_v48 = vpop.eup %4885 }
 0x7d4   : > { %v2783_v20 = vsel %vm1271_vm8, %v5773_v48, 0.0 }
 0x7d5   : > { %2057 = vrot.lane.b32.xlu0 %v5330_v31, %s5023_s1  ;;  %v2535_v31 = vsel %vm1271_vm8, %v5748_v59, 0.0 }
 0x7e8   : > { %2533 = vadd.xlane.f32.xlu1 %v2532_v53  ;;  %v3030_v53 = vmul.f32 1.442695, %v3026_v27 }
 0x7ec   : > { %2536 = vadd.xlane.f32.xlu1 %v2535_v31 }
 0x7f4   : > { %2539 = vadd.xlane.f32.xlu0 %v2538_v42 }
 0x7f7   : > { %v5756_v39 = vpop.xlane.xlu1 %1789 }
 0x7fb   : > { %v1552_v44 = vpop.permute.xlu1 %1551 }
 0x7fc   : > { %4308 = vmatpush3.msk.msra.mxu1 %vm1323_vm11, %v1552_v44 }
 0x7fd   : > { %4820 = vrot.lane.b32.xlu1 %v5418_v46, %s5014_s3  ;;  %4638 = vmatprep.subr.bf16.mxu1 %v5010_v58 }
 0x807   : > { %v5764_v62 = vpop.xlane.xlu0 %2042 }
 0x80f   : > { %v5766_v3 = vpop.xlane.xlu0 %2294 }
 0x813   : > { %v1516_v19 = vpop.xlane.xlu0 %1515 }
 0x814   : > { %v1523_v10 = vsub.f32 %v5585_v1, %v1516_v19 }
 0x816   : > { %v1526_v25 = vmul.f32 1.442695, %v1523_v10 }
 0x817   : > { %v1522_v57 = vpop.xlane.xlu0 %1521 }
 0x818   : > { %4887 = vpow2.f32 %v1526_v25  ;;  %v1525_v18 = vsub.f32 %v5595_v12, %v1522_v57  ;;  %v4811_v12 = vpop.permute.xlu1 %4810 }
 0x819   : > { %4889 = vpow2.f32 %v2779_v16  ;;  %v4813_v19 = vunpack.i.h.bf16 %v4811_v12  ;;  %v4812_v10 = vunpack.i.l.bf16 %v4811_v12 }
 0x81a   : > { %v1530_v24 = vmul.f32 1.442695, %v1525_v18 }
 0x81b   : > { %v4639_v16 = vpack.c.bf16 %v4813_v19, %v4812_v10 }
 0x81c   : > { %4891 = vpow2.f32 %v1530_v24 }
 0x821   : > { %2784 = vadd.xlane.f32.xlu1 %v2783_v20 }
 0x822   : > { %v4888_v11 = vpop.eup %4887 }
 0x823   : > { %v1532_v1 = vsel %vm1271_vm8, %v4888_v11, 0.0  ;;  %v5778_v32 = vpop.eup %4889 }
 0x824   : > { %v2786_v47 = vsel %vm1271_vm8, %v5778_v32, 0.0 }
 0x825   : > { %1533 = vadd.xlane.f32.xlu1 %v1532_v1 }
 0x826   : > { %v5782_v49 = vpop.eup %4891 }
 0x827   : > { %v1538_v40 = vsel %vm1278_vm9, %v5782_v49, 0.0 }
 0x829   : > { %2787 = vadd.xlane.f32.xlu1 %v2786_v47 }
 0x82d   : > { %1539 = vadd.xlane.f32.xlu1 %v1538_v40 }
 0x830   : > { %v5786_v30 = vpop.xlane.xlu1 %1792 }
 0x834   : > { %v5788_v33 = vpop.xlane.xlu1 %2039 }
 0x838   : > { %v5790_v34 = vpop.xlane.xlu1 %2045 }
 0x83c   : > { %v1519_v22 = vpop.xlane.xlu1 %1518 }
 0x83d   : > { %v1524_v36 = vsub.f32 %v5591_v6, %v1519_v22  ;;  %v3032_v6 = vmul.f32 1.442695, %v3027_v4 }
 0x83e   : > { %4825 = vrot.lane.b32.xlu1 %v5418_v46, %s5021_s27 }
 0x83f   : > { %v1528_v37 = vmul.f32 1.442695, %v1524_v36 }
 0x840   : > { %v5826_v4 = vpop.xlane.xlu1 %2297 }
 0x841   : > { %4893 = vpow2.f32 %v1528_v37 }
 0x842   : > { %4895 = vpow2.f32 %v3028_v29 }
 0x843   : > { %4897 = vpow2.f32 %v3030_v53 }
 0x844   : > { %4899 = vpow2.f32 %v3032_v6  ;;  %v4816_v38 = vpop.permute.xlu1 %4815 }
 0x845   : > { %4901 = vpow2.f32 %v2781_v5  ;;  %v4818_v37 = vunpack.i.h.bf16 %v4816_v38 }
 0x84b   : > { %v4894_v41 = vpop.eup %4893 }
 0x84c   : > { %v1535_v26 = vsel %vm1271_vm8, %v4894_v41, 0.0  ;;  %v5803_v31 = vpop.eup %4895 }
 0x84d   : > { %1536 = vadd.xlane.f32.xlu0 %v1535_v26  ;;  %v3034_v42 = vsel %vm1271_vm8, %v5803_v31, 0.0  ;;  %v5807_v44 = vpop.eup %4897  ;;  %v4817_v26 = vunpack.i.l.bf16 %v4816_v38 }
 0x84e   : > { %v3037_v52 = vsel %vm1271_vm8, %v5807_v44, 0.0  ;;  %v5813_v55 = vpop.eup %4899 }
 0x84f   : > { %v3040_v60 = vsel %vm1278_vm9, %v5813_v55, 0.0  ;;  %v5822_v63 = vpop.eup %4901 }
 0x850   : > { %v2789_v14 = vsel %vm1278_vm9, %v5822_v63, 0.0 }
 0x862   : > { %3035 = vadd.xlane.f32.xlu1 %v3034_v42 }
 0x863   : > { %2312 = vrot.lane.b32.xlu0 %v5409_v43, %s5014_s3  ;;  %s5025_s3 = smov 16  }
 0x866   : > { %3038 = vadd.xlane.f32.xlu1 %v3037_v52 }
 0x86a   : > { %3041 = vadd.xlane.f32.xlu1 %v3040_v60 }
 0x875   : > { %v5832_v50 = vpop.xlane.xlu1 %2533 }
 0x879   : > { %v5836_v54 = vpop.xlane.xlu1 %2536 }
 0x87b   : > { %4835 = vrot.lane.b32.xlu1 %v5418_v46, %s5023_s1 }
 0x87d   : > { %v5840_v56 = vpop.permute.xlu1 %4820 }
 0x87e   : > { %v4822_v29 = vunpack.i.l.bf16 %v5840_v56 }
 0x882   : > { %2790 = vadd.xlane.f32.xlu0 %v2789_v14 }
 0x898   : > { %2551 = vrot.lane.b32.xlu0 %v5409_v43, %s5021_s27  ;;  %s6265_s27 = scalar_lea.vmem %s6220_s12, %s5153_s26 }
 0x89c   : > { %4830 = vrot.lane.b32.xlu0 %v5418_v46, %s5022_s21 }
 0x8a0   : > { %2802 = vrot.lane.b32.xlu0 %v5409_v43, %s5022_s21 }
 0x8a4   : > { %3053 = vrot.lane.b32.xlu0 %v5409_v43, %s5023_s1  ;;  %v1805_v43 = vpop.permute.xlu0 %1804  ;;  %s6266_s1 = scalar_lea.vmem %s6222_s14, %s5153_s26 }
 0x8a8   : > { %v2301_v57 = vpop.xlane.xlu0 %2300 }
 0x8ac   : > { %v2058_v18 = vpop.permute.xlu0 %2057 }
 0x8ae   : > { %v5842_v45 = vpop.xlane.xlu1 %2784 }
 0x8b0   : > { %v5852_v20 = vpop.xlane.xlu0 %2539 }
 0x8b2   : > { %v1534_v2 = vpop.xlane.xlu1 %1533 }
 0x8b3   : > { %4903 = vrcp.f32 %v1534_v2 }
 0x8b6   : > { %v5850_v24 = vpop.xlane.xlu1 %2787 }
 0x8bd   : > { %v4904_v25 = vpop.eup %4903 }
 0x8be   : > { %v1542_v46 = vmul.f32 %v4904_v25, %v4888_v11  ;;  %v1540_v11 = vpop.xlane.xlu1 %1539 }
 0x8c0   : > { %4310 = vmatmul.mubr.msk.f32.vlgmr.msra.gmra.mrb[18].mxu1 %vm1271_vm8, %v1542_v46 }
 0x8c1   : > { %4640 = vmatpush3.bf16.msra.mxu1 %v4639_v16  ;;  %4312 = vmatprep.mubr.msk.f32.mxu1 %vm5011_vm4, %v5012_v61 }
 0x8c2   : > { %4337 = vmatprep.subr.mxu1 %v5012_v61  ;;  %v4826_v53 = vpop.permute.xlu1 %4825 }
 0x8c3   : > { %v4828_v52 = vunpack.i.h.bf16 %v4826_v53  ;;  %v4827_v60 = vunpack.i.l.bf16 %v4826_v53 }
 0x8c5   : > { %4338 = vmatpush3.msk.msra.mxu1 %vm1323_vm11, %v1805_v43  ;;  %v4660_v14 = vpack.c.bf16 %v4828_v52, %v4827_v60 }
 0x8c6   : > { %4645 = vmatprep.subr.bf16.mxu1 %v5010_v58 }
 0x8da   : > { %v1537_v1 = vpop.xlane.xlu0 %1536 }
 0x8db   : > { %4905 = vrcp.f32 %v1537_v1 }
 0x8dc   : > { %4907 = vrcp.f32 %v1540_v11 }
 0x8dd   : > { %4909 = vrcp.f32 %v5736_v28 }
 0x8de   : > { %4911 = vrcp.f32 %v5756_v39  ;;  %v2313_v6 = vpop.permute.xlu0 %2312 }
 0x8df   : > { %4913 = vrcp.f32 %v5786_v30 }
 0x8e0   : > { %4915 = vrcp.f32 %v5788_v33  ;;  %v4823_v33 = vunpack.i.h.bf16 %v5840_v56 }
 0x8e1   : > { %4917 = vrcp.f32 %v5764_v62 }
 0x8e2   : > { %4919 = vrcp.f32 %v5790_v34  ;;  %v4653_v27 = vpack.c.bf16 %v4823_v33, %v4822_v29  ;;  %v3170_v29 = vld [vmem:[%s5176_s20 + $0x10] sm:$0xff] }
 0x8e3   : > { %4921 = vrcp.f32 %v5766_v3 }
 0x8e4   : > { %4923 = vrcp.f32 %v5826_v4 }
 0x8e5   : > { %v4906_v47 = vpop.eup %4905  ;;  %4925 = vrcp.f32 %v2301_v57 }
 0x8e6   : > { %v1544_v12 = vmul.f32 %v4906_v47, %v4894_v41  ;;  %v4908_v40 = vpop.eup %4907  ;;  %v4646_v41 = vpack.c.bf16 %v4818_v37, %v4817_v26  ;;  %4927 = vrcp.f32 %v5832_v50 }
 0x8e7   : > { %v1546_v22 = vmul.f32 %v4908_v40, %v5782_v49  ;;  %v4910_v36 = vpop.eup %4909  ;;  %4929 = vrcp.f32 %v5836_v54 }
 0x8e8   : > { %4313 = vmatmul.mubr.msk.f32.gmra.mrb[20].mxu1 %vm1271_vm8, %v1544_v12  ;;  %v1795_v28 = vmul.f32 %v4910_v36, %v5658_v7  ;;  %v4912_v39 = vpop.eup %4911  ;;  %4931 = vrcp.f32 %v5852_v20 }
 0x8e9   : > { %4315 = vmatprep.mubr.msk.f32.mxu1 %vm5011_vm4, %v5012_v61  ;;  %v1797_v49 = vmul.f32 %v4912_v39, %v5665_v9  ;;  %v4914_v30 = vpop.eup %4913  ;;  %4933 = vrcp.f32 %v5842_v45 }
 0x8ea   : > { %v1799_v7 = vmul.f32 %v4914_v30, %v5709_v8  ;;  %v4916_v62 = vpop.eup %4915  ;;  %4935 = vrcp.f32 %v5850_v24  ;;  %v3169_v30 = vld [vmem:[%s5176_s20 + $0x8] sm:$0xff] }
 0x8eb   : > { %v2048_v9 = vmul.f32 %v4916_v62, %v5715_v13  ;;  %v4918_v34 = vpop.eup %4917 }
 0x8ec   : > { %4316 = vmatmul.mubr.msk.f32.gmra.mrb[22].mxu1 %vm1271_vm8, %v1546_v22  ;;  %v2050_v8 = vmul.f32 %v4918_v34, %v5671_v0  ;;  %v4920_v3 = vpop.eup %4919 }
 0x8ed   : > { %4339 = vmatprep.mubr.msk.f32.mxu1 %vm5011_vm4, %v5012_v61  ;;  %v2052_v13 = vmul.f32 %v4920_v3, %v5719_v15  ;;  %v4922_v42 = vpop.eup %4921 }
 0x8ee   : > { %v2303_v0 = vmul.f32 %v4922_v42, %v5679_v17  ;;  %v4924_v5 = vpop.eup %4923 }
 0x8ef   : > { %v3036_v4 = vpop.xlane.xlu1 %3035  ;;  %v2305_v15 = vmul.f32 %v4924_v5, %v5726_v21  ;;  %v4926_v38 = vpop.eup %4925 }
 0x8f0   : > { %4340 = vmatmul.mubr.msk.f32.vlgmr.msra.gmra.mrb[24].mxu1 %vm1271_vm8, %v1795_v28  ;;  %v2307_v50 = vmul.f32 %v4926_v38, %v5730_v23  ;;  %v4928_v2 = vpop.eup %4927 }
 0x8f1   : > { %4647 = vmatpush3.bf16.msra.mxu1 %v4646_v41  ;;  %4342 = vmatprep.mubr.msk.f32.mxu1 %vm5011_vm4, %v5012_v61  ;;  %v2542_v21 = vmul.f32 %v4928_v2, %v5744_v51  ;;  %v4930_v10 = vpop.eup %4929 }
 0x8f2   : > { %4367 = vmatprep.subr.mxu1 %v5012_v61  ;;  %v2544_v25 = vmul.f32 %v4930_v10, %v5748_v59  ;;  %v4932_v45 = vpop.eup %4931 }
 0x8f3   : > { %v3039_v17 = vpop.xlane.xlu1 %3038  ;;  %v2546_v57 = vmul.f32 %v4932_v45, %v5752_v35 }
 0x8f4   : > { %4343 = vmatmul.mubr.msk.f32.gmra.mrb[26].mxu1 %vm1271_vm8, %v1797_v49  ;;  %v3168_v49 = vld [vmem:[%s5176_s20] sm:$0xff] }
 0x8f5   : > { %4368 = vmatpush3.msk.msra.mxu1 %vm1323_vm11, %v2058_v18  ;;  %4345 = vmatprep.mubr.msk.f32.mxu1 %vm5011_vm4, %v5012_v61  ;;  %v4934_v18 = vpop.eup %4933  ;;  %v4677_v62 = vpack.c.bf16 %v3169_v30, %v3168_v49 }
 0x8f6   : > { %4652 = vmatprep.subr.bf16.mxu1 %v5010_v58  ;;  %v2793_v59 = vmul.f32 %v4934_v18, %v5773_v48  ;;  %v4936_v1 = vpop.eup %4935 }
 0x8f7   : > { %v3042_v54 = vpop.xlane.xlu1 %3041  ;;  %v2795_v35 = vmul.f32 %v4936_v1, %v5778_v32  ;;  %4678 = vmatpush3.bf16.msra.mxu0 %v4677_v62  ;;  %v4030_v62 = vld [vmem:[%s6264_s28] ss:$0 sm:$0xff] }
 0x8f8   : > { %4346 = vmatmul.mubr.msk.f32.gmra.mrb[28].mxu1 %vm1271_vm8, %v1799_v7  ;;  %4679 = vmatprep.subr.bf16.mxu0 %v5010_v58 }
 0x8f9   : > { %4369 = vmatprep.mubr.msk.f32.mxu1 %vm5011_vm4, %v5012_v61 }
 0x8fb   : > { %v4836_v16 = vpop.permute.xlu1 %4835 }
 0x8fc   : > { %4370 = vmatmul.mubr.msk.f32.vlgmr.msra.gmra.mrb[30].mxu1 %vm1271_vm8, %v2048_v9  ;;  %v4838_v24 = vunpack.i.h.bf16 %v4836_v16  ;;  %v4837_v20 = vunpack.i.l.bf16 %v4836_v16  ;;  %v3171_v9 = vld [vmem:[%s5176_s20 + $0x18] sm:$0xff] }
 0x8fd   : > { %4654 = vmatpush3.bf16.msra.mxu1 %v4653_v27  ;;  %4372 = vmatprep.mubr.msk.f32.mxu1 %vm5011_vm4, %v5012_v61  ;;  %v4680_v27 = vpack.c.bf16 %v3171_v9, %v3170_v29 }
 0x8fe   : > { %4397 = vmatprep.subr.mxu1 %v5012_v61  ;;  %v4674_v47 = vpack.c.bf16 %v4838_v24, %v4837_v20 }
 0x8ff   : > { %4681 = vmatpush3.bf16.msra.mxu0 %v4680_v27 }
 0x900   : > { %4373 = vmatmul.mubr.msk.f32.gmra.mrb[32].mxu1 %vm1271_vm8, %v2050_v8  ;;  %4688 = vmatprep.subr.bf16.mxu0 %v5010_v58 }
 0x901   : > { %4398 = vmatpush3.msk.msra.mxu1 %vm1323_vm11, %v2313_v6  ;;  %4375 = vmatprep.mubr.msk.f32.mxu1 %vm5011_vm4, %v5012_v61 }
 0x902   : > { %4659 = vmatprep.subr.bf16.mxu1 %v5010_v58 }
 0x904   : > { %4376 = vmatmul.mubr.msk.f32.gmra.mrb[34].mxu1 %vm1271_vm8, %v2052_v13 }
 0x905   : > { %4399 = vmatprep.mubr.msk.f32.mxu1 %vm5011_vm4, %v5012_v61 }
 0x908   : > { %4400 = vmatmul.mubr.msk.f32.vlgmr.msra.gmra.mrb[36].mxu1 %vm1271_vm8, %v2303_v0 }
 0x909   : > { %4661 = vmatpush3.bf16.msra.mxu1 %v4660_v14  ;;  %4402 = vmatprep.mubr.msk.f32.mxu1 %vm5011_vm4, %v5012_v61 }
 0x90a   : > { %4427 = vmatprep.subr.mxu1 %v5012_v61 }
 0x90c   : > { %4403 = vmatmul.mubr.msk.f32.gmra.mrb[38].mxu1 %vm1271_vm8, %v2305_v15 }
 0x90d   : > { %4405 = vmatprep.mubr.msk.f32.mxu1 %vm5011_vm4, %v5012_v61 }
 0x90f   : > { %v2791_v56 = vpop.xlane.xlu0 %2790 }
 0x910   : > { %4406 = vmatmul.mubr.msk.f32.gmra.mrb[40].mxu1 %vm1271_vm8, %v2307_v50  ;;  %4937 = vrcp.f32 %v2791_v56 }
 0x911   : > { %4429 = vmatprep.mubr.msk.f32.mxu1 %vm5011_vm4, %v5012_v61  ;;  %4939 = vrcp.f32 %v3036_v4 }
 0x912   : > { %4941 = vrcp.f32 %v3039_v17 }
 0x913   : > { %v2552_v19 = vpop.permute.xlu0 %2551  ;;  %4943 = vrcp.f32 %v3042_v54 }
 0x914   : > { %4428 = vmatpush3.msk.msra.mxu1 %vm1323_vm11, %v2552_v19 }
 0x915   : > { %4430 = vmatmul.mubr.msk.f32.vlgmr.msra.gmra.mrb[42].mxu1 %vm1271_vm8, %v2542_v21  ;;  %4666 = vmatprep.subr.bf16.mxu1 %v5010_v58 }
 0x916   : > { %4432 = vmatprep.mubr.msk.f32.mxu1 %vm5011_vm4, %v5012_v61 }
 0x917   : > { %v4831_v23 = vpop.permute.xlu0 %4830 }
 0x918   : > { %v4833_v46 = vunpack.i.h.bf16 %v4831_v23  ;;  %v4832_v51 = vunpack.i.l.bf16 %v4831_v23 }
 0x919   : > { %4433 = vmatmul.mubr.msk.f32.gmra.mrb[44].mxu1 %vm1271_vm8, %v2544_v25 }
 0x91a   : > { %v4667_v43 = vpack.c.bf16 %v4833_v46, %v4832_v51  ;;  %4435 = vmatprep.mubr.msk.f32.mxu1 %vm5011_vm4, %v5012_v61  ;;  %v4938_v12 = vpop.eup %4937 }
 0x91b   : > { %v2803_v11 = vpop.permute.xlu0 %2802  ;;  %v2797_v40 = vmul.f32 %v4938_v12, %v5822_v63  ;;  %v4940_v22 = vpop.eup %4939 }
 0x91c   : > { %4668 = vmatpush3.bf16.msra.mxu1 %v4667_v43  ;;  %v3044_v32 = vmul.f32 %v4940_v22, %v5803_v31  ;;  %v4942_v36 = vpop.eup %4941 }
 0x91d   : > { %4436 = vmatmul.mubr.msk.f32.gmra.mrb[46].mxu1 %vm1271_vm8, %v2546_v57  ;;  %4457 = vmatprep.subr.mxu1 %v5012_v61  ;;  %v3046_v37 = vmul.f32 %v4942_v36, %v5807_v44  ;;  %v4944_v26 = vpop.eup %4943 }
 0x91e   : > { %4459 = vmatprep.mubr.msk.f32.mxu1 %vm5011_vm4, %v5012_v61  ;;  %v3048_v63 = vmul.f32 %v4944_v26, %v5813_v55 }
 0x91f   : > { %v3054_v48 = vpop.permute.xlu0 %3053 }
 0x920   : > { %4458 = vmatpush3.msk.msra.mxu1 %vm1323_vm11, %v2803_v11 }
 0x921   : > { %4460 = vmatmul.mubr.msk.f32.vlgmr.msra.gmra.mrb[48].mxu1 %vm1271_vm8, %v2793_v59  ;;  %4673 = vmatprep.subr.bf16.mxu1 %v5010_v58 }
 0x922   : > { %4675 = vmatpush3.bf16.msra.mxu1 %v4674_v47  ;;  %4462 = vmatprep.mubr.msk.f32.mxu1 %vm5011_vm4, %v5012_v61 }
 0x923   : > { %4487 = vmatprep.subr.mxu1 %v5012_v61 }
 0x925   : > { %4463 = vmatmul.mubr.msk.f32.gmra.mrb[50].mxu1 %vm1271_vm8, %v2795_v35 }
 0x926   : > { %4488 = vmatpush3.msk.msra.mxu1 %vm1323_vm11, %v3054_v48  ;;  %4465 = vmatprep.mubr.msk.f32.mxu1 %vm5011_vm4, %v5012_v61 }
 0x927   : > { %4682 = vmatprep.subr.bf16.mxu1 %v5010_v58 }
 0x929   : > { %4466 = vmatmul.mubr.msk.f32.gmra.mrb[52].mxu1 %vm1271_vm8, %v2797_v40 }
 0x92a   : > { %4489 = vmatprep.mubr.msk.f32.mxu1 %vm5011_vm4, %v5012_v61 }
 0x92d   : > { %4490 = vmatmul.mubr.msk.f32.vlgmr.msra.gmra.mrb[54].mxu1 %vm1271_vm8, %v3044_v32 }
 0x92e   : > { %4492 = vmatprep.mubr.msk.f32.mxu1 %vm5011_vm4, %v5012_v61 }
 0x931   : > { %4493 = vmatmul.mubr.msk.f32.gmra.mrb[56].mxu1 %vm1271_vm8, %v3046_v37 }
 0x932   : > { %4495 = vmatprep.mubr.msk.f32.mxu1 %vm5011_vm4, %v5012_v61 }
 0x935   : > { %4496 = vmatmul.mubr.msk.f32.gmra.mrb[58].mxu1 %vm1271_vm8, %v3048_v63 }
 0x936   : > { %4529 = vmatprep.mubr.msk.f32.mxu1 %vm5011_vm4, %v5012_v61 }
 0x993   : > { %v1632_v31 = vpop.f32.mrb[18].mxu1 }
 0x994   : > { %1649 = vrot.lane.b32.xlu0 %v1632_v31, %s5024_s2  ;;  %v4311_v44 = vpop.f32.mrb[19].mxu1 }
 0x9bb   : > { %v1637_v28 = vpop.f32.mrb[20].mxu1 }
 0x9bc   : > { %1651 = vrot.lane.b32.xlu1 %v1637_v28, %s5024_s2  ;;  %v4314_v39 = vpop.f32.mrb[21].mxu1 }
 0x9bf   : > { %v1642_v41 = vpop.f32.mrb[22].mxu1 }
 0x9c0   : > { %1653 = vrot.lane.b32.xlu0 %v1642_v41, %s5024_s2  ;;  %v4317_v55 = vpop.f32.mrb[23].mxu1 }
 0x9c3   : > { %v1885_v7 = vpop.f32.mrb[24].mxu1 }
 0x9c4   : > { %1902 = vrot.lane.b32.xlu0 %v1885_v7, %s5025_s3  ;;  %v4341_v33 = vpop.f32.mrb[25].mxu1 }
 0x9c7   : > { %v1890_v34 = vpop.f32.mrb[26].mxu1 }
 0x9c8   : > { %1904 = vrot.lane.b32.xlu0 %v1890_v34, %s5025_s3  ;;  %v4344_v8 = vpop.f32.mrb[27].mxu1  ;;  %v4965_v34 = vld [vmem:[#allocation2] sm:$0xff] }
 0x9cb   : > { %v1895_v3 = vpop.f32.mrb[28].mxu1 }
 0x9cc   : > { %1906 = vrot.lane.b32.xlu0 %v1895_v3, %s5025_s3  ;;  %v4347_v53 = vpop.f32.mrb[29].mxu1 }
 0x9cf   : > { %v2138_v6 = vpop.f32.mrb[30].mxu1 }
 0x9d0   : > { %2155 = vrot.lane.b32.xlu0 %v2138_v6, %s5026_s17  ;;  %v4371_v13 = vpop.f32.mrb[31].mxu1 }
 0x9d1   : > { %v4966_v13 = vld [vmem:[#allocation2 + $0x8] sm:$0xff] }
 0x9d3   : > { %v2143_v42 = vpop.f32.mrb[32].mxu1 }
 0x9d4   : > { %2157 = vrot.lane.b32.xlu1 %v2143_v42, %s5026_s17  ;;  %v4374_v52 = vpop.f32.mrb[33].mxu1 }
 0x9d7   : > { %v2148_v60 = vpop.f32.mrb[34].mxu1 }
 0x9d8   : > { %2159 = vrot.lane.b32.xlu0 %v2148_v60, %s5026_s17  ;;  %v4377_v0 = vpop.f32.mrb[35].mxu1 }
 0x9db   : > { %v2393_v5 = vpop.f32.mrb[36].mxu1 }
 0x9dc   : > { %2407 = vst.msk [vmem:[#allocation3 + $0x11] sm:$0xff] %vm1178_vm6, %v2393_v5  ;;  %v4401_v14 = vpop.f32.mrb[37].mxu1 }
 0x9dd   : > { %v4967_v14 = vld [vmem:[#allocation2 + $0x10] sm:$0xff] }
 0x9df   : > { %v2398_v4 = vpop.f32.mrb[38].mxu1 }
 0x9e0   : > { %2408 = vst.msk [vmem:[#allocation3 + $0x19] sm:$0xff] %vm1178_vm6, %v2398_v4  ;;  %v4404_v15 = vpop.f32.mrb[39].mxu1  ;;  %vm3653_vm6 = vcmask (!%p4045_p5), 254977  }
 0x9e3   : > { %v2403_v38 = vpop.f32.mrb[40].mxu1 }
 0x9e4   : > { %2409 = vst.msk [vmem:[#allocation3 + $0x21] sm:$0x1] %vm1408_vm12, %v2403_v38  ;;  %v4407_v17 = vpop.f32.mrb[41].mxu1 }
 0x9e8   : > { %v2632_v50 = vpop.f32.mrb[42].mxu1 }
 0x9e9   : > { %2649 = vrot.lane.b32.xlu1 %v2632_v50, %s5024_s2  ;;  %v4431_v56 = vpop.f32.mrb[43].mxu1 }
 0x9ea   : > { %v4968_v56 = vld [vmem:[#allocation2 + $0x18] sm:$0xff] }
 0x9ec   : > { %v2637_v2 = vpop.f32.mrb[44].mxu1 }
 0x9ed   : > { %2651 = vrot.lane.b32.xlu0 %v2637_v2, %s5024_s2  ;;  %v4434_v21 = vpop.f32.mrb[45].mxu1 }
 0x9f0   : > { %v2642_v54 = vpop.f32.mrb[46].mxu1 }
 0x9f1   : > { %v4437_v19 = vpop.f32.mrb[47].mxu1 }
 0x9f4   : > { %v2883_v10 = vpop.f32.mrb[48].mxu1 }
 0x9f5   : > { %2900 = vrot.lane.b32.xlu1 %v2883_v10, %s5025_s3  ;;  %v4461_v23 = vpop.f32.mrb[49].mxu1 }
 0x9f6   : > { %v4969_v23 = vld [vmem:[#allocation2 + $0x20] sm:$0x3] }
 0x9f8   : > { %v2888_v25 = vpop.f32.mrb[50].mxu1 }
 0x9f9   : > { %2902 = vrot.lane.b32.xlu1 %v2888_v25, %s5025_s3  ;;  %v4464_v45 = vpop.f32.mrb[51].mxu1 }
 0x9fc   : > { %v2893_v46 = vpop.f32.mrb[52].mxu1 }
 0x9fd   : > { %v4467_v51 = vpop.f32.mrb[53].mxu1 }
 0xa00   : > { %v3134_v16 = vpop.f32.mrb[54].mxu1 }
 0xa01   : > { %3151 = vrot.lane.b32.xlu1 %v3134_v16, %s5026_s17  ;;  %v4491_v43 = vpop.f32.mrb[55].mxu1 }
 0xa04   : > { %v3139_v57 = vpop.f32.mrb[56].mxu1 }
 0xa05   : > { %2653 = vrot.lane.b32.xlu1 %v2642_v54, %s5024_s2  ;;  %3153 = vrot.lane.b32.xlu0 %v3139_v57, %s5026_s17  ;;  %v4494_v18 = vpop.f32.mrb[57].mxu1 }
 0xa06   : > { %v1650_v24 = vpop.permute.xlu0 %1649 }
 0xa07   : > { %1659 = vst.msk [vmem:[#allocation3] sm:$0xff] %vm1658_vm13, %v1650_v24 }
 0xa08   : > { %v3144_v20 = vpop.f32.mrb[58].mxu1 }
 0xa09   : > { %2904 = vrot.lane.b32.xlu0 %v2893_v46, %s5025_s3  ;;  %3155 = vrot.lane.b32.xlu1 %v3144_v20, %s5026_s17  ;;  %v4497_v59 = vpop.f32.mrb[59].mxu1  ;;  %s6267_s3 = scalar_lea.vmem %s6224_s16, %s5153_s26  ;;  %s6270_s26 = sld [smem:[#allocation19_spill]] (!%p4045_p5) }
 0xa2e   : > { %v1652_v11 = vpop.permute.xlu1 %1651 }
 0xa2f   : > { %1660 = vst.msk [vmem:[#allocation3 + $0x8] sm:$0xff] %vm1658_vm13, %v1652_v11 }
 0xa32   : > { %v1654_v1 = vpop.permute.xlu0 %1653 }
 0xa33   : > { %1662 = vst.msk [vmem:[#allocation3 + $0x10] sm:$0x1] %vm1661_vm14, %v1654_v1  ;;  %v3378_v1 = vld [vmem:[%s5193_s7] sm:$0xff] }
 0xa36   : > { %v1903_v47 = vpop.permute.xlu0 %1902 }
 0xa37   : > { %1912 = vst.msk [vmem:[#allocation3] sm:$0xff] %vm1911_vm15, %v1903_v47  ;;  %v3379_v47 = vld [vmem:[%s5193_s7 + $0x8] sm:$0xff] }
 0xa3a   : > { %v1905_v35 = vpop.permute.xlu0 %1904 }
 0xa3b   : > { %1913 = vst.msk [vmem:[#allocation3 + $0x8] sm:$0xff] %vm1911_vm15, %v1905_v35  ;;  %v4683_v35 = vpack.c.bf16 %v3379_v47, %v3378_v1 }
 0xa3d   : > { %4684 = vmatpush3.bf16.msra.mxu1 %v4683_v35 }
 0xa3e   : > { %v1907_v12 = vpop.permute.xlu0 %1906  ;;  %4685 = vmatprep.subr.bf16.mxu1 %v5010_v58 }
 0xa3f   : > { %1915 = vst.msk [vmem:[#allocation3 + $0x10] sm:$0x1] %vm1914_vm0, %v1907_v12  ;;  %v3380_v12 = vld [vmem:[%s5193_s7 + $0x10] sm:$0xff] }
 0xa42   : > { %v2156_v48 = vpop.permute.xlu0 %2155 }
 0xa43   : > { %2165 = vst.msk [vmem:[#allocation3] sm:$0xff] %vm2164_vm1, %v2156_v48  ;;  %v3381_v48 = vld [vmem:[%s5193_s7 + $0x18] sm:$0xff] }
 0xa46   : > { %v2158_v40 = vpop.permute.xlu1 %2157 }
 0xa47   : > { %2166 = vst.msk [vmem:[#allocation3 + $0x8] sm:$0xff] %vm2164_vm1, %v2158_v40  ;;  %v4686_v40 = vpack.c.bf16 %v3381_v48, %v3380_v12 }
 0xa49   : > { %4687 = vmatpush3.bf16.msra.mxu1 %v4686_v40 }
 0xa4a   : > { %v2160_v22 = vpop.permute.xlu0 %2159  ;;  %v3163_v32 = vld [vmem:[#allocation3] sm:$0xff] }
 0xa4b   : > { %2168 = vst.msk [vmem:[#allocation3 + $0x10] sm:$0x1] %vm2167_vm2, %v2160_v22  ;;  %4507 = vmatmul.mubr.msk.f32.vlgmr.msra.gmra.mrb[46].mxu0 %vm963_vm3, %v3163_v32 }
 0xa4c   : > { %4509 = vmatprep.mubr.msk.f32.mxu0 %vm5011_vm4, %v5012_v61 }
 0xa4e   : > { %v3164_v36 = vld [vmem:[#allocation3 + $0x8] sm:$0xff] }
 0xa4f   : > { %4510 = vmatmul.mubr.msk.f32.gmra.mrb[48].mxu0 %vm963_vm3, %v3164_v36 }
 0xa50   : > { %4512 = vmatprep.mubr.msk.f32.mxu0 %vm5011_vm4, %v5012_v61 }
 0xa5b   : > { %v2650_v37 = vpop.permute.xlu1 %2649 }
 0xa5c   : > { %2658 = vst.msk [vmem:[#allocation3 + $0x11] sm:$0xff] %vm1658_vm13, %v2650_v37 }
 0xa5f   : > { %v2652_v26 = vpop.permute.xlu0 %2651 }
 0xa60   : > { %2659 = vst.msk [vmem:[#allocation3 + $0x19] sm:$0xff] %vm1658_vm13, %v2652_v26 }
 0xa67   : > { %v2901_v63 = vpop.permute.xlu1 %2900 }
 0xa68   : > { %2909 = vst.msk [vmem:[#allocation3 + $0x11] sm:$0xff] %vm1911_vm15, %v2901_v63 }
 0xa6b   : > { %v2903_v31 = vpop.permute.xlu1 %2902 }
 0xa6c   : > { %2910 = vst.msk [vmem:[#allocation3 + $0x19] sm:$0xff] %vm1911_vm15, %v2903_v31 }
 0xa73   : > { %v3152_v44 = vpop.permute.xlu1 %3151 }
 0xa74   : > { %3160 = vst.msk [vmem:[#allocation3 + $0x11] sm:$0xff] %vm2164_vm1, %v3152_v44 }
 0xa77   : > { %v2654_v28 = vpop.permute.xlu1 %2653  ;;  %v3154_v39 = vpop.permute.xlu0 %3153 }
 0xa78   : > { %2660 = vst.msk [vmem:[#allocation3 + $0x21] sm:$0x1] %vm1661_vm14, %v2654_v28 }
 0xa79   : > { %3161 = vst.msk [vmem:[#allocation3 + $0x19] sm:$0xff] %vm2164_vm1, %v3154_v39 }
 0xa7b   : > { %v2905_v41 = vpop.permute.xlu0 %2904  ;;  %v3156_v55 = vpop.permute.xlu1 %3155  ;;  %v3165_v49 = vld [vmem:[#allocation3 + $0x10] sm:$0xff] }
 0xa7c   : > { %2911 = vst.msk [vmem:[#allocation3 + $0x21] sm:$0x1] %vm1914_vm0, %v2905_v41  ;;  %4513 = vmatmul.mubr.msk.f32.gmra.mrb[50].mxu0 %vm963_vm3, %v3165_v49 }
 0xa7d   : > { %3162 = vst.msk [vmem:[#allocation3 + $0x21] sm:$0x1] %vm2167_vm2, %v3156_v55  ;;  %4515 = vmatprep.mubr.msk.f32.mxu0 %vm5011_vm4, %v5012_v61 }
 0xa80   : > { %v3166_v30 = vld [vmem:[#allocation3 + $0x18] sm:$0xff] }
 0xa81   : > { %4516 = vmatmul.mubr.msk.f32.gmra.mrb[52].mxu0 %vm963_vm3, %v3166_v30 }
 0xa82   : > { %4518 = vmatprep.mubr.msk.f32.mxu0 %vm5011_vm4, %v5012_v61 }
 0xa84   : > { %v3167_v7 = vld [vmem:[#allocation3 + $0x20] sm:$0x3] }
 0xa85   : > { %4519 = vmatmul.mubr.msk.f32.gmra.mrb[54].mxu0 %vm963_vm3, %v3167_v7 }
 0xa86   : > { %4576 = vmatprep.mubr.msk.f32.mxu0 %vm5011_vm4, %v5012_v61 }
 0xb1e   : > { %v3260_v33 = vpop.f32.mrb[46].mxu0 }
 0xb1f   : > { %v3261_v29 = vadd.f32 %v4030_v62, %v3260_v33  ;;  %v4508_v9 = vpop.f32.mrb[47].mxu0  ;;  %v3520_v33 = vld [vmem:[%s5203_s0 + $0x8] sm:$0xff] }
 0xb21   : > { %v6028_v27 = vadd.f32 %v4965_v34, %v3261_v29  ;;  %v3521_v29 = vld [vmem:[%s5203_s0 + $0x10] sm:$0xff]  ;;  %v3522_v34 = vld [vmem:[%s5203_s0 + $0x18] sm:$0xff] }
 0xb22   : > { %v3265_v8 = vpop.f32.mrb[48].mxu0 }
 0xb23   : > { %v3266_v3 = vadd.f32 %v4030_v62, %v3265_v8  ;;  %v4511_v53 = vpop.f32.mrb[49].mxu0  ;;  %v3291_v6 = vsel %vm963_vm3, %v6028_v27, 0.0  ;;  %v4692_v8 = vpack.c.bf16 %v3522_v34, %v3521_v29  ;;  %v3534_v29 = vld [vmem:[%s5203_s0 + $0x78] sm:$0xff]  ;;  %v4038_v34 = vld [vmem:[%s6266_s1] ss:$0 sm:$0xff] }
 0xb24   : > { %3292 = vadd.xlane.f32.xlu0 %v3291_v6  ;;  %v3524_v53 = vld [vmem:[%s5203_s0 + $0x28] sm:$0xff] }
 0xb25   : > { %v6032_v42 = vadd.f32 %v4966_v13, %v3266_v3  ;;  %v3523_v3 = vld [vmem:[%s5203_s0 + $0x20] sm:$0xff] }
 0xb26   : > { %v4695_v6 = vpack.c.bf16 %v3524_v53, %v3523_v3 }
 0xb27   : > { %v3294_v52 = vsel %vm963_vm3, %v6032_v42, 0.0 }
 0xb28   : > { %3295 = vadd.xlane.f32.xlu1 %v3294_v52 }
 0xb4f   : > { %v3270_v60 = vpop.f32.mrb[50].mxu0 }
 0xb50   : > { %v3271_v0 = vadd.f32 %v4030_v62, %v3270_v60  ;;  %v4514_v5 = vpop.f32.mrb[51].mxu0 }
 0xb52   : > { %v6036_v4 = vadd.f32 %v4967_v14, %v3271_v0 }
 0xb54   : > { %v3275_v15 = vpop.f32.mrb[52].mxu0  ;;  %v3297_v50 = vsel %vm963_vm3, %v6036_v4, 0.0 }
 0xb55   : > { %v3276_v38 = vadd.f32 %v4030_v62, %v3275_v15  ;;  %v4517_v17 = vpop.f32.mrb[53].mxu0  ;;  %3298 = vadd.xlane.f32.xlu0 %v3297_v50  ;;  %v4037_v50 = vld [vmem:[%s6265_s27] ss:$0 sm:$0xff] }
 0xb57   : > { %v6040_v2 = vadd.f32 %v4968_v56, %v3276_v38  ;;  %v4036_v38 = vld [vmem:[%s795_s18] ss:$0 sm:$0xff]  ;;  %s6268_s18 = sld [smem:[#allocation17_spill]] (!%p4045_p5) }
 0xb58   : > { %v3280_v21 = vpop.f32.mrb[54].mxu0 }
 0xb59   : > { %v3300_v54 = vsel %vm963_vm3, %v6040_v2, 0.0  ;;  %v3281_v19 = vadd.f32 %v4030_v62, %v3280_v21  ;;  %v4520_v10 = vpop.f32.mrb[55].mxu0  ;;  %v3519_v62 = vld [vmem:[%s5203_s0] sm:$0xff] }
 0xb5a   : > { %3301 = vadd.xlane.f32.xlu0 %v3300_v54  ;;  %v4689_v9 = vpack.c.bf16 %v3520_v33, %v3519_v62  ;;  %v3533_v33 = vld [vmem:[%s5203_s0 + $0x70] sm:$0xff] }
 0xb5b   : > { %v6044_v25 = vadd.f32 %v4969_v23, %v3281_v19 }
 0xb5c   : > { %4690 = vmatpush3.bf16.msra.mxu0 %v4689_v9  ;;  %v4710_v9 = vpack.c.bf16 %v3534_v29, %v3533_v33 }
 0xb5d   : > { %v3303_v45 = vsel %vm976_vm5, %v6044_v25, 0.0  ;;  %4691 = vmatprep.subr.bf16.mxu0 %v5010_v58 }
 0xb5e   : > { %3304 = vadd.xlane.f32.xlu0 %v3303_v45 }
 0xb60   : > { %4693 = vmatpush3.bf16.msra.mxu0 %v4692_v8 }
 0xb61   : > { %4694 = vmatprep.subr.bf16.mxu0 %v5010_v58 }
 0xb64   : > { %4696 = vmatpush3.bf16.msra.mxu0 %v4695_v6 }
 0xb65   : > { %4697 = vmatprep.subr.bf16.mxu0 %v5010_v58 }
 0xbb1   : > { %v3293_v46 = vpop.xlane.xlu0 %3292 }
 0xbb2   : > { %v3306_v51 = vmul.f32 0.03125, %v3293_v46 }
 0xbb4   : > { %v3311_v16 = vsub.f32 %v6028_v27, %v3306_v51 }
 0xbb5   : > { %v3296_v43 = vpop.xlane.xlu1 %3295 }
 0xbb6   : > { %v3307_v57 = vmul.f32 0.03125, %v3296_v43  ;;  %v3316_v18 = vmul.f32 %v3311_v16, %v3311_v16 }
 0xbb8   : > { %v6050_v24 = vsub.f32 %v6032_v42, %v3307_v57  ;;  %v3321_v20 = vsel %vm963_vm3, %v3316_v18, 0.0 }
 0xbb9   : > { %3322 = vadd.xlane.f32.xlu1 %v3321_v20 }
 0xbba   : > { %v3317_v59 = vmul.f32 %v6050_v24, %v6050_v24 }
 0xbbc   : > { %v3324_v11 = vsel %vm963_vm3, %v3317_v59, 0.0 }
 0xbbd   : > { %3325 = vadd.xlane.f32.xlu0 %v3324_v11 }
 0xbe2   : > { %v3299_v22 = vpop.xlane.xlu0 %3298 }
 0xbe3   : > { %v3308_v32 = vmul.f32 0.03125, %v3299_v22 }
 0xbe5   : > { %v6062_v36 = vsub.f32 %v6036_v4, %v3308_v32 }
 0xbe7   : > { %v3302_v37 = vpop.xlane.xlu0 %3301  ;;  %v3318_v63 = vmul.f32 %v6062_v36, %v6062_v36 }
 0xbe8   : > { %v3309_v26 = vmul.f32 0.03125, %v3302_v37 }
 0xbe9   : > { %v3327_v44 = vsel %vm963_vm3, %v3318_v63, 0.0  ;;  %v3526_v63 = vld [vmem:[%s5203_s0 + $0x38] sm:$0xff] }
 0xbea   : > { %v6067_v31 = vsub.f32 %v6040_v2, %v3309_v26  ;;  %3328 = vadd.xlane.f32.xlu1 %v3327_v44  ;;  %v3525_v26 = vld [vmem:[%s5203_s0 + $0x30] sm:$0xff]  ;;  %v3527_v44 = vld [vmem:[%s5203_s0 + $0x40] sm:$0xff] }
 0xbeb   : > { %v3305_v28 = vpop.xlane.xlu0 %3304 }
 0xbec   : > { %v3319_v39 = vmul.f32 %v6067_v31, %v6067_v31  ;;  %v3310_v41 = vmul.f32 0.03125, %v3305_v28  ;;  %v3528_v28 = vld [vmem:[%s5203_s0 + $0x48] sm:$0xff] }
 0xbee   : > { %v3330_v55 = vsel %vm963_vm3, %v3319_v39, 0.0  ;;  %v6074_v49 = vsub.f32 %v6044_v25, %v3310_v41  ;;  %v4701_v39 = vpack.c.bf16 %v3528_v28, %v3527_v44  ;;  %v3529_v41 = vld [vmem:[%s5203_s0 + $0x50] sm:$0xff] }
 0xbef   : > { %3331 = vadd.xlane.f32.xlu0 %v3330_v55  ;;  %v3530_v55 = vld [vmem:[%s5203_s0 + $0x58] sm:$0xff] }
 0xbf0   : > { %v3320_v30 = vmul.f32 %v6074_v49, %v6074_v49 }
 0xbf2   : > { %v3333_v7 = vsel %vm976_vm5, %v3320_v30, 0.0  ;;  %v3531_v30 = vld [vmem:[%s5203_s0 + $0x60] sm:$0xff] }
 0xbf3   : > { %3334 = vadd.xlane.f32.xlu1 %v3333_v7  ;;  %v3532_v7 = vld [vmem:[%s5203_s0 + $0x68] sm:$0xff]  ;;  %s6269_s0 = sld [smem:[#allocation18_spill]] (!%p4045_p5) }
 0xbf4   : > { %v4707_v62 = vpack.c.bf16 %v3532_v7, %v3531_v30 }
 0xc46   : > { %v3323_v13 = vpop.xlane.xlu1 %3322 }
 0xc47   : > { %v3336_v52 = vmul.f32 0.03125, %v3323_v13 }
 0xc49   : > { %v3341_v60 = vadd.f32 1e-12, %v3336_v52 }
 0xc4a   : > { %v3326_v0 = vpop.xlane.xlu0 %3325 }
 0xc4b   : > { %4945 = vrsqrt.f32 %v3341_v60  ;;  %v3337_v5 = vmul.f32 0.03125, %v3326_v0 }
 0xc4d   : > { %v3342_v14 = vadd.f32 1e-12, %v3337_v5 }
 0xc4f   : > { %4947 = vrsqrt.f32 %v3342_v14 }
 0xc55   : > { %v4946_v15 = vpop.eup %4945 }
 0xc56   : > { %v3351_v17 = vmul.f32 %v4946_v15, %v3311_v16 }
 0xc58   : > { %v3362_v56 = vmul.f32 %v4036_v38, %v3351_v17 }
 0xc59   : > { %v4948_v21 = vpop.eup %4947 }
 0xc5a   : > { %v3373_v54 = vadd.f32 %v4037_v50, %v3362_v56  ;;  %v3352_v19 = vmul.f32 %v4948_v21, %v6050_v24 }
 0xc5c   : > { %4530 = vmatmul.mubr.msk.f32.vlgmr.msra.gmra.mrb[60].mxu1 %vm963_vm3, %v3373_v54  ;;  %v3363_v10 = vmul.f32 %v4036_v38, %v3352_v19 }
 0xc5d   : > { %4532 = vmatprep.mubr.msk.f32.mxu1 %vm5011_vm4, %v5012_v61 }
 0xc5e   : > { %v3374_v23 = vadd.f32 %v4037_v50, %v3363_v10 }
 0xc60   : > { %4533 = vmatmul.mubr.msk.f32.gmra.mrb[62].mxu1 %vm963_vm3, %v3374_v23 }
 0xc61   : > { %4535 = vmatprep.mubr.msk.f32.mxu1 %vm5011_vm4, %v5012_v61 }
 0xc77   : > { %v3329_v45 = vpop.xlane.xlu1 %3328 }
 0xc78   : > { %v3338_v46 = vmul.f32 0.03125, %v3329_v45 }
 0xc7a   : > { %v3343_v51 = vadd.f32 1e-12, %v3338_v46 }
 0xc7c   : > { %v3332_v16 = vpop.xlane.xlu0 %3331  ;;  %4949 = vrsqrt.f32 %v3343_v51 }
 0xc7d   : > { %v3339_v43 = vmul.f32 0.03125, %v3332_v16 }
 0xc7f   : > { %v3344_v57 = vadd.f32 1e-12, %v3339_v43 }
 0xc80   : > { %v3335_v18 = vpop.xlane.xlu1 %3334 }
 0xc81   : > { %4951 = vrsqrt.f32 %v3344_v57  ;;  %v3340_v24 = vmul.f32 0.03125, %v3335_v18 }
 0xc83   : > { %v3345_v20 = vadd.f32 1e-12, %v3340_v24 }
 0xc85   : > { %4953 = vrsqrt.f32 %v3345_v20 }
 0xc86   : > { %v4950_v59 = vpop.eup %4949 }
 0xc87   : > { %v3353_v11 = vmul.f32 %v4950_v59, %v6062_v36 }
 0xc89   : > { %v3364_v1 = vmul.f32 %v4036_v38, %v3353_v11 }
 0xc8b   : > { %v4952_v47 = vpop.eup %4951  ;;  %v3375_v35 = vadd.f32 %v4037_v50, %v3364_v1 }
 0xc8c   : > { %v3354_v12 = vmul.f32 %v4952_v47, %v6067_v31  ;;  %v4698_v31 = vpack.c.bf16 %v3526_v63, %v3525_v26 }
 0xc8d   : > { %4536 = vmatmul.mubr.msk.f32.gmra.mrb[64].mxu1 %vm963_vm3, %v3375_v35 }
 0xc8e   : > { %v3365_v48 = vmul.f32 %v4036_v38, %v3354_v12  ;;  %4538 = vmatprep.mubr.msk.f32.mxu1 %vm5011_vm4, %v5012_v61  ;;  %4699 = vmatpush3.bf16.msra.mxu0 %v4698_v31 }
 0xc8f   : > { %v4954_v40 = vpop.eup %4953  ;;  %4700 = vmatprep.subr.bf16.mxu0 %v5010_v58 }
 0xc90   : > { %v3376_v22 = vadd.f32 %v4037_v50, %v3365_v48  ;;  %v3355_v32 = vmul.f32 %v4954_v40, %v6074_v49  ;;  %v4704_v49 = vpack.c.bf16 %v3530_v55, %v3529_v41 }
 0xc92   : > { %4539 = vmatmul.mubr.msk.f32.gmra.mrb[66].mxu1 %vm963_vm3, %v3376_v22  ;;  %v3366_v36 = vmul.f32 %v4036_v38, %v3355_v32  ;;  %4702 = vmatpush3.bf16.msra.mxu0 %v4701_v39 }
 0xc93   : > { %4541 = vmatprep.mubr.msk.f32.mxu1 %vm5011_vm4, %v5012_v61  ;;  %4703 = vmatprep.subr.bf16.mxu0 %v5010_v58 }
 0xc94   : > { %v3377_v37 = vadd.f32 %v4037_v50, %v3366_v36 }
 0xc96   : > { %4542 = vmatmul.mubr.msk.f32.gmra.mrb[68].mxu1 %vm963_vm3, %v3377_v37  ;;  %4705 = vmatpush3.bf16.msra.mxu0 %v4704_v49  ;;  %v4044_v37 = vld [vmem:[%s6267_s3] ss:$0 sm:$0xff] }
 0xc97   : > { %4706 = vmatprep.subr.bf16.mxu0 %v5010_v58 }
 0xc9a   : > { %4708 = vmatpush3.bf16.msra.mxu0 %v4707_v62 }
 0xc9b   : > { %4709 = vmatprep.subr.bf16.mxu0 %v5010_v58 }
 0xc9e   : > { %4711 = vmatpush3.bf16.msra.mxu0 %v4710_v9 }
 0xd2f   : > { %v3470_v8 = vpop.f32.mrb[60].mxu1 }
 0xd30   : > { %v3471_v3 = vadd.f32 %v4038_v34, %v3470_v8  ;;  %v4531_v53 = vpop.f32.mrb[61].mxu1 }
 0xd32   : > { %v3499_v6 = vmul.f32 0.70710677, %v3471_v3  ;;  %v3494_v5 = vmul.f32 0.5, %v3471_v3 }
 0xd33   : > { %v3475_v13 = vpop.f32.mrb[62].mxu1 }
 0xd34   : > { %4955 = verf.f32 %v3499_v6  ;;  %v3476_v52 = vadd.f32 %v4038_v34, %v3475_v13  ;;  %v4534_v60 = vpop.f32.mrb[63].mxu1  ;;  %v3685_v13 = vld [vmem:[%s6227_s19] sm:$0xff] (!%p4045_p5) }
 0xd35   : > { %v3687_v60 = vld [vmem:[%s6227_s19 + $0x10] sm:$0xff] (!%p4045_p5) }
 0xd36   : > { %v3500_v0 = vmul.f32 0.70710677, %v3476_v52  ;;  %v3495_v17 = vmul.f32 0.5, %v3476_v52  ;;  %v3686_v52 = vld [vmem:[%s6227_s19 + $0x8] sm:$0xff] (!%p4045_p5) }
 0xd38   : > { %4957 = verf.f32 %v3500_v0  ;;  %v5027_v0 = vmov (!%p4045_p5), 0.0|0.0  }
 0xd39   : > { %4712 = vmatprep.subr.bf16.mxu0 (!%p4045_p5), %v5027_v0 }
 0xd3e   : > { %v4956_v58 = vpop.eup %4955 }
 0xd3f   : > { %v3509_v14 = vadd.f32 1.0, %v4956_v58  ;;  %v4713_v58 = vpack.c.bf16 (!%p4045_p5), %v3686_v52, %v3685_v13 }
 0xd41   : > { %v3514_v15 = vmul.f32 %v3509_v14, %v3494_v5  ;;  %v3688_v5 = vld [vmem:[%s6227_s19 + $0x18] sm:$0xff] (!%p4045_p5)  ;;  %v5029_v14 = vmov (!%p4045_p5), 0.0  }
 0xd42   : > { %v4958_v38 = vpop.eup %4957 }
 0xd43   : > { %v3510_v50 = vadd.f32 1.0, %v4958_v38  ;;  %4577 = vmatmul.mubr.f32.vlgmr.msra.gmra.mrb[56].mxu0 %v3514_v15  ;;  %v4716_v15 = vpack.c.bf16 (!%p4045_p5), %v3688_v5, %v3687_v60 }
 0xd44   : > { %4579 = vmatprep.mubr.msk.f32.mxu0 %vm5011_vm4, %v5012_v61  ;;  %4714 = vmatpush3.bf16.msra.mxu0 (!%p4045_p5), %v4713_v58 }
 0xd45   : > { %v3515_v56 = vmul.f32 %v3510_v50, %v3495_v17  ;;  %4715 = vmatprep.subr.bf16.mxu0 (!%p4045_p5), %v5027_v0 }
 0xd47   : > { %4580 = vmatmul.mubr.f32.gmra.mrb[58].mxu0 %v3515_v56 }
 0xd48   : > { %4582 = vmatprep.mubr.msk.f32.mxu0 %vm5011_vm4, %v5012_v61  ;;  %4717 = vmatpush3.bf16.msra.mxu0 (!%p4045_p5), %v4716_v15 }
 0xd60   : > { %v3480_v21 = vpop.f32.mrb[64].mxu1 }
 0xd61   : > { %v3481_v54 = vadd.f32 %v4038_v34, %v3480_v21  ;;  %v4537_v19 = vpop.f32.mrb[65].mxu1  ;;  %v4046_v21 = vld [vmem:[%s6268_s18] ss:$0 sm:$0xff] (!%p4045_p5) }
 0xd62   : > { %v4047_v19 = vld [vmem:[%s6269_s0] ss:$0 sm:$0xff] (!%p4045_p5) }
 0xd63   : > { %v3501_v10 = vmul.f32 0.70710677, %v3481_v54  ;;  %v3496_v20 = vmul.f32 0.5, %v3481_v54 }
 0xd65   : > { %v3485_v23 = vpop.f32.mrb[66].mxu1  ;;  %4959 = verf.f32 %v3501_v10 }
 0xd66   : > { %v3486_v45 = vadd.f32 %v4038_v34, %v3485_v23  ;;  %v4540_v46 = vpop.f32.mrb[67].mxu1 }
 0xd68   : > { %v3502_v51 = vmul.f32 0.70710677, %v3486_v45  ;;  %v3497_v47 = vmul.f32 0.5, %v3486_v45  ;;  %v4048_v45 = vld [vmem:[%s6270_s26] ss:$0 sm:$0xff] (!%p4045_p5) }
 0xd69   : > { %v3490_v16 = vpop.f32.mrb[68].mxu1 }
 0xd6a   : > { %4961 = verf.f32 %v3502_v51  ;;  %v3491_v43 = vadd.f32 %v4038_v34, %v3490_v16  ;;  %v4543_v57 = vpop.f32.mrb[69].mxu1 }
 0xd6c   : > { %v3503_v18 = vmul.f32 0.70710677, %v3491_v43  ;;  %v3498_v40 = vmul.f32 0.5, %v3491_v43 }
 0xd6e   : > { %4963 = verf.f32 %v3503_v18 }
 0xd6f   : > { %v4960_v24 = vpop.eup %4959 }
 0xd70   : > { %v3511_v59 = vadd.f32 1.0, %v4960_v24 }
 0xd72   : > { %v3516_v11 = vmul.f32 %v3511_v59, %v3496_v20 }
 0xd74   : > { %v4962_v1 = vpop.eup %4961  ;;  %4583 = vmatmul.mubr.f32.gmra.mrb[60].mxu0 %v3516_v11 }
 0xd75   : > { %v3512_v35 = vadd.f32 1.0, %v4962_v1  ;;  %4585 = vmatprep.mubr.msk.f32.mxu0 %vm5011_vm4, %v5012_v61 }
 0xd77   : > { %v3517_v12 = vmul.f32 %v3512_v35, %v3497_v47 }
 0xd78   : > { %v4964_v48 = vpop.eup %4963 }
 0xd79   : > { %4586 = vmatmul.mubr.f32.gmra.mrb[62].mxu0 %v3517_v12  ;;  %v3513_v22 = vadd.f32 1.0, %v4964_v48 }
 0xd7a   : > { %4588 = vmatprep.mubr.msk.f32.mxu0 %vm5011_vm4, %v5012_v61  ;;  %vm3651_vm4 = vcmask (!%p4045_p5), 253952  }
 0xd7b   : > { %v3518_v32 = vmul.f32 %v3513_v22, %v3498_v40 }
 0xd7d   : > { %4589 = vmatmul.mubr.f32.gmra.mrb[64].mxu0 %v3518_v32 }
 0xe16   : > { %v3601_v36 = vpop.f32.mrb[56].mxu0 }
 0xe17   : > { %v3625_v26 = vadd.f32 %v3601_v36, %v6028_v27  ;;  %v4578_v63 = vpop.f32.mrb[57].mxu0 }
 0xe19   : > { %v3637_v31 = vadd.f32 %v4044_v37, %v3625_v26 }
 0xe1a   : > { %v3606_v44 = vpop.f32.mrb[58].mxu0 }
 0xe1b   : > { %3642 = vst.msk [vmem:[#allocation2] sm:$0xff] %vm963_vm3, %v3637_v31  ;;  %v3626_v28 = vadd.f32 %v3606_v44, %v6032_v42  ;;  %v4581_v39 = vpop.f32.mrb[59].mxu0 }
 0xe1c   : > { %3652 = vst.msk [vmem:[#allocation4] sm:$0x1] (!%p4045_p5), %vm3651_vm4, %v3637_v31 }
 0xe1d   : > { %v3638_v41 = vadd.f32 %v4044_v37, %v3626_v28 }
 0xe1f   : > { %3643 = vst.msk [vmem:[#allocation2 + $0x8] sm:$0xff] %vm963_vm3, %v3638_v41 }
 0xe47   : > { %v3611_v61 = vpop.f32.mrb[60].mxu0 }
 0xe48   : > { %v3627_v55 = vadd.f32 %v3611_v61, %v6036_v4  ;;  %v4584_v49 = vpop.f32.mrb[61].mxu0 }
 0xe4a   : > { %v3639_v30 = vadd.f32 %v4044_v37, %v3627_v55 }
 0xe4c   : > { %v3616_v7 = vpop.f32.mrb[62].mxu0  ;;  %3644 = vst.msk [vmem:[#allocation2 + $0x10] sm:$0xff] %vm963_vm3, %v3639_v30 }
 0xe4d   : > { %v3628_v27 = vadd.f32 %v3616_v7, %v6040_v2  ;;  %v4587_v62 = vpop.f32.mrb[63].mxu0  ;;  %3654 = vst.msk [vmem:[#allocation4] sm:$0x2] (!%p4045_p5), %vm3653_vm6, %v3639_v30 }
 0xe4f   : > { %v3640_v33 = vadd.f32 %v4044_v37, %v3628_v27  ;;  %3650 = sbr.rel (%p4045_p5) target bundleno = 4197 (0x1065), region = 112 }
 0xe50   : > { %v3621_v29 = vpop.f32.mrb[64].mxu0 }
 0xe51   : > { %3645 = vst.msk [vmem:[#allocation2 + $0x18] sm:$0xff] %vm963_vm3, %v3640_v33  ;;  %v3629_v42 = vadd.f32 %v3621_v29, %v6044_v25  ;;  %v4590_v9 = vpop.f32.mrb[65].mxu0 }
 0xe53   : > { %v3641_v34 = vadd.f32 %v4044_v37, %v3629_v42 }
 0xe54   : > { %v3655_v4 = vld [vmem:[#allocation4] sm:$0x3] (!%p4045_p5) }
 0xe55   : > { %3646 = vst.msk [vmem:[#allocation2 + $0x20] sm:$0x3] %vm976_vm5, %v3641_v34  ;;  %v3658_v2 = vsel (!%p4045_p5), %vm976_vm5, %v3655_v4, 0.0 }
 0xe56   : > { %3659 = vadd.xlane.f32.xlu0 %v3658_v2 }
 0xee3   : > { %v3660_v8 = vpop.xlane.xlu0 %3659 }
 0xee4   : > { %v3661_v3 = vmul.f32 0.03125, %v3660_v8 }
 0xee6   : > { %v3662_v53 = vsub.f32 %v3655_v4, %v3661_v3 }
 0xee8   : > { %v3663_v6 = vmul.f32 %v3662_v53, %v3662_v53 }
 0xeea   : > { %v3664_v25 = vsel %vm976_vm5, %v3663_v6, 0.0  ;;  %vm5028_vm5 = vmmov 0  }
 0xeeb   : > { %3665 = vadd.xlane.f32.xlu0 %v3664_v25  ;;  %4599 = vmatprep.mubr.msk.f32.mxu0 %vm5028_vm5, %v5029_v14 }
 0xf78   : > { %v3666_v38 = vpop.xlane.xlu0 %3665 }
 0xf79   : > { %v3667_v17 = vmul.f32 0.03125, %v3666_v38 }
 0xf7b   : > { %v3668_v50 = vadd.f32 1e-12, %v3667_v17 }
 0xf7d   : > { %4970 = vrsqrt.f32 %v3668_v50 }
 0xf87   : > { %v4971_v56 = vpop.eup %4970 }
 0xf88   : > { %v3670_v54 = vmul.f32 %v4971_v56, %v3662_v53 }
 0xf8a   : > { %v3677_v10 = vmul.f32 %v4046_v21, %v3670_v54 }
 0xf8c   : > { %v3684_v23 = vadd.f32 %v4047_v19, %v3677_v10 }
 0xf8e   : > { %4600 = vmatmul.mubr.msk.f32.vlgmr.msra.gmra.mrb[0].mxu0 %vm963_vm3, %v3684_v23 }
0x1061   : > { %v3765_v46 = vpop.f32.mrb[0].mxu0 }
0x1062   : > { %v3766_v51 = vadd.f32 %v4048_v45, %v3765_v46  ;;  %v4601_v16 = vpop.f32.mrb[1].mxu0 }
0x1064   : > { %3769 = vst [vmem:[#allocation5] sm:$0x3] %v3766_v51 }
0x1065 PF: > { %p4728_p6 = scmp.eq.s32.totalorder %s5147_s25, 1  ;;  %s5030_s17 = smov [#allocation5]  }
0x1066   : > { %s3777_s20 = sshll.u32 %s5030_s17, 4  ;;  %s3778_s20 = int_to_ptr.vmem [resolvable:$true] %s3777_s20 }
0x1067   : > { %s4972_s29 = scalar_lea.vmem %s3778_s20, 32  ;;  %p4979_p10 = scmp.lt.s32.totalorder %s3778_s20, %s3778_s20 }
0x1068   : > { %p4973_p7 = scmp.ne.s32.totalorder %s3778_s20, %s4972_s29  ;;  %p4980_p11 = scmp.lt.s32.totalorder %s4972_s29, %s4972_s29 }
0x106a   : > { %p4974_p8 = pnand %p4973_p7, %p4728_p6  ;;  %p4981_p12 = por %p4980_p11, %p4979_p10 }
0x106c   : > { %p4975_p9 = pneg %p4974_p8 }
0x106e   : > { %p4982_p13 = pnand %p4981_p12, %p4975_p9 }
0x1070   : > { %4985 = shalt.err (!%p4982_p13)
}
0x1071   : > { %s6271_s30 = sld [smem:[#allocation20_spill]] }
0x1077   : > { %s4986_s4 = scalar_lea.hbm %s6271_s30, 32 }
0x1078   : > { %p4987_p0 = scmp.ne.s32.totalorder %s6271_s30, %s4986_s4  ;;  %p4992_p3 = scmp.lt.u32.totalorder %s4986_s4, %s6271_s30 }
0x107a   : > { %p4988_p1 = pnand %p4987_p0, %p4728_p6 }
0x107c   : > { %p4989_p2 = pneg %p4988_p1 }
0x107e   : > { %p4994_p4 = pnand %p4992_p3, %p4989_p2 }
0x1080   : > { %4997 = shalt.err (!%p4994_p4)
}
0x1081   : > { %4725 = dma.vmem_to_hbm [thread:$0]  (%p4728_p6), %s3778_s20, 32, %s6271_s30, [#allocation6]  }
0x1082   : > { %5003 = dma.done.wait (%p4728_p6), [#allocation6], 32  }
0x1083   : > { %5005 = vsyncadd (%p4728_p6), [#allocation6], 4294967264 }
0x1084 PF: > { %s6272_s2 = sld [smem:[#allocation8_spill]] }
0x108a   : > { %s32_s2 = sadd.s32 1, %s6272_s2  }
0x108b   : > { %p29_p5 = scmp.ge.s32.totalorder %s32_s2, 4  }
0x108d   :  { %31 = sbr.rel (!%p29_p5) target bundleno = 14 (0xe), region = 172 }
0x1094   :  { %3790 = vsyncpa [#allocation6], 1 }
0x1095   :  { %3792 = vsyncpa [#allocation6 + $0x1], 1 }

</bundles_post_ra>
